<compile_context>
chip_gen: v7x
topology: tpu7x:2x2x1
jax: 0.10.0
libtpu: 0.0.40
codegen_flags: <defaults>
</compile_context>

<pallas_src>
import math

import jax
import jax.numpy as jnp
from jax.experimental import pallas as pl
from jax.experimental.pallas import tpu as pltpu


# ----------------------------------------------------------------------------
# Reduced ViT configuration (see TODO above)
# ----------------------------------------------------------------------------
BATCH = 2
IN_CH = 3
IMG = 64                                # image height == width
PATCH = 16                              # ViT-B/16 patch size
N_PATCH = (IMG // PATCH) ** 2           # 16 patches
TOKENS = N_PATCH + 1                    # +1 CLS token = 17
T_PAD = 24                              # token count padded to a multiple of 8
PATCH_DIM = PATCH * PATCH * IN_CH       # 768  (lane-dense: 6 * 128)
D_MODEL = 128                           # TODO(synk): 768 in vit_base_patch16_224
DEPTH = 2                               # TODO(synk): 12 blocks in vit_base_patch16_224
NUM_HEADS = 2                           # TODO(synk): 12 heads in vit_base_patch16_224
HEAD_DIM = D_MODEL // NUM_HEADS         # 64
D_MLP = 4 * D_MODEL                     # 512
EMB_SIZE = 32                           # encoder (nn.Linear) output size
EMB_PAD = 128                           # lane-dense output slab (sliced outside)
LN_EPS = 1e-6

# Images stacked per grid step.  BATCH (all images fused) is best on single-TC
# v5e/v6e; on v7x set BATCH_BLOCK = BATCH // 2 so the "parallel" batch-block axis
# is split across the two TensorCores.
BATCH_BLOCK = BATCH

_LAYER_PARAM_NAMES = ("ln1_w", "ln1_b", "qkv_w", "qkv_b", "proj_w", "proj_b",
                      "ln2_w", "ln2_b", "fc1_w", "fc1_b", "fc2_w", "fc2_b")


# ----------------------------------------------------------------------------
# Math shared by the Pallas kernel and the pure-JAX reference
# ----------------------------------------------------------------------------
def _mm(a, w):
    """MXU matmul: bf16 operands, f32 accumulation."""
    return jnp.dot(a.astype(jnp.bfloat16), w.astype(jnp.bfloat16),
                   preferred_element_type=jnp.float32)


def _layer_norm(x, w, b):
    mu = jnp.mean(x, axis=-1, keepdims=True)
    xc = x - mu
    var = jnp.mean(xc * xc, axis=-1, keepdims=True)
    return xc * jax.lax.rsqrt(var + LN_EPS) * w + b


def _gelu(x):
    # tanh-approx GELU. TODO(synk): timm ViT uses exact erf GELU.
    c = math.sqrt(2.0 / math.pi)
    return 0.5 * x * (1.0 + jnp.tanh(c * (x + 0.044715 * x * x * x)))


def _transformer_block(tok, weights, *, bb, recip):
    """One pre-LN transformer block on a (bb*T_PAD, D_MODEL) f32 token matrix.

    All images' tokens are stacked along rows; QKV / proj / MLP matmuls run on the
    full stack, attention is computed with (image, head) as a single leading batch
    dim of one einsum pair.  Padded key columns (token index >= TOKENS) are masked.
    """
    (ln1_w, ln1_b, qkv_w, qkv_b, proj_w, proj_b,
     ln2_w, ln2_b, fc1_w, fc1_b, fc2_w, fc2_b) = weights

    # ---- multi-head self-attention ----
    h = _layer_norm(tok, ln1_w, ln1_b)
    qkv = _mm(h, qkv_w) + qkv_b                                    # (bb*T, 3D) f32

    def head_stack(lane_off):
        # gather per-(image, head) (T_PAD, HEAD_DIM) slices into one leading batch dim
        sl = [qkv[b * T_PAD:(b + 1) * T_PAD,
                  lane_off + hd * HEAD_DIM: lane_off + (hd + 1) * HEAD_DIM]
              for b in range(bb) for hd in range(NUM_HEADS)]
        return jnp.stack(sl).astype(jnp.bfloat16)                  # (bb*H, T, HD) bf16

    q = head_stack(0)
    k = head_stack(D_MODEL)
    v = head_stack(2 * D_MODEL)

    # key-padding mask: tokens >= TOKENS (zero-pad rows) must not be attended to
    kpos = jax.lax.broadcasted_iota(jnp.int32, (1, 1, T_PAD), 2)
    key_bias = jnp.where(kpos >= TOKENS, jnp.float32(-1e9), jnp.float32(0.0))

    s = jnp.einsum('bqd,bkd->bqk', q, k,
                   preferred_element_type=jnp.float32)             # (bb*H, T, T)
    s = s * (1.0 / math.sqrt(HEAD_DIM)) + key_bias
    s = s - jnp.max(s, axis=-1, keepdims=True)
    p = jnp.exp(s)
    p = p * recip(jnp.sum(p, axis=-1, keepdims=True))              # EUP recip in-kernel
    o = jnp.einsum('bqk,bkd->bqd', p.astype(jnp.bfloat16), v,
                   preferred_element_type=jnp.float32)             # (bb*H, T, HD)

    # re-assemble (bb*T, D): heads concatenated on lanes, images on rows
    attn = jnp.concatenate([
        jnp.concatenate([o[b * NUM_HEADS + hd] for hd in range(NUM_HEADS)], axis=-1)
        for b in range(bb)], axis=0)                               # (bb*T, D) f32

    # single fused output projection for all images and heads
    tok = tok + _mm(attn, proj_w) + proj_b

    # ---- MLP ----
    h2 = _layer_norm(tok, ln2_w, ln2_b)
    h2 = _gelu(_mm(h2, fc1_w) + fc1_b)
    tok = tok + _mm(h2, fc2_w) + fc2_b
    return tok


def _cls_head(tok, lnf_w, lnf_b, enc_w, enc_b, *, bb):
    """CLS pooling -> final LN -> encoder Linear, on (bb, D) only (CLS sliced first)."""
    cls = jnp.concatenate([tok[b * T_PAD:b * T_PAD + 1, :] for b in range(bb)], axis=0)
    cls = _layer_norm(cls, lnf_w, lnf_b)
    return _mm(cls, enc_w) + enc_b                                 # (bb, EMB_PAD) f32


# ----------------------------------------------------------------------------
# Pallas kernel: grid = (batch_blocks, DEPTH); per-layer weights streamed over the
# depth axis, token state carried in a persistent VMEM scratch.
# ----------------------------------------------------------------------------
def vit_encoder_kernel(patch_ref, pos_ref, pw_ref,
                       ln1w_ref, ln1b_ref, qkvw_ref, qkvb_ref,
                       projw_ref, projb_ref, ln2w_ref, ln2b_ref,
                       fc1w_ref, fc1b_ref, fc2w_ref, fc2b_ref,
                       lnfw_ref, lnfb_ref, encw_ref, encb_ref,
                       out_ref, tok_ref):
    """patch_ref: (BB*T_PAD, PATCH_DIM) bf16; CLS slot and pad rows are zero
    pos_ref:   (BB*T_PAD, D_MODEL) f32 pos-emb with CLS token + patch bias folded in
    pw_ref:    (PATCH_DIM, D_MODEL) bf16 patch-embedding weight
    *_ref (layer params): (1, ., .) block of the (DEPTH, ., .) stack for this layer
    out_ref:   (BB, EMB_PAD) f32 lane-dense encoder output slab
    tok_ref:   (BB*T_PAD, D_MODEL) f32 VMEM scratch carrying tokens across layers
    """
    l = pl.program_id(1)

    # ---- layer-0 prologue: patch embedding on the MXU + folded positional table ----
    @pl.when(l == 0)
    def _():
        tok_ref[...] = (jnp.dot(patch_ref[...], pw_ref[...],
                                preferred_element_type=jnp.float32)
                        + pos_ref[...])

    # ---- transformer block l (weights for this layer streamed into VMEM) ----
    weights = (ln1w_ref[0], ln1b_ref[0], qkvw_ref[0], qkvb_ref[0],
               projw_ref[0], projb_ref[0], ln2w_ref[0], ln2b_ref[0],
               fc1w_ref[0], fc1b_ref[0], fc2w_ref[0], fc2b_ref[0])
    tok = _transformer_block(tok_ref[...], weights, bb=BATCH_BLOCK,
                             recip=lambda x: pl.reciprocal(x, approx=True))
    tok_ref[...] = tok

    # ---- last-layer epilogue: CLS -> final LN -> encoder Linear ----
    @pl.when(l == DEPTH - 1)
    def _():
        out_ref[...] = _cls_head(tok, lnfw_ref[...], lnfb_ref[...],
                                 encw_ref[...], encb_ref[...], bb=BATCH_BLOCK)


# ----------------------------------------------------------------------------
# Wrapper glue: patchify, parameter folding/padding, pallas_call
# ----------------------------------------------------------------------------
def _patchify(img_nchw):
    """Non-overlapping ViT patchify: (B,C,H,W) -> (B, N_PATCH, PATCH_DIM).
    No data duplication (each pixel appears once), unlike conv im2col."""
    b, c, h, w = img_nchw.shape
    x = jnp.transpose(img_nchw, (0, 2, 3, 1))                      # NHWC
    x = x.reshape(b, h // PATCH, PATCH, w // PATCH, PATCH, c)
    x = jnp.transpose(x, (0, 1, 3, 2, 4, 5))                       # B,hp,wp,ph,pw,C
    return x.reshape(b, (h // PATCH) * (w // PATCH), PATCH * PATCH * c)


def _prepare_inputs(img, params):
    """Layout plumbing only: patchify, pad tokens 17->24 with zero rows (CLS slot at
    row 0, pad rows at the end), fold the CLS token + patch-embed bias into the
    positional table, stack the batch along rows, pad the encoder head to a
    lane-dense 128-wide slab, and cast matmul operands to bf16."""
    x = img.astype(jnp.float32)
    patches = _patchify(x)                                         # (B, N_PATCH, PATCH_DIM)
    b = patches.shape[0]

    patches_pad = jnp.zeros((b, T_PAD, PATCH_DIM), jnp.float32)
    patches_pad = patches_pad.at[:, 1:1 + N_PATCH, :].set(patches)  # row 0 = CLS slot
    patches_flat = patches_pad.reshape(b * T_PAD, PATCH_DIM).astype(jnp.bfloat16)

    pos_one = jnp.zeros((T_PAD, D_MODEL), jnp.float32)
    pos_one = pos_one.at[:TOKENS].set(params["pos_emb"])
    pos_one = pos_one.at[0].add(params["cls_token"][0])            # token 0 = CLS + pos[0]
    pos_one = pos_one.at[1:TOKENS].add(params["patch_b"][0])       # fold patch-embed bias
    pos_flat = jnp.tile(pos_one, (b, 1))                           # (B*T_PAD, D_MODEL)

    enc_w = jnp.pad(params["enc_w"], ((0, 0), (0, EMB_PAD - EMB_SIZE)))
    enc_b = jnp.pad(params["enc_b"], ((0, 0), (0, EMB_PAD - EMB_SIZE)))

    bf16 = lambda a: a.astype(jnp.bfloat16)
    kp = {
        "patch_w": bf16(params["patch_w"]),
        "ln1_w": params["ln1_w"], "ln1_b": params["ln1_b"],
        "qkv_w": bf16(params["qkv_w"]), "qkv_b": params["qkv_b"],
        "proj_w": bf16(params["proj_w"]), "proj_b": params["proj_b"],
        "ln2_w": params["ln2_w"], "ln2_b": params["ln2_b"],
        "fc1_w": bf16(params["fc1_w"]), "fc1_b": params["fc1_b"],
        "fc2_w": bf16(params["fc2_w"]), "fc2_b": params["fc2_b"],
        "lnf_w": params["lnf_w"], "lnf_b": params["lnf_b"],
        "enc_w": bf16(enc_w), "enc_b": enc_b,
    }
    return patches_flat, pos_flat, kp


@jax.jit
def label_projector_vit_forward(img, params):
    # img.squeeze() in the reference: drop a possible singleton dim, e.g. (B,1,C,H,W)
    if img.ndim == 5 and img.shape[1] == 1:
        img = img[:, 0]
    patches_flat, pos_flat, kp = _prepare_inputs(img, params)
    batch = img.shape[0]
    assert batch % BATCH_BLOCK == 0
    nb = batch // BATCH_BLOCK

    _const2 = lambda b, l: (0, 0)        # constant-index 2-D blocks (stay in VMEM)
    _layer3 = lambda b, l: (l, 0, 0)     # depth-streamed (DEPTH, ., .) blocks
    _batch2 = lambda b, l: (b, 0)        # batch-block indexed rows / outputs

    out_pad = pl.pallas_call(
        vit_encoder_kernel,
        out_shape=jax.ShapeDtypeStruct((batch, EMB_PAD), jnp.float32),
        grid=(nb, DEPTH),
        in_specs=[
            pl.BlockSpec((BATCH_BLOCK * T_PAD, PATCH_DIM), _batch2),   # patches
            pl.BlockSpec((BATCH_BLOCK * T_PAD, D_MODEL), _batch2),     # pos table
            pl.BlockSpec((PATCH_DIM, D_MODEL), _const2),               # patch_w
            pl.BlockSpec((1, 1, D_MODEL), _layer3),                    # ln1_w
            pl.BlockSpec((1, 1, D_MODEL), _layer3),                    # ln1_b
            pl.BlockSpec((1, D_MODEL, 3 * D_MODEL), _layer3),          # qkv_w
            pl.BlockSpec((1, 1, 3 * D_MODEL), _layer3),                # qkv_b
            pl.BlockSpec((1, D_MODEL, D_MODEL), _layer3),              # proj_w
            pl.BlockSpec((1, 1, D_MODEL), _layer3),                    # proj_b
            pl.BlockSpec((1, 1, D_MODEL), _layer3),                    # ln2_w
            pl.BlockSpec((1, 1, D_MODEL), _layer3),                    # ln2_b
            pl.BlockSpec((1, D_MODEL, D_MLP), _layer3),                # fc1_w
            pl.BlockSpec((1, 1, D_MLP), _layer3),                      # fc1_b
            pl.BlockSpec((1, D_MLP, D_MODEL), _layer3),                # fc2_w
            pl.BlockSpec((1, 1, D_MODEL), _layer3),                    # fc2_b
            pl.BlockSpec((1, D_MODEL), _const2),                       # lnf_w
            pl.BlockSpec((1, D_MODEL), _const2),                       # lnf_b
            pl.BlockSpec((D_MODEL, EMB_PAD), _const2),                 # enc_w
            pl.BlockSpec((1, EMB_PAD), _const2),                       # enc_b
        ],
        out_specs=pl.BlockSpec((BATCH_BLOCK, EMB_PAD), _batch2),
        scratch_shapes=[pltpu.VMEM((BATCH_BLOCK * T_PAD, D_MODEL), jnp.float32)],
        compiler_params=pltpu.CompilerParams(
            # batch-block axis "parallel" (v7x dual-TC split), depth axis "arbitrary"
            # because the token state in scratch is carried layer-to-layer.
            dimension_semantics=("parallel", "arbitrary"),
            vmem_limit_bytes=32 * 1024 * 1024,
        ),
    )(patches_flat, pos_flat, kp["patch_w"],
      kp["ln1_w"], kp["ln1_b"], kp["qkv_w"], kp["qkv_b"],
      kp["proj_w"], kp["proj_b"], kp["ln2_w"], kp["ln2_b"],
      kp["fc1_w"], kp["fc1_b"], kp["fc2_w"], kp["fc2_b"],
      kp["lnf_w"], kp["lnf_b"], kp["enc_w"], kp["enc_b"])

    return out_pad[:, :EMB_SIZE]


def _reference_forward(patches_flat, pos_flat, kp):
    """Pure-JAX (no Pallas) forward over the same prepared inputs / same math."""
    tok = jnp.dot(patches_flat.astype(jnp.bfloat16), kp["patch_w"],
                  preferred_element_type=jnp.float32) + pos_flat
    for l in range(DEPTH):
        weights = tuple(kp[n][l] for n in _LAYER_PARAM_NAMES)
        tok = _transformer_block(tok, weights, bb=BATCH, recip=lambda x: 1.0 / x)
    out = _cls_head(tok, kp["lnf_w"], kp["lnf_b"], kp["enc_w"], kp["enc_b"], bb=BATCH)
    return out[:, :EMB_SIZE]


def init_params(key):
    """Deterministic synthetic parameters (no pretrained checkpoint)."""
    ks = jax.random.split(key, 16)
    s = 0.02
    nrm = lambda k, shape: s * jax.random.normal(k, shape, jnp.float32)
    ones = lambda shape: jnp.ones(shape, jnp.float32)
    zeros = lambda shape: jnp.zeros(shape, jnp.float32)
    return {
        "patch_w": nrm(ks[0], (PATCH_DIM, D_MODEL)),
        "patch_b": nrm(ks[1], (1, D_MODEL)),
        "cls_token": nrm(ks[2], (1, D_MODEL)),
        "pos_emb": nrm(ks[3], (TOKENS, D_MODEL)),
        "ln1_w": ones((DEPTH, 1, D_MODEL)), "ln1_b": zeros((DEPTH, 1, D_MODEL)),
        "qkv_w": nrm(ks[4], (DEPTH, D_MODEL, 3 * D_MODEL)),
        "qkv_b": nrm(ks[5], (DEPTH, 1, 3 * D_MODEL)),
        "proj_w": nrm(ks[6], (DEPTH, D_MODEL, D_MODEL)),
        "proj_b": nrm(ks[7], (DEPTH, 1, D_MODEL)),
        "ln2_w": ones((DEPTH, 1, D_MODEL)), "ln2_b": zeros((DEPTH, 1, D_MODEL)),
        "fc1_w": nrm(ks[8], (DEPTH, D_MODEL, D_MLP)),
        "fc1_b": nrm(ks[9], (DEPTH, 1, D_MLP)),
        "fc2_w": nrm(ks[10], (DEPTH, D_MLP, D_MODEL)),
        "fc2_b": nrm(ks[11], (DEPTH, 1, D_MODEL)),
        "lnf_w": ones((1, D_MODEL)), "lnf_b": zeros((1, D_MODEL)),
        "enc_w": nrm(ks[12], (D_MODEL, EMB_SIZE)),
        "enc_b": nrm(ks[13], (1, EMB_SIZE)),
    }


if __name__ == "__main__":
    key = jax.random.PRNGKey(0)
    k_img, k_par = jax.random.split(key)
    img = jax.random.normal(k_img, (BATCH, IN_CH, IMG, IMG), jnp.float32)
    params = init_params(k_par)

    out = label_projector_vit_forward(img, params)
    jax.block_until_ready(out)
    assert out.shape == (BATCH, EMB_SIZE)

    # numerical check vs a pure-JAX reference sharing the same math / bf16 casts
    # (only difference: exact divide vs pl.reciprocal(approx=True) in the softmax)
    patches_flat, pos_flat, kp = _prepare_inputs(img, params)
    ref = jax.jit(_reference_forward)(patches_flat, pos_flat, kp)
    err = float(jnp.max(jnp.abs(out - ref)))
    assert err < 5e-2, f"kernel/reference mismatch: max abs err = {err}"

    print("KERNEL_OK")
</pallas_src>

<mosaic_0001>
module attributes {stable_mosaic.version = 11 : i64} {
  func.func @vit_encoder_kernel(%arg0: i32, %arg1: i32, %arg2: memref<48x768xbf16, #tpu.memory_space<vmem>>, %arg3: memref<48x128xf32, #tpu.memory_space<vmem>>, %arg4: memref<768x128xbf16, #tpu.memory_space<vmem>>, %arg5: memref<1x1x128xf32, #tpu.memory_space<vmem>>, %arg6: memref<1x1x128xf32, #tpu.memory_space<vmem>>, %arg7: memref<1x128x384xbf16, #tpu.memory_space<vmem>>, %arg8: memref<1x1x384xf32, #tpu.memory_space<vmem>>, %arg9: memref<1x128x128xbf16, #tpu.memory_space<vmem>>, %arg10: memref<1x1x128xf32, #tpu.memory_space<vmem>>, %arg11: memref<1x1x128xf32, #tpu.memory_space<vmem>>, %arg12: memref<1x1x128xf32, #tpu.memory_space<vmem>>, %arg13: memref<1x128x512xbf16, #tpu.memory_space<vmem>>, %arg14: memref<1x1x512xf32, #tpu.memory_space<vmem>>, %arg15: memref<1x512x128xbf16, #tpu.memory_space<vmem>>, %arg16: memref<1x1x128xf32, #tpu.memory_space<vmem>>, %arg17: memref<1x128xf32, #tpu.memory_space<vmem>>, %arg18: memref<1x128xf32, #tpu.memory_space<vmem>>, %arg19: memref<128x128xbf16, #tpu.memory_space<vmem>>, %arg20: memref<1x128xf32, #tpu.memory_space<vmem>>, %arg21: memref<2x128xf32, #tpu.memory_space<vmem>>, %arg22: memref<48x128xf32, #tpu.memory_space<vmem>>) attributes {dimension_semantics = [#tpu.dimension_semantics<parallel>, #tpu.dimension_semantics<arbitrary>], iteration_bounds = array<i64: 1, 2>, scalar_prefetch = 0 : i64, scratch_operands = 1 : i64, tpu.core_type = #tpu.core_type<tc>, window_params = [{transform_indices = @transform_0, window_bounds = array<i64: 48, 768>}, {transform_indices = @transform_1, window_bounds = array<i64: 48, 128>}, {pipeline_mode = #tpu.pipeline_mode<synchronous>, transform_indices = @transform_2, window_bounds = array<i64: 768, 128>}, {transform_indices = @transform_3, window_bounds = array<i64: 1, 1, 128>}, {transform_indices = @transform_4, window_bounds = array<i64: 1, 1, 128>}, {transform_indices = @transform_5, window_bounds = array<i64: 1, 128, 384>}, {transform_indices = @transform_6, window_bounds = array<i64: 1, 1, 384>}, {transform_indices = @transform_7, window_bounds = array<i64: 1, 128, 128>}, {transform_indices = @transform_8, window_bounds = array<i64: 1, 1, 128>}, {transform_indices = @transform_9, window_bounds = array<i64: 1, 1, 128>}, {transform_indices = @transform_10, window_bounds = array<i64: 1, 1, 128>}, {transform_indices = @transform_11, window_bounds = array<i64: 1, 128, 512>}, {transform_indices = @transform_12, window_bounds = array<i64: 1, 1, 512>}, {transform_indices = @transform_13, window_bounds = array<i64: 1, 512, 128>}, {transform_indices = @transform_14, window_bounds = array<i64: 1, 1, 128>}, {pipeline_mode = #tpu.pipeline_mode<synchronous>, transform_indices = @transform_15, window_bounds = array<i64: 1, 128>}, {pipeline_mode = #tpu.pipeline_mode<synchronous>, transform_indices = @transform_16, window_bounds = array<i64: 1, 128>}, {pipeline_mode = #tpu.pipeline_mode<synchronous>, transform_indices = @transform_17, window_bounds = array<i64: 128, 128>}, {pipeline_mode = #tpu.pipeline_mode<synchronous>, transform_indices = @transform_18, window_bounds = array<i64: 1, 128>}, {transform_indices = @transform_19, window_bounds = array<i64: 2, 128>}]} {
    %c0_i32 = arith.constant 0 : i32
    %0 = arith.cmpi eq, %arg1, %c0_i32 : i32
    %1 = arith.extui %0 : i1 to i32
    %c0_i32_0 = arith.constant 0 : i32
    %2 = arith.cmpi ne, %1, %c0_i32_0 : i32
    scf.if %2 {
      %c0_65 = arith.constant 0 : index
      %c0_66 = arith.constant 0 : index
      %167 = vector.load %arg2[%c0_65, %c0_66] : memref<48x768xbf16, #tpu.memory_space<vmem>>, vector<48x768xbf16>
      %c0_67 = arith.constant 0 : index
      %c0_68 = arith.constant 0 : index
      %168 = vector.load %arg4[%c0_67, %c0_68] : memref<768x128xbf16, #tpu.memory_space<vmem>>, vector<768x128xbf16>
      %cst_69 = arith.constant dense<0.000000e+00> : vector<48x128xf32>
      %169 = tpu.matmul %167, %168, %cst_69 {dimension_numbers = #tpu.dot_dimension_numbers<[1], [0], [0], [1], [0, 0, 1, 1], [], []>} : vector<48x768xbf16>, vector<768x128xbf16>, vector<48x128xf32> -> vector<48x128xf32>
      %c0_70 = arith.constant 0 : index
      %c0_71 = arith.constant 0 : index
      %170 = vector.load %arg3[%c0_70, %c0_71] : memref<48x128xf32, #tpu.memory_space<vmem>>, vector<48x128xf32>
      %171 = arith.addf %169, %170 : vector<48x128xf32>
      %c0_72 = arith.constant 0 : index
      %c0_73 = arith.constant 0 : index
      %172 = vector.load %arg22[%c0_72, %c0_73] : memref<48x128xf32, #tpu.memory_space<vmem>>, vector<48x128xf32>
      tpu.vector_store %arg22[%c0_72, %c0_73], %171 {strides = array<i32>} : memref<48x128xf32, #tpu.memory_space<vmem>>, vector<48x128xf32>,
    } else {
    }
    %c0 = arith.constant 0 : index
    %c0_1 = arith.constant 0 : index
    %c0_2 = arith.constant 0 : index
    %3 = vector.load %arg5[%c0, %c0_1, %c0_2] : memref<1x1x128xf32, #tpu.memory_space<vmem>>, vector<1x1x128xf32>
    %4 = vector.shape_cast %3 : vector<1x1x128xf32> to vector<1x128xf32>
    %c0_3 = arith.constant 0 : index
    %c0_4 = arith.constant 0 : index
    %c0_5 = arith.constant 0 : index
    %5 = vector.load %arg6[%c0_3, %c0_4, %c0_5] : memref<1x1x128xf32, #tpu.memory_space<vmem>>, vector<1x1x128xf32>
    %6 = vector.shape_cast %5 : vector<1x1x128xf32> to vector<1x128xf32>
    %c0_6 = arith.constant 0 : index
    %c0_7 = arith.constant 0 : index
    %c0_8 = arith.constant 0 : index
    %7 = vector.load %arg7[%c0_6, %c0_7, %c0_8] : memref<1x128x384xbf16, #tpu.memory_space<vmem>>, vector<1x128x384xbf16>
    %8 = vector.shape_cast %7 : vector<1x128x384xbf16> to vector<128x384xbf16>
    %c0_9 = arith.constant 0 : index
    %c0_10 = arith.constant 0 : index
    %c0_11 = arith.constant 0 : index
    %9 = vector.load %arg8[%c0_9, %c0_10, %c0_11] : memref<1x1x384xf32, #tpu.memory_space<vmem>>, vector<1x1x384xf32>
    %10 = vector.shape_cast %9 : vector<1x1x384xf32> to vector<1x384xf32>
    %c0_12 = arith.constant 0 : index
    %c0_13 = arith.constant 0 : index
    %c0_14 = arith.constant 0 : index
    %11 = vector.load %arg9[%c0_12, %c0_13, %c0_14] : memref<1x128x128xbf16, #tpu.memory_space<vmem>>, vector<1x128x128xbf16>
    %12 = vector.shape_cast %11 : vector<1x128x128xbf16> to vector<128x128xbf16>
    %c0_15 = arith.constant 0 : index
    %c0_16 = arith.constant 0 : index
    %c0_17 = arith.constant 0 : index
    %13 = vector.load %arg10[%c0_15, %c0_16, %c0_17] : memref<1x1x128xf32, #tpu.memory_space<vmem>>, vector<1x1x128xf32>
    %14 = vector.shape_cast %13 : vector<1x1x128xf32> to vector<1x128xf32>
    %c0_18 = arith.constant 0 : index
    %c0_19 = arith.constant 0 : index
    %c0_20 = arith.constant 0 : index
    %15 = vector.load %arg11[%c0_18, %c0_19, %c0_20] : memref<1x1x128xf32, #tpu.memory_space<vmem>>, vector<1x1x128xf32>
    %16 = vector.shape_cast %15 : vector<1x1x128xf32> to vector<1x128xf32>
    %c0_21 = arith.constant 0 : index
    %c0_22 = arith.constant 0 : index
    %c0_23 = arith.constant 0 : index
    %17 = vector.load %arg12[%c0_21, %c0_22, %c0_23] : memref<1x1x128xf32, #tpu.memory_space<vmem>>, vector<1x1x128xf32>
    %18 = vector.shape_cast %17 : vector<1x1x128xf32> to vector<1x128xf32>
    %c0_24 = arith.constant 0 : index
    %c0_25 = arith.constant 0 : index
    %c0_26 = arith.constant 0 : index
    %19 = vector.load %arg13[%c0_24, %c0_25, %c0_26] : memref<1x128x512xbf16, #tpu.memory_space<vmem>>, vector<1x128x512xbf16>
    %20 = vector.shape_cast %19 : vector<1x128x512xbf16> to vector<128x512xbf16>
    %c0_27 = arith.constant 0 : index
    %c0_28 = arith.constant 0 : index
    %c0_29 = arith.constant 0 : index
    %21 = vector.load %arg14[%c0_27, %c0_28, %c0_29] : memref<1x1x512xf32, #tpu.memory_space<vmem>>, vector<1x1x512xf32>
    %22 = vector.shape_cast %21 : vector<1x1x512xf32> to vector<1x512xf32>
    %c0_30 = arith.constant 0 : index
    %c0_31 = arith.constant 0 : index
    %c0_32 = arith.constant 0 : index
    %23 = vector.load %arg15[%c0_30, %c0_31, %c0_32] : memref<1x512x128xbf16, #tpu.memory_space<vmem>>, vector<1x512x128xbf16>
    %24 = vector.shape_cast %23 : vector<1x512x128xbf16> to vector<512x128xbf16>
    %c0_33 = arith.constant 0 : index
    %c0_34 = arith.constant 0 : index
    %c0_35 = arith.constant 0 : index
    %25 = vector.load %arg16[%c0_33, %c0_34, %c0_35] : memref<1x1x128xf32, #tpu.memory_space<vmem>>, vector<1x1x128xf32>
    %26 = vector.shape_cast %25 : vector<1x1x128xf32> to vector<1x128xf32>
    %c0_36 = arith.constant 0 : index
    %c0_37 = arith.constant 0 : index
    %27 = vector.load %arg22[%c0_36, %c0_37] : memref<48x128xf32, #tpu.memory_space<vmem>>, vector<48x128xf32>
    %cst = arith.constant dense<0.000000e+00> : vector<48xf32>
    %28 = vector.multi_reduction <add>, %27, %cst [1] : vector<48x128xf32> to vector<48xf32>
    %29 = vector.shape_cast %28 : vector<48xf32> to vector<48x1xf32>
    %cst_38 = arith.constant 1.280000e+02 : f32
    %30 = vector.broadcast %cst_38 : f32 to vector<48x1xf32>
    %31 = arith.divf %29, %30 : vector<48x1xf32>
    %32 = vector.broadcast %31 : vector<48x1xf32> to vector<48x128xf32>
    %33 = arith.subf %27, %32 : vector<48x128xf32>
    %34 = arith.mulf %33, %33 : vector<48x128xf32>
    %cst_39 = arith.constant dense<0.000000e+00> : vector<48xf32>
    %35 = vector.multi_reduction <add>, %34, %cst_39 [1] : vector<48x128xf32> to vector<48xf32>
    %36 = vector.shape_cast %35 : vector<48xf32> to vector<48x1xf32>
    %cst_40 = arith.constant 1.280000e+02 : f32
    %37 = vector.broadcast %cst_40 : f32 to vector<48x1xf32>
    %38 = arith.divf %36, %37 : vector<48x1xf32>
    %cst_41 = arith.constant 9.99999997E-7 : f32
    %39 = vector.broadcast %cst_41 : f32 to vector<48x1xf32>
    %40 = arith.addf %38, %39 : vector<48x1xf32>
    %41 = math.rsqrt %40 : vector<48x1xf32>
    %42 = vector.broadcast %41 : vector<48x1xf32> to vector<48x128xf32>
    %43 = arith.mulf %33, %42 : vector<48x128xf32>
    %44 = vector.broadcast %4 : vector<1x128xf32> to vector<48x128xf32>
    %45 = arith.mulf %43, %44 : vector<48x128xf32>
    %46 = vector.broadcast %6 : vector<1x128xf32> to vector<48x128xf32>
    %47 = arith.addf %45, %46 : vector<48x128xf32>
    %48 = arith.truncf %47 : vector<48x128xf32> to vector<48x128xbf16>
    %cst_42 = arith.constant dense<0.000000e+00> : vector<48x384xf32>
    %49 = tpu.matmul %48, %8, %cst_42 {dimension_numbers = #tpu.dot_dimension_numbers<[1], [0], [0], [1], [0, 0, 1, 1], [], []>} : vector<48x128xbf16>, vector<128x384xbf16>, vector<48x384xf32> -> vector<48x384xf32>
    %50 = vector.broadcast %10 : vector<1x384xf32> to vector<48x384xf32>
    %51 = arith.addf %49, %50 : vector<48x384xf32>
    %52 = vector.extract_strided_slice %51 {offsets = [0, 0], sizes = [24, 64], strides = [1, 1]} : vector<48x384xf32> to vector<24x64xf32>
    %53 = vector.extract_strided_slice %51 {offsets = [0, 64], sizes = [24, 64], strides = [1, 1]} : vector<48x384xf32> to vector<24x64xf32>
    %54 = vector.extract_strided_slice %51 {offsets = [24, 0], sizes = [24, 64], strides = [1, 1]} : vector<48x384xf32> to vector<24x64xf32>
    %55 = vector.extract_strided_slice %51 {offsets = [24, 64], sizes = [24, 64], strides = [1, 1]} : vector<48x384xf32> to vector<24x64xf32>
    %56 = vector.shape_cast %52 : vector<24x64xf32> to vector<1x24x64xf32>
    %57 = vector.shape_cast %53 : vector<24x64xf32> to vector<1x24x64xf32>
    %58 = vector.shape_cast %54 : vector<24x64xf32> to vector<1x24x64xf32>
    %59 = vector.shape_cast %55 : vector<24x64xf32> to vector<1x24x64xf32>
    %60 = tpu.concatenate %56, %57, %58, %59 in 0 : vector<1x24x64xf32>, vector<1x24x64xf32>, vector<1x24x64xf32>, vector<1x24x64xf32> -> vector<4x24x64xf32>
    %61 = arith.truncf %60 : vector<4x24x64xf32> to vector<4x24x64xbf16>
    %62 = vector.extract_strided_slice %51 {offsets = [0, 128], sizes = [24, 64], strides = [1, 1]} : vector<48x384xf32> to vector<24x64xf32>
    %63 = vector.extract_strided_slice %51 {offsets = [0, 192], sizes = [24, 64], strides = [1, 1]} : vector<48x384xf32> to vector<24x64xf32>
    %64 = vector.extract_strided_slice %51 {offsets = [24, 128], sizes = [24, 64], strides = [1, 1]} : vector<48x384xf32> to vector<24x64xf32>
    %65 = vector.extract_strided_slice %51 {offsets = [24, 192], sizes = [24, 64], strides = [1, 1]} : vector<48x384xf32> to vector<24x64xf32>
    %66 = vector.shape_cast %62 : vector<24x64xf32> to vector<1x24x64xf32>
    %67 = vector.shape_cast %63 : vector<24x64xf32> to vector<1x24x64xf32>
    %68 = vector.shape_cast %64 : vector<24x64xf32> to vector<1x24x64xf32>
    %69 = vector.shape_cast %65 : vector<24x64xf32> to vector<1x24x64xf32>
    %70 = tpu.concatenate %66, %67, %68, %69 in 0 : vector<1x24x64xf32>, vector<1x24x64xf32>, vector<1x24x64xf32>, vector<1x24x64xf32> -> vector<4x24x64xf32>
    %71 = arith.truncf %70 : vector<4x24x64xf32> to vector<4x24x64xbf16>
    %72 = vector.extract_strided_slice %51 {offsets = [0, 256], sizes = [24, 64], strides = [1, 1]} : vector<48x384xf32> to vector<24x64xf32>
    %73 = vector.extract_strided_slice %51 {offsets = [0, 320], sizes = [24, 64], strides = [1, 1]} : vector<48x384xf32> to vector<24x64xf32>
    %74 = vector.extract_strided_slice %51 {offsets = [24, 256], sizes = [24, 64], strides = [1, 1]} : vector<48x384xf32> to vector<24x64xf32>
    %75 = vector.extract_strided_slice %51 {offsets = [24, 320], sizes = [24, 64], strides = [1, 1]} : vector<48x384xf32> to vector<24x64xf32>
    %76 = vector.shape_cast %72 : vector<24x64xf32> to vector<1x24x64xf32>
    %77 = vector.shape_cast %73 : vector<24x64xf32> to vector<1x24x64xf32>
    %78 = vector.shape_cast %74 : vector<24x64xf32> to vector<1x24x64xf32>
    %79 = vector.shape_cast %75 : vector<24x64xf32> to vector<1x24x64xf32>
    %80 = tpu.concatenate %76, %77, %78, %79 in 0 : vector<1x24x64xf32>, vector<1x24x64xf32>, vector<1x24x64xf32>, vector<1x24x64xf32> -> vector<4x24x64xf32>
    %81 = arith.truncf %80 : vector<4x24x64xf32> to vector<4x24x64xbf16>
    %82 = tpu.iota {dimensions = array<i32: 2>} : vector<1x1x24xi32>
    %c17_i32 = arith.constant 17 : i32
    %83 = vector.broadcast %c17_i32 : i32 to vector<1x1x24xi32>
    %84 = arith.cmpi sge, %82, %83 : vector<1x1x24xi32>
    %cst_43 = arith.constant -1.000000e+09 : f32
    %cst_44 = arith.constant 0.000000e+00 : f32
    %85 = vector.broadcast %cst_43 : f32 to vector<1x1x24xf32>
    %86 = vector.broadcast %cst_44 : f32 to vector<1x1x24xf32>
    %87 = arith.select %84, %85, %86 : vector<1x1x24xi1>, vector<1x1x24xf32>
    "tpu.trace_start"() <{level = 10 : i32, message = "bqd,bkd->bqk"}> : () -> ()
    %cst_45 = arith.constant dense<0.000000e+00> : vector<4x24x24xf32>
    %88 = tpu.matmul %61, %71, %cst_45 {dimension_numbers = #tpu.dot_dimension_numbers<[2], [2], [1], [1], [0, 0, 0, 1, 1, 1], [0], [0]>} : vector<4x24x64xbf16>, vector<4x24x64xbf16>, vector<4x24x24xf32> -> vector<4x24x24xf32>
    "tpu.trace_stop"() : () -> ()
    %cst_46 = arith.constant 1.250000e-01 : f32
    %89 = vector.broadcast %cst_46 : f32 to vector<4x24x24xf32>
    %90 = arith.mulf %88, %89 : vector<4x24x24xf32>
    %91 = vector.broadcast %87 : vector<1x1x24xf32> to vector<4x24x24xf32>
    %92 = arith.addf %90, %91 : vector<4x24x24xf32>
    %cst_47 = arith.constant dense<0xFF800000> : vector<4x24xf32>
    %93 = vector.multi_reduction <maximumf>, %92, %cst_47 [2] : vector<4x24x24xf32> to vector<4x24xf32>
    %94 = vector.shape_cast %93 : vector<4x24xf32> to vector<4x24x1xf32>
    %95 = vector.broadcast %94 : vector<4x24x1xf32> to vector<4x24x24xf32>
    %96 = arith.subf %92, %95 : vector<4x24x24xf32>
    %97 = math.exp %96 : vector<4x24x24xf32>
    %cst_48 = arith.constant dense<0.000000e+00> : vector<4x24xf32>
    %98 = vector.multi_reduction <add>, %97, %cst_48 [2] : vector<4x24x24xf32> to vector<4x24xf32>
    %99 = vector.shape_cast %98 : vector<4x24xf32> to vector<4x24x1xf32>
    %100 = tpu.reciprocal %99 {approx = true} : vector<4x24x1xf32> -> vector<4x24x1xf32>
    %101 = vector.broadcast %100 : vector<4x24x1xf32> to vector<4x24x24xf32>
    %102 = arith.mulf %97, %101 : vector<4x24x24xf32>
    %103 = arith.truncf %102 : vector<4x24x24xf32> to vector<4x24x24xbf16>
    "tpu.trace_start"() <{level = 10 : i32, message = "bqk,bkd->bqd"}> : () -> ()
    %cst_49 = arith.constant dense<0.000000e+00> : vector<4x24x64xf32>
    %104 = tpu.matmul %103, %81, %cst_49 {dimension_numbers = #tpu.dot_dimension_numbers<[2], [1], [1], [2], [0, 0, 0, 1, 1, 2], [0], [0]>} : vector<4x24x24xbf16>, vector<4x24x64xbf16>, vector<4x24x64xf32> -> vector<4x24x64xf32>
    "tpu.trace_stop"() : () -> ()
    %105 = vector.extract_strided_slice %104 {offsets = [0, 0, 0], sizes = [1, 24, 64], strides = [1, 1, 1]} : vector<4x24x64xf32> to vector<1x24x64xf32>
    %106 = vector.shape_cast %105 : vector<1x24x64xf32> to vector<24x64xf32>
    %107 = vector.extract_strided_slice %104 {offsets = [1, 0, 0], sizes = [1, 24, 64], strides = [1, 1, 1]} : vector<4x24x64xf32> to vector<1x24x64xf32>
    %108 = vector.shape_cast %107 : vector<1x24x64xf32> to vector<24x64xf32>
    %109 = tpu.concatenate %106, %108 in 1 : vector<24x64xf32>, vector<24x64xf32> -> vector<24x128xf32>
    %110 = vector.extract_strided_slice %104 {offsets = [2, 0, 0], sizes = [1, 24, 64], strides = [1, 1, 1]} : vector<4x24x64xf32> to vector<1x24x64xf32>
    %111 = vector.shape_cast %110 : vector<1x24x64xf32> to vector<24x64xf32>
    %112 = vector.extract_strided_slice %104 {offsets = [3, 0, 0], sizes = [1, 24, 64], strides = [1, 1, 1]} : vector<4x24x64xf32> to vector<1x24x64xf32>
    %113 = vector.shape_cast %112 : vector<1x24x64xf32> to vector<24x64xf32>
    %114 = tpu.concatenate %111, %113 in 1 : vector<24x64xf32>, vector<24x64xf32> -> vector<24x128xf32>
    %115 = tpu.concatenate %109, %114 in 0 : vector<24x128xf32>, vector<24x128xf32> -> vector<48x128xf32>
    %116 = arith.truncf %115 : vector<48x128xf32> to vector<48x128xbf16>
    %cst_50 = arith.constant dense<0.000000e+00> : vector<48x128xf32>
    %117 = tpu.matmul %116, %12, %cst_50 {dimension_numbers = #tpu.dot_dimension_numbers<[1], [0], [0], [1], [0, 0, 1, 1], [], []>} : vector<48x128xbf16>, vector<128x128xbf16>, vector<48x128xf32> -> vector<48x128xf32>
    %118 = arith.addf %27, %117 : vector<48x128xf32>
    %119 = vector.broadcast %14 : vector<1x128xf32> to vector<48x128xf32>
    %120 = arith.addf %118, %119 : vector<48x128xf32>
    %cst_51 = arith.constant dense<0.000000e+00> : vector<48xf32>
    %121 = vector.multi_reduction <add>, %120, %cst_51 [1] : vector<48x128xf32> to vector<48xf32>
    %122 = vector.shape_cast %121 : vector<48xf32> to vector<48x1xf32>
    %cst_52 = arith.constant 1.280000e+02 : f32
    %123 = vector.broadcast %cst_52 : f32 to vector<48x1xf32>
    %124 = arith.divf %122, %123 : vector<48x1xf32>
    %125 = vector.broadcast %124 : vector<48x1xf32> to vector<48x128xf32>
    %126 = arith.subf %120, %125 : vector<48x128xf32>
    %127 = arith.mulf %126, %126 : vector<48x128xf32>
    %cst_53 = arith.constant dense<0.000000e+00> : vector<48xf32>
    %128 = vector.multi_reduction <add>, %127, %cst_53 [1] : vector<48x128xf32> to vector<48xf32>
    %129 = vector.shape_cast %128 : vector<48xf32> to vector<48x1xf32>
    %cst_54 = arith.constant 1.280000e+02 : f32
    %130 = vector.broadcast %cst_54 : f32 to vector<48x1xf32>
    %131 = arith.divf %129, %130 : vector<48x1xf32>
    %cst_55 = arith.constant 9.99999997E-7 : f32
    %132 = vector.broadcast %cst_55 : f32 to vector<48x1xf32>
    %133 = arith.addf %131, %132 : vector<48x1xf32>
    %134 = math.rsqrt %133 : vector<48x1xf32>
    %135 = vector.broadcast %134 : vector<48x1xf32> to vector<48x128xf32>
    %136 = arith.mulf %126, %135 : vector<48x128xf32>
    %137 = vector.broadcast %16 : vector<1x128xf32> to vector<48x128xf32>
    %138 = arith.mulf %136, %137 : vector<48x128xf32>
    %139 = vector.broadcast %18 : vector<1x128xf32> to vector<48x128xf32>
    %140 = arith.addf %138, %139 : vector<48x128xf32>
    %141 = arith.truncf %140 : vector<48x128xf32> to vector<48x128xbf16>
    %cst_56 = arith.constant dense<0.000000e+00> : vector<48x512xf32>
    %142 = tpu.matmul %141, %20, %cst_56 {dimension_numbers = #tpu.dot_dimension_numbers<[1], [0], [0], [1], [0, 0, 1, 1], [], []>} : vector<48x128xbf16>, vector<128x512xbf16>, vector<48x512xf32> -> vector<48x512xf32>
    %143 = vector.broadcast %22 : vector<1x512xf32> to vector<48x512xf32>
    %144 = arith.addf %142, %143 : vector<48x512xf32>
    %cst_57 = arith.constant 5.000000e-01 : f32
    %145 = vector.broadcast %cst_57 : f32 to vector<48x512xf32>
    %146 = arith.mulf %145, %144 : vector<48x512xf32>
    %cst_58 = arith.constant 4.471500e-02 : f32
    %147 = vector.broadcast %cst_58 : f32 to vector<48x512xf32>
    %148 = arith.mulf %147, %144 : vector<48x512xf32>
    %149 = arith.mulf %148, %144 : vector<48x512xf32>
    %150 = arith.mulf %149, %144 : vector<48x512xf32>
    %151 = arith.addf %144, %150 : vector<48x512xf32>
    %cst_59 = arith.constant 0.797884583 : f32
    %152 = vector.broadcast %cst_59 : f32 to vector<48x512xf32>
    %153 = arith.mulf %152, %151 : vector<48x512xf32>
    %154 = math.tanh %153 : vector<48x512xf32>
    %cst_60 = arith.constant 1.000000e+00 : f32
    %155 = vector.broadcast %cst_60 : f32 to vector<48x512xf32>
    %156 = arith.addf %155, %154 : vector<48x512xf32>
    %157 = arith.mulf %146, %156 : vector<48x512xf32>
    %158 = arith.truncf %157 : vector<48x512xf32> to vector<48x512xbf16>
    %cst_61 = arith.constant dense<0.000000e+00> : vector<48x128xf32>
    %159 = tpu.matmul %158, %24, %cst_61 {dimension_numbers = #tpu.dot_dimension_numbers<[1], [0], [0], [1], [0, 0, 1, 1], [], []>} : vector<48x512xbf16>, vector<512x128xbf16>, vector<48x128xf32> -> vector<48x128xf32>
    %160 = arith.addf %120, %159 : vector<48x128xf32>
    %161 = vector.broadcast %26 : vector<1x128xf32> to vector<48x128xf32>
    %162 = arith.addf %160, %161 : vector<48x128xf32>
    %c0_62 = arith.constant 0 : index
    %c0_63 = arith.constant 0 : index
    %163 = vector.load %arg22[%c0_62, %c0_63] : memref<48x128xf32, #tpu.memory_space<vmem>>, vector<48x128xf32>
    tpu.vector_store %arg22[%c0_62, %c0_63], %162 {strides = array<i32>} : memref<48x128xf32, #tpu.memory_space<vmem>>, vector<48x128xf32>,
    %c1_i32 = arith.constant 1 : i32
    %164 = arith.cmpi eq, %arg1, %c1_i32 : i32
    %165 = arith.extui %164 : i1 to i32
    %c0_i32_64 = arith.constant 0 : i32
    %166 = arith.cmpi ne, %165, %c0_i32_64 : i32
    scf.if %166 {
      %c0_65 = arith.constant 0 : index
      %c0_66 = arith.constant 0 : index
      %167 = vector.load %arg17[%c0_65, %c0_66] : memref<1x128xf32, #tpu.memory_space<vmem>>, vector<1x128xf32>
      %c0_67 = arith.constant 0 : index
      %c0_68 = arith.constant 0 : index
      %168 = vector.load %arg18[%c0_67, %c0_68] : memref<1x128xf32, #tpu.memory_space<vmem>>, vector<1x128xf32>
      %c0_69 = arith.constant 0 : index
      %c0_70 = arith.constant 0 : index
      %169 = vector.load %arg19[%c0_69, %c0_70] : memref<128x128xbf16, #tpu.memory_space<vmem>>, vector<128x128xbf16>
      %c0_71 = arith.constant 0 : index
      %c0_72 = arith.constant 0 : index
      %170 = vector.load %arg20[%c0_71, %c0_72] : memref<1x128xf32, #tpu.memory_space<vmem>>, vector<1x128xf32>
      %171 = vector.extract_strided_slice %162 {offsets = [0, 0], sizes = [1, 128], strides = [1, 1]} : vector<48x128xf32> to vector<1x128xf32>
      %172 = vector.extract_strided_slice %162 {offsets = [24, 0], sizes = [1, 128], strides = [1, 1]} : vector<48x128xf32> to vector<1x128xf32>
      %173 = tpu.concatenate %171, %172 in 0 : vector<1x128xf32>, vector<1x128xf32> -> vector<2x128xf32>
      %cst_73 = arith.constant dense<0.000000e+00> : vector<2xf32>
      %174 = vector.multi_reduction <add>, %173, %cst_73 [1] : vector<2x128xf32> to vector<2xf32>
      %175 = vector.shape_cast %174 : vector<2xf32> to vector<2x1xf32>
      %cst_74 = arith.constant 1.280000e+02 : f32
      %176 = vector.broadcast %cst_74 : f32 to vector<2x1xf32>
      %177 = arith.divf %175, %176 : vector<2x1xf32>
      %178 = vector.broadcast %177 : vector<2x1xf32> to vector<2x128xf32>
      %179 = arith.subf %173, %178 : vector<2x128xf32>
      %180 = arith.mulf %179, %179 : vector<2x128xf32>
      %cst_75 = arith.constant dense<0.000000e+00> : vector<2xf32>
      %181 = vector.multi_reduction <add>, %180, %cst_75 [1] : vector<2x128xf32> to vector<2xf32>
      %182 = vector.shape_cast %181 : vector<2xf32> to vector<2x1xf32>
      %cst_76 = arith.constant 1.280000e+02 : f32
      %183 = vector.broadcast %cst_76 : f32 to vector<2x1xf32>
      %184 = arith.divf %182, %183 : vector<2x1xf32>
      %cst_77 = arith.constant 9.99999997E-7 : f32
      %185 = vector.broadcast %cst_77 : f32 to vector<2x1xf32>
      %186 = arith.addf %184, %185 : vector<2x1xf32>
      %187 = math.rsqrt %186 : vector<2x1xf32>
      %188 = vector.broadcast %187 : vector<2x1xf32> to vector<2x128xf32>
      %189 = arith.mulf %179, %188 : vector<2x128xf32>
      %190 = vector.broadcast %167 : vector<1x128xf32> to vector<2x128xf32>
      %191 = arith.mulf %189, %190 : vector<2x128xf32>
      %192 = vector.broadcast %168 : vector<1x128xf32> to vector<2x128xf32>
      %193 = arith.addf %191, %192 : vector<2x128xf32>
      %194 = arith.truncf %193 : vector<2x128xf32> to vector<2x128xbf16>
      %cst_78 = arith.constant dense<0.000000e+00> : vector<2x128xf32>
      %195 = tpu.matmul %194, %169, %cst_78 {dimension_numbers = #tpu.dot_dimension_numbers<[1], [0], [0], [1], [0, 0, 1, 1], [], []>} : vector<2x128xbf16>, vector<128x128xbf16>, vector<2x128xf32> -> vector<2x128xf32>
      %196 = vector.broadcast %170 : vector<1x128xf32> to vector<2x128xf32>
      %197 = arith.addf %195, %196 : vector<2x128xf32>
      %c0_79 = arith.constant 0 : index
      %c0_80 = arith.constant 0 : index
      %198 = vector.load %arg21[%c0_79, %c0_80] : memref<2x128xf32, #tpu.memory_space<vmem>>, vector<2x128xf32>
      tpu.vector_store %arg21[%c0_79, %c0_80], %197 {strides = array<i32>} : memref<2x128xf32, #tpu.memory_space<vmem>>, vector<2x128xf32>,
    } else {
    }
    return
  }
  func.func @transform_0(%arg0: i32, %arg1: i32) -> (i32, i32) {
    %c0_i32 = arith.constant 0 : i32
    %c0_i32_0 = arith.constant 0 : i32
    return %arg0, %c0_i32 : i32, i32
  }
  func.func @transform_1(%arg0: i32, %arg1: i32) -> (i32, i32) {
    %c0_i32 = arith.constant 0 : i32
    %c0_i32_0 = arith.constant 0 : i32
    return %arg0, %c0_i32 : i32, i32
  }
  func.func @transform_2(%arg0: i32, %arg1: i32) -> (i32, i32) {
    %c0_i32 = arith.constant 0 : i32
    %c0_i32_0 = arith.constant 0 : i32
    %c0_i32_1 = arith.constant 0 : i32
    return %c0_i32, %c0_i32_0 : i32, i32
  }
  func.func @transform_3(%arg0: i32, %arg1: i32) -> (i32, i32, i32) {
    %c0_i32 = arith.constant 0 : i32
    %c0_i32_0 = arith.constant 0 : i32
    %c0_i32_1 = arith.constant 0 : i32
    return %arg1, %c0_i32, %c0_i32_0 : i32, i32, i32
  }
  func.func @transform_4(%arg0: i32, %arg1: i32) -> (i32, i32, i32) {
    %c0_i32 = arith.constant 0 : i32
    %c0_i32_0 = arith.constant 0 : i32
    %c0_i32_1 = arith.constant 0 : i32
    return %arg1, %c0_i32, %c0_i32_0 : i32, i32, i32
  }
  func.func @transform_5(%arg0: i32, %arg1: i32) -> (i32, i32, i32) {
    %c0_i32 = arith.constant 0 : i32
    %c0_i32_0 = arith.constant 0 : i32
    %c0_i32_1 = arith.constant 0 : i32
    return %arg1, %c0_i32, %c0_i32_0 : i32, i32, i32
  }
  func.func @transform_6(%arg0: i32, %arg1: i32) -> (i32, i32, i32) {
    %c0_i32 = arith.constant 0 : i32
    %c0_i32_0 = arith.constant 0 : i32
    %c0_i32_1 = arith.constant 0 : i32
    return %arg1, %c0_i32, %c0_i32_0 : i32, i32, i32
  }
  func.func @transform_7(%arg0: i32, %arg1: i32) -> (i32, i32, i32) {
    %c0_i32 = arith.constant 0 : i32
    %c0_i32_0 = arith.constant 0 : i32
    %c0_i32_1 = arith.constant 0 : i32
    return %arg1, %c0_i32, %c0_i32_0 : i32, i32, i32
  }
  func.func @transform_8(%arg0: i32, %arg1: i32) -> (i32, i32, i32) {
    %c0_i32 = arith.constant 0 : i32
    %c0_i32_0 = arith.constant 0 : i32
    %c0_i32_1 = arith.constant 0 : i32
    return %arg1, %c0_i32, %c0_i32_0 : i32, i32, i32
  }
  func.func @transform_9(%arg0: i32, %arg1: i32) -> (i32, i32, i32) {
    %c0_i32 = arith.constant 0 : i32
    %c0_i32_0 = arith.constant 0 : i32
    %c0_i32_1 = arith.constant 0 : i32
    return %arg1, %c0_i32, %c0_i32_0 : i32, i32, i32
  }
  func.func @transform_10(%arg0: i32, %arg1: i32) -> (i32, i32, i32) {
    %c0_i32 = arith.constant 0 : i32
    %c0_i32_0 = arith.constant 0 : i32
    %c0_i32_1 = arith.constant 0 : i32
    return %arg1, %c0_i32, %c0_i32_0 : i32, i32, i32
  }
  func.func @transform_11(%arg0: i32, %arg1: i32) -> (i32, i32, i32) {
    %c0_i32 = arith.constant 0 : i32
    %c0_i32_0 = arith.constant 0 : i32
    %c0_i32_1 = arith.constant 0 : i32
    return %arg1, %c0_i32, %c0_i32_0 : i32, i32, i32
  }
  func.func @transform_12(%arg0: i32, %arg1: i32) -> (i32, i32, i32) {
    %c0_i32 = arith.constant 0 : i32
    %c0_i32_0 = arith.constant 0 : i32
    %c0_i32_1 = arith.constant 0 : i32
    return %arg1, %c0_i32, %c0_i32_0 : i32, i32, i32
  }
  func.func @transform_13(%arg0: i32, %arg1: i32) -> (i32, i32, i32) {
    %c0_i32 = arith.constant 0 : i32
    %c0_i32_0 = arith.constant 0 : i32
    %c0_i32_1 = arith.constant 0 : i32
    return %arg1, %c0_i32, %c0_i32_0 : i32, i32, i32
  }
  func.func @transform_14(%arg0: i32, %arg1: i32) -> (i32, i32, i32) {
    %c0_i32 = arith.constant 0 : i32
    %c0_i32_0 = arith.constant 0 : i32
    %c0_i32_1 = arith.constant 0 : i32
    return %arg1, %c0_i32, %c0_i32_0 : i32, i32, i32
  }
  func.func @transform_15(%arg0: i32, %arg1: i32) -> (i32, i32) {
    %c0_i32 = arith.constant 0 : i32
    %c0_i32_0 = arith.constant 0 : i32
    %c0_i32_1 = arith.constant 0 : i32
    return %c0_i32, %c0_i32_0 : i32, i32
  }
  func.func @transform_16(%arg0: i32, %arg1: i32) -> (i32, i32) {
    %c0_i32 = arith.constant 0 : i32
    %c0_i32_0 = arith.constant 0 : i32
    %c0_i32_1 = arith.constant 0 : i32
    return %c0_i32, %c0_i32_0 : i32, i32
  }
  func.func @transform_17(%arg0: i32, %arg1: i32) -> (i32, i32) {
    %c0_i32 = arith.constant 0 : i32
    %c0_i32_0 = arith.constant 0 : i32
    %c0_i32_1 = arith.constant 0 : i32
    return %c0_i32, %c0_i32_0 : i32, i32
  }
  func.func @transform_18(%arg0: i32, %arg1: i32) -> (i32, i32) {
    %c0_i32 = arith.constant 0 : i32
    %c0_i32_0 = arith.constant 0 : i32
    %c0_i32_1 = arith.constant 0 : i32
    return %c0_i32, %c0_i32_0 : i32, i32
  }
  func.func @transform_19(%arg0: i32, %arg1: i32) -> (i32, i32) {
    %c0_i32 = arith.constant 0 : i32
    %c0_i32_0 = arith.constant 0 : i32
    return %arg0, %c0_i32 : i32, i32
  }
}

</mosaic_0001>

<bundles_post_ra>
// kernel: label_projector_vit_forward.1
= control target key start
LH: loop header
LB: loop body
LE: loop exit
PB: predicated region body
PF: predicated region fallthrough
CT: control target
= control target key end

     0   :  { %s6470_s0 = inlined_call_operand.vmem [shape: bf16[48,768], index: 0, kind: input, shape index: {}]   ;;  %s6471_s1 = inlined_call_operand.vmem [shape: f32[48,128], index: 1, kind: input, shape index: {}]   ;;  %s6472_s2 = inlined_call_operand.vmem [shape: bf16[768,128], index: 2, kind: input, shape index: {}]   ;;  %s6473_s3 = inlined_call_operand.vmem [shape: f32[2,1,128], index: 3, kind: input, shape index: {}]   ;;  %s6474_s4 = inlined_call_operand.vmem [shape: f32[2,1,128], index: 4, kind: input, shape index: {}]   ;;  %s6475_s5 = inlined_call_operand.vmem [shape: bf16[2,128,384], index: 5, kind: input, shape index: {}]   ;;  %s6476_s6 = inlined_call_operand.vmem [shape: f32[2,1,384], index: 6, kind: input, shape index: {}]   ;;  %s6477_s7 = inlined_call_operand.vmem [shape: bf16[2,128,128], index: 7, kind: input, shape index: {}]   ;;  %s6478_s8 = inlined_call_operand.vmem [shape: f32[2,1,128], index: 8, kind: input, shape index: {}]   ;;  %s6479_s9 = inlined_call_operand.vmem [shape: f32[2,1,128], index: 9, kind: input, shape index: {}]   ;;  %s6480_s10 = inlined_call_operand.vmem [shape: f32[2,1,128], index: 10, kind: input, shape index: {}]   ;;  %s6481_s11 = inlined_call_operand.vmem [shape: bf16[2,128,512], index: 11, kind: input, shape index: {}]   ;;  %s6482_s12 = inlined_call_operand.vmem [shape: f32[2,1,512], index: 12, kind: input, shape index: {}]   ;;  %s6483_s13 = inlined_call_operand.vmem [shape: bf16[2,512,128], index: 13, kind: input, shape index: {}]   ;;  %s6484_s14 = inlined_call_operand.vmem [shape: f32[2,1,128], index: 14, kind: input, shape index: {}]   ;;  %s6485_s15 = inlined_call_operand.vmem [shape: f32[1,128], index: 15, kind: input, shape index: {}]   ;;  %s6486_s16 = inlined_call_operand.vmem [shape: f32[1,128], index: 16, kind: input, shape index: {}]   ;;  %s6487_s17 = inlined_call_operand.vmem [shape: bf16[128,128], index: 17, kind: input, shape index: {}]   ;;  %s6488_s18 = inlined_call_operand.vmem [shape: f32[1,128], index: 18, kind: input, shape index: {}]   ;;  %s6489_s19 = inlined_call_operand.hbm [shape: f32[2,128], index: 19, kind: output, shape index: {}]  }
   0x1   :  { %6496 = sst [smem:[#allocation9_spill]] %s6470_s0 }
   0x2   :  { %6497 = sst [smem:[#allocation10_spill]] %s6471_s1 }
   0x3   :  { %6498 = sst [smem:[#allocation11_spill]] %s6472_s2 }
   0x4   :  { %6499 = sst [smem:[#allocation12_spill]] %s6473_s3 }
   0x5   :  { %6500 = sst [smem:[#allocation13_spill]] %s6475_s5 }
   0x6   :  { %6501 = sst [smem:[#allocation14_spill]] %s6477_s7 }
   0x7   :  { %6502 = sst [smem:[#allocation15_spill]] %s6485_s15 }
   0x8   :  { %6503 = sst [smem:[#allocation16_spill]] %s6486_s16 }
   0x9   :  { %6504 = sst [smem:[#allocation17_spill]] %s6488_s18 }
   0xa   :  { %6505 = sst [smem:[#allocation18_spill]] %s6489_s19 }
   0xb   :  { %24 = vsyncpa [#allocation4], 0  ;;  %s5431_s0 = smov 0   ;;  %s5433_s30 = smov 0  }
   0xc   :  { %s5435_s20 = smov 0  }
   0xd LB: > { %6506 = sst [smem:[#allocation6_spill]] %s5318_s30  ;;  %s39_s1 = sadd.s32 1, %s5318_s30  ;;  %s5322_s20 = sphi %s5435_s20, %s30_s20   ;;  %s5318_s30 = sphi %s5433_s30, %s6532_s30   ;;  %s5314_s0 = sphi %s5431_s0, %s6531_s0  }
   0xe   : > { %6507 = sst [smem:[#allocation7_spill]] %s5322_s20  ;;  %p40_p0 = scmp.ge.s32.totalorder %s39_s1, 2 }
   0xf   : > { %p4236_p1 = scmp.ge.s32.totalorder %s5322_s20, 1  ;;  %p669_p2 = scmp.lt.s32.totalorder %s5322_s20, 3 }
  0x10   : > { %s6534_s1 = smov (%p40_p0, %s39_s1), 0 }
  0x11   : > { %6508 = sst [smem:[#allocation8_spill]] %s6534_s1  ;;  %p670_p3 = pnand %p4236_p1, %p669_p2 }
  0x12   : > { %p785_p4 = scmp.lt.s32.totalorder (!%p670_p3), %s5314_s0, 1  ;;  %s6510_s7 = sld [smem:[#allocation14_spill]] (!%p670_p3) }
  0x13   : > { %673 = sbr.rel (%p670_p3) target bundleno = 3515 (0xdbb), region = 96  ;;  %s6511_s5 = sld [smem:[#allocation13_spill]] (!%p670_p3) }
  0x14   : > { %p4245_p5 = scmp.ne.s32.totalorder (!%p670_p3), %s5314_s0, 0 }
  0x1a   : > { %s5454_s22 = scalar_select %p785_p4, %s5314_s0, 1 }
  0x1b   : > { %835 = sbr.rel (%p4245_p5) target bundleno = 334 (0x14e), region = 100  ;;  %s6513_s30 = sld [smem:[#allocation9_spill]] (!%p4245_p5) }
  0x1c   : > { %s4850_s28 = smul.u32 192, %s5454_s22  ;;  %s4446_s29 = sshll.u32 %s5454_s22, 6 }
  0x1d   : > { %s4851_s21 = smul.u32 3, %s5454_s22  ;;  %s5470_s23 = scalar_lea.vmem %s6510_s7, %s4446_s29 }
  0x1e   : > { %s5475_s20 = scalar_lea.vmem %s6511_s5, %s4850_s28  ;;  %s4447_s19 = sshll.u32 %s5454_s22, 8 }
  0x1f   : > { %s5484_s27 = scalar_lea.vmem %s6476_s6, %s4851_s21  ;;  %s5498_s5 = scalar_lea.vmem %s6481_s11, %s4447_s19 }
  0x20   : > { %s4242_s18 = sshll.u32 %s5454_s22, 2  ;;  %s5509_s15 = scalar_lea.vmem %s6483_s13, %s4447_s19 }
  0x21   : > { %s5504_s21 = scalar_lea.vmem %s6482_s12, %s4242_s18  ;;  %s6512_s7 = sld [smem:[#allocation11_spill]] (!%p4245_p5)  ;;  %v4921_v32 = vld [vmem:[%s6513_s30] ss:$24 sps:$4 sm:$0xff] (!%p4245_p5)  }
  0x22   : > { %s6514_s1 = smov %s6513_s30  ;;  %s6515_s25 = sld [smem:[#allocation10_spill]] }
  0x23   : > { %v4923_v33 = vld [vmem:[%s6514_s1 + $0x4] ss:$24 sps:$4 sm:$0xff]   ;;  %v4924_v34 = vld [vmem:[%s6514_s1 + $0x8] ss:$24 sps:$4 sm:$0xff]   ;;  %v4933_v42 = vld [vmem:[%s6514_s1 + $0x34] ss:$24 sps:$4 sm:$0xff]  }
  0x24   : > { %v4926_v35 = vld [vmem:[%s6514_s1 + $0xc] ss:$24 sps:$4 sm:$0xff]   ;;  %1366 = vmatprep.mubr.bf16.mxu0 %v4923_v33  ;;  %v4935_v43 = vld [vmem:[%s6514_s1 + $0x30] ss:$24 sps:$4 sm:$0xff]   ;;  %v4936_v44 = vld [vmem:[%s6514_s1 + $0x3c] ss:$24 sps:$4 sm:$0xff]  }
  0x25   : > { %1423 = vmatprep.mubr.bf16.mxu1 %v4926_v35  ;;  %v4939_v46 = vld [vmem:[%s6514_s1 + $0x38] ss:$24 sps:$4 sm:$0xff]   ;;  %v4943_v49 = vld [vmem:[%s6514_s1 + $0x64] ss:$24 sps:$4 sm:$0xff]   ;;  %v4949_v53 = vld [vmem:[%s6514_s1 + $0x68] ss:$24 sps:$4 sm:$0xff]  }
  0x26   : > { %v4945_v50 = vld [vmem:[%s6514_s1 + $0x60] ss:$24 sps:$4 sm:$0xff]   ;;  %v4946_v51 = vld [vmem:[%s6514_s1 + $0x6c] ss:$24 sps:$4 sm:$0xff]   ;;  %v4955_v62 = vld [vmem:[%s6514_s1 + $0x10] ss:$24 sps:$4 sm:$0xff]  }
  0x27   : > { %v4889_v0 = vld [vmem:[%s6512_s7 + $0x40] sm:$0xff]   ;;  %v4893_v4 = vld [vmem:[%s6512_s7 + $0x48] sm:$0xff]   ;;  %v4897_v8 = vld [vmem:[%s6512_s7 + $0x50] sm:$0xff]  }
  0x28   : > { %v4890_v1 = vld [vmem:[%s6512_s7 + $0xc0] sm:$0xff]   ;;  %4449 = vmatprep.subr.bf16.mxu0 %v4889_v0  ;;  %v4894_v5 = vld [vmem:[%s6512_s7 + $0xc8] sm:$0xff]   ;;  %v4898_v9 = vld [vmem:[%s6512_s7 + $0xd0] sm:$0xff]  }
  0x29   : > { %v4891_v2 = vld [vmem:[%s6512_s7] sm:$0xff]   ;;  %4483 = vmatprep.subr.bf16.mxu1 %v4890_v1  ;;  %v4895_v6 = vld [vmem:[%s6512_s7 + $0x8] sm:$0xff]   ;;  %v4899_v10 = vld [vmem:[%s6512_s7 + $0x10] sm:$0xff]  }
  0x2a   : > { %v4892_v3 = vld [vmem:[%s6512_s7 + $0x80] sm:$0xff]   ;;  %4450 = vmatpush3.bf16.msra.mxu0 %v4891_v2  ;;  %v4896_v7 = vld [vmem:[%s6512_s7 + $0x88] sm:$0xff]   ;;  %v4900_v11 = vld [vmem:[%s6512_s7 + $0x90] sm:$0xff]  }
  0x2b   : > { %4484 = vmatpush3.bf16.msra.mxu1 %v4892_v3  ;;  %4451 = vmatprep.subr.bf16.mxu0 %v4893_v4  ;;  %v4901_v12 = vld [vmem:[%s6512_s7 + $0x58] sm:$0xff]   ;;  %v4905_v16 = vld [vmem:[%s6512_s7 + $0x60] sm:$0xff]   ;;  %v4909_v20 = vld [vmem:[%s6512_s7 + $0x68] sm:$0xff]  }
  0x2c   : > { %4485 = vmatprep.subr.bf16.mxu1 %v4894_v5  ;;  %v4902_v13 = vld [vmem:[%s6512_s7 + $0xd8] sm:$0xff]   ;;  %v4906_v17 = vld [vmem:[%s6512_s7 + $0xe0] sm:$0xff]   ;;  %v4910_v21 = vld [vmem:[%s6512_s7 + $0xe8] sm:$0xff]  }
  0x2d   : > { %v4903_v14 = vld [vmem:[%s6512_s7 + $0x18] sm:$0xff]   ;;  %v4907_v18 = vld [vmem:[%s6512_s7 + $0x20] sm:$0xff]   ;;  %v4911_v22 = vld [vmem:[%s6512_s7 + $0x28] sm:$0xff]  }
  0x2e   : > { %4452 = vmatpush3.bf16.msra.mxu0 %v4895_v6  ;;  %v4904_v15 = vld [vmem:[%s6512_s7 + $0x98] sm:$0xff]   ;;  %v4908_v19 = vld [vmem:[%s6512_s7 + $0xa0] sm:$0xff]   ;;  %v4912_v23 = vld [vmem:[%s6512_s7 + $0xa8] sm:$0xff]  }
  0x2f   : > { %4486 = vmatpush3.bf16.msra.mxu1 %v4896_v7  ;;  %4453 = vmatprep.subr.bf16.mxu0 %v4897_v8  ;;  %v4913_v24 = vld [vmem:[%s6512_s7 + $0x70] sm:$0xff]   ;;  %v4917_v28 = vld [vmem:[%s6512_s7 + $0x78] sm:$0xff]   ;;  %v4927_v36 = vld [vmem:[%s6512_s7 + $0x140] sm:$0xff]  }
  0x30   : > { %4487 = vmatprep.subr.bf16.mxu1 %v4898_v9  ;;  %v4914_v25 = vld [vmem:[%s6512_s7 + $0xf0] sm:$0xff]   ;;  %v4918_v29 = vld [vmem:[%s6512_s7 + $0xf8] sm:$0xff]   ;;  %v4928_v37 = vld [vmem:[%s6512_s7 + $0x100] sm:$0xff]  }
  0x31   : > { %v4915_v26 = vld [vmem:[%s6512_s7 + $0x30] sm:$0xff]   ;;  %v4919_v30 = vld [vmem:[%s6512_s7 + $0x38] sm:$0xff]   ;;  %v4929_v38 = vld [vmem:[%s6512_s7 + $0x148] sm:$0xff]  }
  0x32   : > { %4454 = vmatpush3.bf16.msra.mxu0 %v4899_v10  ;;  %v4916_v27 = vld [vmem:[%s6512_s7 + $0xb0] sm:$0xff]   ;;  %v4920_v31 = vld [vmem:[%s6512_s7 + $0xb8] sm:$0xff]   ;;  %v4930_v39 = vld [vmem:[%s6512_s7 + $0x108] sm:$0xff]  }
  0x33   : > { %4488 = vmatpush3.bf16.msra.mxu1 %v4900_v11  ;;  %4455 = vmatprep.subr.bf16.mxu0 %v4901_v12  ;;  %v4931_v40 = vld [vmem:[%s6512_s7 + $0x150] sm:$0xff]   ;;  %v4938_v45 = vld [vmem:[%s6512_s7 + $0x158] sm:$0xff]   ;;  %v4941_v48 = vld [vmem:[%s6512_s7 + $0x160] sm:$0xff]  }
  0x34   : > { %4489 = vmatprep.subr.bf16.mxu1 %v4902_v13  ;;  %v4932_v41 = vld [vmem:[%s6512_s7 + $0x110] sm:$0xff]   ;;  %v4940_v47 = vld [vmem:[%s6512_s7 + $0x118] sm:$0xff]   ;;  %v4942_v52 = vld [vmem:[%s6512_s7 + $0x120] sm:$0xff]  }
  0x35   : > { %v4948_v54 = vld [vmem:[%s6512_s7 + $0x168] sm:$0xff]   ;;  %v4951_v56 = vld [vmem:[%s6512_s7 + $0x170] sm:$0xff]   ;;  %v4960_v59 = vld [vmem:[%s6514_s1 + $0x44] ss:$24 sps:$4 sm:$0xff]  }
  0x36   : > { %4456 = vmatpush3.bf16.msra.mxu0 %v4903_v14  ;;  %v4950_v55 = vld [vmem:[%s6512_s7 + $0x128] sm:$0xff]   ;;  %v4952_v58 = vld [vmem:[%s6512_s7 + $0x130] sm:$0xff]   ;;  %v4953_v60 = vld [vmem:[%s6512_s7 + $0x178] sm:$0xff]  }
  0x37   : > { %4490 = vmatpush3.bf16.msra.mxu1 %v4904_v15  ;;  %4457 = vmatprep.subr.bf16.mxu0 %v4905_v16  ;;  %v4957_v57 = vld [vmem:[%s6514_s1 + $0x14] ss:$24 sps:$4 sm:$0xff]   ;;  %v4954_v61 = vld [vmem:[%s6512_s7 + $0x138] sm:$0xff]   ;;  %v4963_v1 = vld [vmem:[%s6514_s1 + $0x70] ss:$24 sps:$4 sm:$0xff]  }
  0x38   : > { %4491 = vmatprep.subr.bf16.mxu1 %v4906_v17  ;;  %v4958_v63 = vld [vmem:[%s6514_s1 + $0x40] ss:$24 sps:$4 sm:$0xff]   ;;  %v4961_v0 = vld [vmem:[%s6514_s1 + $0x74] ss:$24 sps:$4 sm:$0xff]  }
  0x39   : > { %v950_v4 = vld [vmem:[%s6515_s25] sm:$0xff]  ;;  %v951_v11 = vld [vmem:[%s6515_s25 + $0x8] sm:$0xff] }
  0x3a   : > { %4458 = vmatpush3.bf16.msra.mxu0 %v4907_v18 }
  0x3b   : > { %4492 = vmatpush3.bf16.msra.mxu1 %v4908_v19  ;;  %4459 = vmatprep.subr.bf16.mxu0 %v4909_v20 }
  0x3c   : > { %4493 = vmatprep.subr.bf16.mxu1 %v4910_v21  ;;  %v952_v21 = vld [vmem:[%s6515_s25 + $0x10] sm:$0xff] }
  0x3e   : > { %4460 = vmatpush3.bf16.msra.mxu0 %v4911_v22 }
  0x3f   : > { %4494 = vmatpush3.bf16.msra.mxu1 %v4912_v23  ;;  %4461 = vmatprep.subr.bf16.mxu0 %v4913_v24 }
  0x40   : > { %4495 = vmatprep.subr.bf16.mxu1 %v4914_v25 }
  0x42   : > { %4462 = vmatpush3.bf16.msra.mxu0 %v4915_v26 }
  0x43   : > { %4496 = vmatpush3.bf16.msra.mxu1 %v4916_v27  ;;  %4463 = vmatprep.subr.bf16.mxu0 %v4917_v28  ;;  %v953_v27 = vld [vmem:[%s6515_s25 + $0x18] sm:$0xff] }
  0x44   : > { %4497 = vmatprep.subr.bf16.mxu1 %v4918_v29 }
  0x46   : > { %4464 = vmatpush3.bf16.msra.mxu0 %v4919_v30 }
  0x47   : > { %4498 = vmatpush3.bf16.msra.mxu1 %v4920_v31  ;;  %4517 = vmatprep.subr.bf16.mxu0 %v4927_v36 }
  0x48   : > { %4822 = vmatprep.subr.bf16.mxu1 %v4927_v36 }
  0x49   : > { %1367 = vmatmul.mubr.bf16.vlgmr.msra.gmra.mrb[0].mxu0 %v4921_v32 }
  0x4a   : > { %1424 = vmatmul.mubr.bf16.vlgmr.msra.gmra.mrb[0].mxu1 %v4924_v34  ;;  %4518 = vmatpush3.bf16.msra.mxu0 %v4928_v37 }
  0x4b   : > { %4830 = vmatpush3.bf16.msra.mxu1 %v4928_v37  ;;  %4519 = vmatprep.subr.bf16.mxu0 %v4929_v38 }
  0x4c   : > { %4823 = vmatprep.subr.bf16.mxu1 %v4929_v38  ;;  %1374 = vmatprep.mubr.bf16.mxu0 %v4933_v42 }
  0x4d   : > { %1431 = vmatprep.mubr.bf16.mxu1 %v4936_v44 }
  0x4e   : > { %4520 = vmatpush3.bf16.msra.mxu0 %v4930_v39 }
  0x4f   : > { %4831 = vmatpush3.bf16.msra.mxu1 %v4930_v39  ;;  %4521 = vmatprep.subr.bf16.mxu0 %v4931_v40  ;;  %v954_v39 = vld [vmem:[%s6515_s25 + $0x20] sm:$0xff] }
  0x50   : > { %4824 = vmatprep.subr.bf16.mxu1 %v4931_v40 }
  0x51   : > { %1375 = vmatmul.mubr.bf16.gmra.mrb[4].mxu0 %v4935_v43 }
  0x52   : > { %4522 = vmatpush3.bf16.msra.mxu0 %v4932_v41  ;;  %1432 = vmatmul.mubr.bf16.gmra.mrb[4].mxu1 %v4939_v46 }
  0x53   : > { %4832 = vmatpush3.bf16.msra.mxu1 %v4932_v41  ;;  %4523 = vmatprep.subr.bf16.mxu0 %v4938_v45 }
  0x54   : > { %4825 = vmatprep.subr.bf16.mxu1 %v4938_v45  ;;  %1382 = vmatprep.mubr.bf16.mxu0 %v4943_v49  ;;  %v955_v45 = vld [vmem:[%s6515_s25 + $0x28] sm:$0xff] }
  0x55   : > { %1439 = vmatprep.mubr.bf16.mxu1 %v4946_v51 }
  0x56   : > { %4524 = vmatpush3.bf16.msra.mxu0 %v4940_v47 }
  0x57   : > { %4833 = vmatpush3.bf16.msra.mxu1 %v4940_v47  ;;  %4525 = vmatprep.subr.bf16.mxu0 %v4941_v48 }
  0x58   : > { %4826 = vmatprep.subr.bf16.mxu1 %v4941_v48 }
  0x59   : > { %1383 = vmatmul.mubr.bf16.gmra.mrb[8].mxu0 %v4945_v50 }
  0x5a   : > { %4526 = vmatpush3.bf16.msra.mxu0 %v4942_v52  ;;  %1440 = vmatmul.mubr.bf16.gmra.mrb[8].mxu1 %v4949_v53 }
  0x5b   : > { %4834 = vmatpush3.bf16.msra.mxu1 %v4942_v52  ;;  %4527 = vmatprep.subr.bf16.mxu0 %v4948_v54 }
  0x5c   : > { %4827 = vmatprep.subr.bf16.mxu1 %v4948_v54  ;;  %1480 = vmatprep.mubr.bf16.mxu0 %v4957_v57 }
  0x5d   : > { %1488 = vmatprep.mubr.bf16.mxu1 %v4960_v59 }
  0x5e   : > { %4528 = vmatpush3.bf16.msra.mxu0 %v4950_v55 }
  0x5f   : > { %4835 = vmatpush3.bf16.msra.mxu1 %v4950_v55  ;;  %4529 = vmatprep.subr.bf16.mxu0 %v4951_v56 }
  0x60   : > { %4828 = vmatprep.subr.bf16.mxu1 %v4951_v56 }
  0x62   : > { %4530 = vmatpush3.bf16.msra.mxu0 %v4952_v58 }
  0x63   : > { %4836 = vmatpush3.bf16.msra.mxu1 %v4952_v58  ;;  %4531 = vmatprep.subr.bf16.mxu0 %v4953_v60 }
  0x64   : > { %4829 = vmatprep.subr.bf16.mxu1 %v4953_v60 }
  0x66   : > { %4532 = vmatpush3.bf16.msra.mxu0 %v4954_v61 }
  0x67   : > { %4837 = vmatpush3.bf16.msra.mxu1 %v4954_v61 }
  0x69   : > { %1481 = vmatmul.mubr.bf16.vlgmr.msra.gmra.mrb[12].mxu0 %v4955_v62 }
  0x6a   : > { %1489 = vmatmul.mubr.bf16.vlgmr.msra.gmra.mrb[12].mxu1 %v4958_v63 }
  0x6b   : > { %1496 = vmatprep.mubr.bf16.mxu1 %v4961_v0 }
  0x72   : > { %1497 = vmatmul.mubr.bf16.gmra.mrb[16].mxu1 %v4963_v1 }
 0x11c   : > { %v4465_v2 = vpop.f32.mrb[0].mxu0 }
 0x11d   : > { %v4499_v3 = vpop.f32.mrb[0].mxu1  ;;  %v4466_v5 = vpop.f32.mrb[1].mxu0 }
 0x11e   : > { %v4467_v6 = vadd.f32 %v4466_v5, %v4465_v2  ;;  %v4500_v7 = vpop.f32.mrb[1].mxu1  ;;  %v4468_v8 = vpop.f32.mrb[2].mxu0 }
 0x11f   : > { %v4501_v9 = vadd.f32 %v4500_v7, %v4499_v3  ;;  %v4502_v10 = vpop.f32.mrb[2].mxu1  ;;  %v4469_v12 = vpop.f32.mrb[3].mxu0 }
 0x120   : > { %v1369_v13 = vadd.f32 %v4467_v6, %v950_v4  ;;  %v4470_v14 = vadd.f32 %v4469_v12, %v4468_v8  ;;  %v4503_v15 = vpop.f32.mrb[3].mxu1 }
 0x121   : > { %v4504_v16 = vadd.f32 %v4503_v15, %v4502_v10 }
 0x122   : > { %v1426_v17 = vadd.f32 %v4501_v9, %v1369_v13  ;;  %v1372_v18 = vadd.f32 %v4470_v14, %v951_v11 }
 0x124   : > { %v1429_v19 = vadd.f32 %v4504_v16, %v1372_v18  ;;  %v4471_v20 = vpop.f32.mrb[4].mxu0 }
 0x125   : > { %v4472_v22 = vpop.f32.mrb[5].mxu0  ;;  %v4505_v23 = vpop.f32.mrb[4].mxu1 }
 0x126   : > { %v4473_v24 = vadd.f32 %v4472_v22, %v4471_v20  ;;  %v4474_v25 = vpop.f32.mrb[6].mxu0  ;;  %v4506_v26 = vpop.f32.mrb[5].mxu1 }
 0x127   : > { %v4475_v28 = vpop.f32.mrb[7].mxu0  ;;  %v4507_v29 = vadd.f32 %v4506_v26, %v4505_v23  ;;  %v4508_v30 = vpop.f32.mrb[6].mxu1 }
 0x128   : > { %v1377_v31 = vadd.f32 %v4473_v24, %v952_v21  ;;  %v4476_v32 = vadd.f32 %v4475_v28, %v4474_v25  ;;  %v4509_v33 = vpop.f32.mrb[7].mxu1 }
 0x129   : > { %v4510_v34 = vadd.f32 %v4509_v33, %v4508_v30 }
 0x12a   : > { %v1380_v35 = vadd.f32 %v4476_v32, %v953_v27  ;;  %v1434_v36 = vadd.f32 %v4507_v29, %v1377_v31 }
 0x12c   : > { %v1437_v37 = vadd.f32 %v4510_v34, %v1380_v35  ;;  %v4477_v38 = vpop.f32.mrb[8].mxu0 }
 0x12d   : > { %v4478_v40 = vpop.f32.mrb[9].mxu0  ;;  %v4511_v41 = vpop.f32.mrb[8].mxu1 }
 0x12e   : > { %v4479_v42 = vadd.f32 %v4478_v40, %v4477_v38  ;;  %v4480_v43 = vpop.f32.mrb[10].mxu0  ;;  %v4512_v44 = vpop.f32.mrb[9].mxu1 }
 0x12f   : > { %v4481_v46 = vpop.f32.mrb[11].mxu0  ;;  %v4513_v47 = vadd.f32 %v4512_v44, %v4511_v41  ;;  %v4514_v48 = vpop.f32.mrb[10].mxu1 }
 0x130   : > { %v1385_v49 = vadd.f32 %v4479_v42, %v954_v39  ;;  %v4482_v50 = vadd.f32 %v4481_v46, %v4480_v43  ;;  %v4515_v51 = vpop.f32.mrb[11].mxu1 }
 0x131   : > { %v4516_v52 = vadd.f32 %v4515_v51, %v4514_v48 }
 0x132   : > { %v1388_v53 = vadd.f32 %v4482_v50, %v955_v45  ;;  %v1442_v54 = vadd.f32 %v4513_v47, %v1385_v49 }
 0x134   : > { %v1445_v55 = vadd.f32 %v4516_v52, %v1388_v53 }
 0x13c   : > { %v4533_v56 = vpop.f32.mrb[12].mxu0 }
 0x13d   : > { %v4539_v57 = vpop.f32.mrb[12].mxu1  ;;  %v4534_v58 = vpop.f32.mrb[13].mxu0 }
 0x13e   : > { %v4535_v59 = vadd.f32 %v4534_v58, %v4533_v56  ;;  %v4540_v60 = vpop.f32.mrb[13].mxu1  ;;  %v4536_v61 = vpop.f32.mrb[14].mxu0 }
 0x13f   : > { %v4541_v62 = vadd.f32 %v4540_v60, %v4539_v57  ;;  %v4542_v63 = vpop.f32.mrb[14].mxu1  ;;  %v4537_v0 = vpop.f32.mrb[15].mxu0 }
 0x140   : > { %v1483_v1 = vadd.f32 %v4535_v59, %v1426_v17  ;;  %v4538_v2 = vadd.f32 %v4537_v0, %v4536_v61  ;;  %v4543_v3 = vpop.f32.mrb[15].mxu1 }
 0x141   : > { %v1491_v4 = vadd.f32 %v4541_v62, %v1434_v36  ;;  %v4544_v5 = vadd.f32 %v4543_v3, %v4542_v63 }
 0x142   : > { %1505 = vst [vmem:[#allocation2] sm:$0xff] %v1483_v1  ;;  %v1486_v6 = vadd.f32 %v4538_v2, %v1429_v19 }
 0x143   : > { %1507 = vst [vmem:[#allocation2 + $0x10] sm:$0xff] %v1491_v4  ;;  %v1494_v7 = vadd.f32 %v4544_v5, %v1437_v37 }
 0x144   : > { %1506 = vst [vmem:[#allocation2 + $0x8] sm:$0xff] %v1486_v6 }
 0x145   : > { %1508 = vst [vmem:[#allocation2 + $0x18] sm:$0xff] %v1494_v7  ;;  %v4545_v8 = vpop.f32.mrb[16].mxu1 }
 0x146   : > { %v4546_v9 = vpop.f32.mrb[17].mxu1 }
 0x147   : > { %v4547_v10 = vadd.f32 %v4546_v9, %v4545_v8  ;;  %v4548_v11 = vpop.f32.mrb[18].mxu1 }
 0x148   : > { %v4549_v12 = vpop.f32.mrb[19].mxu1 }
 0x149   : > { %v1499_v13 = vadd.f32 %v4547_v10, %v1442_v54  ;;  %v4550_v14 = vadd.f32 %v4549_v12, %v4548_v11 }
 0x14b   : > { %1509 = vst [vmem:[#allocation2 + $0x20] sm:$0xff] %v1499_v13  ;;  %v1502_v15 = vadd.f32 %v4550_v14, %v1445_v55 }
 0x14d   : > { %1510 = vst [vmem:[#allocation2 + $0x28] sm:$0xff] %v1502_v15 }
 0x14e PF: > { %v1663_v16 = vld [vmem:[#allocation2] sm:$0xff]  ;;  %v1665_v17 = vld [vmem:[#allocation2 + $0x10] sm:$0xff]  ;;  %v1664_v18 = vld [vmem:[#allocation2 + $0x8] sm:$0xff]  ;;  %v5324_v24 = vmov 0.0   ;;  %v5325_v5 = vmov 0   ;;  %vm5326_vm0 = vmmov 0   ;;  %s6518_s16 = scalar_lea.vmem %s6474_s4, %s5454_s22  ;;  %s6519_s2 = scalar_lea.vmem %s6478_s8, %s5454_s22 }
 0x14f   : > { %1669 = vadd.xlane.f32.xlu0 %v1663_v16  ;;  %1673 = vadd.xlane.f32.xlu1 %v1665_v17  ;;  %v1666_v19 = vld [vmem:[#allocation2 + $0x18] sm:$0xff]  ;;  %v5014_v22 = vld [vmem:[%s5475_s20 + $0x4] ss:$12 sps:$4 sm:$0xff]   ;;  %v5016_v23 = vld [vmem:[%s5475_s20] ss:$12 sps:$4 sm:$0xff]   ;;  %s6516_s24 = sld [smem:[#allocation12_spill]]  ;;  %s6520_s28 = scalar_lea.vmem %s6479_s9, %s5454_s22 }
 0x150   : > { %4682 = vmatprep.subr.bf16.mxu1 %v5324_v24  ;;  %v5017_v25 = vld [vmem:[%s5475_s20 + $0x8] ss:$12 sps:$4 sm:$0xff]   ;;  %1907 = vmatprep.subr.bf16.mxu0 %v5014_v22  ;;  %v5020_v51 = vld [vmem:[%s5475_s20 + $0x18] ss:$12 sps:$4 sm:$0xff]   ;;  %v5021_v52 = vld [vmem:[%s5475_s20 + $0x20] ss:$12 sps:$4 sm:$0xff]  }
 0x151   : > { %1908 = vmatpush1.bf16.msra.mxu0 %v5016_v23  ;;  %4683 = vmatpush3.bf16.msra.mxu1 %v5017_v25  ;;  %v5018_v50 = vld [vmem:[%s5475_s20 + $0x1c] ss:$12 sps:$4 sm:$0xff]   ;;  %v5022_v53 = vld [vmem:[%s5475_s20 + $0x34] ss:$12 sps:$4 sm:$0xff]   ;;  %v5025_v55 = vld [vmem:[%s5475_s20 + $0x38] ss:$12 sps:$4 sm:$0xff]  }
 0x152   : > { %v1667_v20 = vld [vmem:[#allocation2 + $0x20] sm:$0xff]  ;;  %4684 = vmatprep.subr.bf16.mxu1 %v5324_v24  ;;  %1909 = vmatprep.subr.bf16.mxu0 %v5018_v50  ;;  %v5024_v54 = vld [vmem:[%s5475_s20 + $0x30] ss:$12 sps:$4 sm:$0xff]   ;;  %v5026_v56 = vld [vmem:[%s5475_s20 + $0x4c] ss:$12 sps:$4 sm:$0xff]   ;;  %vm2127_vm1 = vcmask 523264  }
 0x153   : > { %1671 = vadd.xlane.f32.xlu0 %v1664_v18  ;;  %1675 = vadd.xlane.f32.xlu1 %v1666_v19  ;;  %v5028_v57 = vld [vmem:[%s5475_s20 + $0x48] ss:$12 sps:$4 sm:$0xff]   ;;  %v5029_v58 = vld [vmem:[%s5475_s20 + $0x50] ss:$12 sps:$4 sm:$0xff]   ;;  %v5032_v60 = vld [vmem:[%s5475_s20 + $0x60] ss:$12 sps:$4 sm:$0xff]  }
 0x154   : > { %v1668_v21 = vld [vmem:[#allocation2 + $0x28] sm:$0xff]  ;;  %v5030_v59 = vld [vmem:[%s5475_s20 + $0x64] ss:$12 sps:$4 sm:$0xff]   ;;  %v5038_v1 = vld [vmem:[%s5475_s20 + $0x94] ss:$12 sps:$4 sm:$0xff]   ;;  %1939 = vmatprep.mubr.bf16.mxu0 %v5325_v5  ;;  %4698 = vmatprep.mubr.msk.bf16.mxu1 %vm5326_vm0, %v5324_v24  ;;  %vm2539_vm2 = vcmask 1043456  }
 0x155   : > { %1910 = vmatpush1.bf16.msra.mxu0 %v5020_v51  ;;  %4685 = vmatpush3.bf16.msra.mxu1 %v5021_v52  ;;  %v5033_v61 = vld [vmem:[%s5475_s20 + $0x68] ss:$12 sps:$4 sm:$0xff]   ;;  %v5036_v63 = vld [vmem:[%s5475_s20 + $0x78] ss:$12 sps:$4 sm:$0xff]   ;;  %v5037_v0 = vld [vmem:[%s5475_s20 + $0x80] ss:$12 sps:$4 sm:$0xff]   ;;  %s6517_s19 = scalar_lea.vmem %s6516_s24, %s5454_s22  ;;  %s6521_s24 = scalar_lea.vmem %s6480_s10, %s5454_s22 }
 0x156   : > { %4686 = vmatprep.subr.bf16.mxu1 %v5324_v24  ;;  %1911 = vmatprep.subr.bf16.mxu0 %v5022_v53  ;;  %v5034_v62 = vld [vmem:[%s5475_s20 + $0x7c] ss:$12 sps:$4 sm:$0xff]   ;;  %v5041_v3 = vld [vmem:[%s5475_s20 + $0x98] ss:$12 sps:$4 sm:$0xff]   ;;  %vm2392_vm4 = vcmask 195584   ;;  %p4430_p6 = scmp.ne.s32.totalorder %s5314_s0, 1 }
 0x157   : > { %1677 = vadd.xlane.f32.xlu0 %v1667_v20  ;;  %1679 = vadd.xlane.f32.xlu1 %v1668_v21  ;;  %v5040_v2 = vld [vmem:[%s5475_s20 + $0x90] ss:$12 sps:$4 sm:$0xff]   ;;  %v5042_v4 = vld [vmem:[%s5475_s20 + $0xac] ss:$12 sps:$4 sm:$0xff]   ;;  %v5044_v6 = vld [vmem:[%s5475_s20 + $0xa8] ss:$12 sps:$4 sm:$0xff]  }
 0x158   : > { %v5045_v7 = vld [vmem:[%s5475_s20 + $0xb0] ss:$12 sps:$4 sm:$0xff]   ;;  %vm3902_vm5 = vcmask (!%p4430_p6), 1040384   ;;  %vm3904_vm6 = vcmask (!%p4430_p6), 1041408   ;;  %vm5329_vm7 = vmmov (!%p4430_p6), 0  }
 0x159   : > { %1912 = vmatpush1.bf16.msra.mxu0 %v5024_v54  ;;  %4687 = vmatpush3.bf16.msra.mxu1 %v5025_v55 }
 0x15a   : > { %4688 = vmatprep.subr.bf16.mxu1 %v5324_v24  ;;  %1913 = vmatprep.subr.bf16.mxu0 %v5026_v56 }
 0x15d   : > { %1914 = vmatpush1.bf16.msra.mxu0 %v5028_v57  ;;  %4689 = vmatpush3.bf16.msra.mxu1 %v5029_v58 }
 0x15e   : > { %4690 = vmatprep.subr.bf16.mxu1 %v5324_v24  ;;  %1915 = vmatprep.subr.bf16.mxu0 %v5030_v59 }
 0x161   : > { %1916 = vmatpush1.bf16.msra.mxu0 %v5032_v60  ;;  %4691 = vmatpush3.bf16.msra.mxu1 %v5033_v61  ;;  %v1545_v60 = vld [vmem:[%s5484_s27] sm:$0x7]  ;;  %s5327_s27 = smov 64  }
 0x162   : > { %4692 = vmatprep.subr.bf16.mxu1 %v5324_v24  ;;  %1917 = vmatprep.subr.bf16.mxu0 %v5034_v62 }
 0x165   : > { %1918 = vmatpush1.bf16.msra.mxu0 %v5036_v63  ;;  %4693 = vmatpush3.bf16.msra.mxu1 %v5037_v0 }
 0x166   : > { %1919 = vmatprep.subr.bf16.mxu0 %v5038_v1  ;;  %4694 = vmatprep.subr.bf16.mxu1 %v5324_v24 }
 0x169   : > { %1920 = vmatpush1.bf16.msra.mxu0 %v5040_v2  ;;  %4695 = vmatpush3.bf16.msra.mxu1 %v5041_v3 }
 0x16a   : > { %1921 = vmatprep.subr.bf16.mxu0 %v5042_v4  ;;  %4696 = vmatprep.subr.bf16.mxu1 %v5324_v24 }
 0x16d   : > { %1922 = vmatpush1.bf16.msra.mxu0 %v5044_v6  ;;  %4697 = vmatpush3.bf16.msra.mxu1 %v5045_v7 }
 0x1dc   : > { %v1670_v26 = vpop.xlane.xlu0 %1669  ;;  %v1674_v27 = vpop.xlane.xlu1 %1673 }
 0x1dd   : > { %v1682_v28 = vmul.f32 0.0078125, %v1670_v26  ;;  %v1684_v29 = vmul.f32 0.0078125, %v1674_v27 }
 0x1df   : > { %v5737_v30 = vsub.f32 %v1663_v16, %v1682_v28  ;;  %v5739_v31 = vsub.f32 %v1665_v17, %v1684_v29  ;;  %v4312_v29 = vld [vmem:[%s6517_s19] ss:$0 sm:$0xff]  ;;  %s6522_s19 = scalar_lea.vmem %s6484_s14, %s5454_s22  ;;  %s6523_s22 = sld [smem:[#allocation15_spill]] (!%p4430_p6) }
 0x1e0   : > { %v1672_v32 = vpop.xlane.xlu0 %1671  ;;  %v1676_v33 = vpop.xlane.xlu1 %1675 }
 0x1e1   : > { %v1683_v34 = vmul.f32 0.0078125, %v1672_v32  ;;  %v1694_v35 = vmul.f32 %v5737_v30, %v5737_v30  ;;  %v1685_v36 = vmul.f32 0.0078125, %v1676_v33  ;;  %v1696_v39 = vmul.f32 %v5739_v31, %v5739_v31 }
 0x1e3   : > { %v5743_v37 = vsub.f32 %v1664_v18, %v1683_v34  ;;  %1700 = vadd.xlane.f32.xlu0 %v1694_v35  ;;  %v5745_v38 = vsub.f32 %v1666_v19, %v1685_v36  ;;  %v4313_v36 = vld [vmem:[%s6518_s16] ss:$0 sm:$0xff]  ;;  %s6524_s16 = sld [smem:[#allocation16_spill]] (!%p4430_p6) }
 0x1e4   : > { %v1678_v40 = vpop.xlane.xlu0 %1677  ;;  %v1680_v41 = vpop.xlane.xlu1 %1679 }
 0x1e5   : > { %v1686_v42 = vmul.f32 0.0078125, %v1678_v40  ;;  %v1695_v43 = vmul.f32 %v5743_v37, %v5743_v37  ;;  %v1687_v44 = vmul.f32 0.0078125, %v1680_v41  ;;  %v1697_v47 = vmul.f32 %v5745_v38, %v5745_v38 }
 0x1e7   : > { %v5751_v45 = vsub.f32 %v1667_v20, %v1686_v42  ;;  %1704 = vadd.xlane.f32.xlu0 %v1696_v39  ;;  %1702 = vadd.xlane.f32.xlu1 %v1695_v43  ;;  %v5753_v46 = vsub.f32 %v1668_v21, %v1687_v44 }
 0x1e9   : > { %v1698_v48 = vmul.f32 %v5751_v45, %v5751_v45  ;;  %v1699_v49 = vmul.f32 %v5753_v46, %v5753_v46 }
 0x1eb   : > { %1706 = vadd.xlane.f32.xlu1 %v1697_v47  ;;  %1708 = vadd.xlane.f32.xlu0 %v1698_v48 }
 0x1ef   : > { %1710 = vadd.xlane.f32.xlu1 %v1699_v49 }
 0x270   : > { %v1701_v8 = vpop.xlane.xlu0 %1700 }
 0x271   : > { %v1712_v9 = vmul.f32 0.0078125, %v1701_v8 }
 0x273   : > { %v1718_v10 = vadd.f32 1e-06, %v1712_v9 }
 0x274   : > { %v1703_v11 = vpop.xlane.xlu1 %1702  ;;  %v1705_v12 = vpop.xlane.xlu0 %1704 }
 0x275   : > { %5134 = vrsqrt.f32 %v1718_v10  ;;  %v1713_v13 = vmul.f32 0.0078125, %v1703_v11  ;;  %v1714_v14 = vmul.f32 0.0078125, %v1705_v12 }
 0x277   : > { %v1719_v15 = vadd.f32 1e-06, %v1713_v13  ;;  %v1720_v16 = vadd.f32 1e-06, %v1714_v14 }
 0x278   : > { %v1707_v17 = vpop.xlane.xlu1 %1706  ;;  %v1709_v18 = vpop.xlane.xlu0 %1708 }
 0x279   : > { %5136 = vrsqrt.f32 %v1719_v15  ;;  %v1715_v19 = vmul.f32 0.0078125, %v1707_v17  ;;  %v1716_v21 = vmul.f32 0.0078125, %v1709_v18 }
 0x27a   : > { %5138 = vrsqrt.f32 %v1720_v16 }
 0x27b   : > { %v1721_v20 = vadd.f32 1e-06, %v1715_v19  ;;  %v1722_v26 = vadd.f32 1e-06, %v1716_v21 }
 0x27c   : > { %v1711_v22 = vpop.xlane.xlu1 %1710 }
 0x27d   : > { %5140 = vrsqrt.f32 %v1721_v20  ;;  %v1717_v23 = vmul.f32 0.0078125, %v1711_v22 }
 0x27f   : > { %v5135_v25 = vpop.eup %5134  ;;  %v1723_v27 = vadd.f32 1e-06, %v1717_v23 }
 0x280   : > { %v1730_v28 = vmul.f32 %v5135_v25, %v5737_v30 }
 0x281   : > { %5142 = vrsqrt.f32 %v1723_v27 }
 0x282   : > { %5144 = vrsqrt.f32 %v1722_v26  ;;  %v1742_v34 = vmul.f32 %v4312_v29, %v1730_v28 }
 0x283   : > { %v5137_v32 = vpop.eup %5136 }
 0x284   : > { %v1731_v33 = vmul.f32 %v5137_v32, %v5743_v37  ;;  %v5139_v35 = vpop.eup %5138  ;;  %v1754_v30 = vadd.f32 %v4313_v36, %v1742_v34 }
 0x285   : > { %v1732_v42 = vmul.f32 %v5139_v35, %v5739_v31 }
 0x286   : > { %v1743_v39 = vmul.f32 %v4312_v29, %v1731_v33 }
 0x287   : > { %v5141_v40 = vpop.eup %5140  ;;  %v1744_v37 = vmul.f32 %v4312_v29, %v1732_v42 }
 0x288   : > { %v1755_v41 = vadd.f32 %v4313_v36, %v1743_v39  ;;  %v1733_v43 = vmul.f32 %v5141_v40, %v5745_v38 }
 0x289   : > { %v1756_v52 = vadd.f32 %v4313_v36, %v1744_v37 }
 0x28a   : > { %v1760_v44 = vpack.c.bf16 %v1755_v41, %v1754_v30  ;;  %v1745_v47 = vmul.f32 %v4312_v29, %v1733_v43 }
 0x28b   : > { %v5143_v48 = vpop.eup %5142 }
 0x28c   : > { %1940 = vmatmul.mubr.bf16.vlgmr.msra.gmra.mrb[0].mxu0 %v1760_v44  ;;  %4699 = vmatmul.mubr.bf16.vlgmr.msra.gmra.mrb[0].mxu1 %v1760_v44  ;;  %v5145_v49 = vpop.eup %5144  ;;  %v1757_v50 = vadd.f32 %v4313_v36, %v1745_v47  ;;  %v1735_v51 = vmul.f32 %v5143_v48, %v5753_v46  ;;  %v1764_v46 = vlaneseq }
 0x28d   : > { %1949 = vmatprep.mubr.bf16.mxu0 %v5325_v5  ;;  %4702 = vmatprep.mubr.msk.bf16.mxu1 %vm5326_vm0, %v5324_v24  ;;  %v1734_v31 = vmul.f32 %v5145_v49, %v5751_v45 }
 0x28e   : > { %v1761_v53 = vpack.c.bf16 %v1757_v50, %v1756_v52  ;;  %v1747_v38 = vmul.f32 %v4312_v29, %v1735_v51  ;;  %v5814_v58 = vshrl.u32 %v1764_v46, 7 }
 0x28f   : > { %v1746_v54 = vmul.f32 %v4312_v29, %v1734_v31 }
 0x290   : > { %v1759_v55 = vadd.f32 %v4313_v36, %v1747_v38  ;;  %v1766_v45 = vsub.s32 0, %v5814_v58  ;;  %v1774_v59 = vsub.s32 2, %v5814_v58  ;;  %v1770_v61 = vsub.s32 1, %v5814_v58 }
 0x291   : > { %v1758_v56 = vadd.f32 %v4313_v36, %v1746_v54 }
 0x292   : > { %v5822_v62 = vrot.slane %v1545_v60, %v1766_v45  ;;  %v5826_v63 = vrot.slane %v1545_v60, %v1774_v59  ;;  %v5830_v2 = vrot.slane %v1545_v60, %v1770_v61 }
 0x293   : > { %v1762_v57 = vpack.c.bf16 %v1759_v55, %v1758_v56 }
 0x294   : > { %1950 = vmatmul.mubr.bf16.gmra.mrb[4].mxu0 %v1761_v53  ;;  %4703 = vmatmul.mubr.bf16.gmra.mrb[4].mxu1 %v1761_v53 }
 0x295   : > { %1959 = vmatprep.mubr.bf16.mxu0 %v5325_v5  ;;  %4706 = vmatprep.mubr.msk.bf16.mxu1 %vm5326_vm0, %v5324_v24 }
 0x29c   : > { %1960 = vmatmul.mubr.bf16.gmra.mrb[8].mxu0 %v1762_v57  ;;  %4707 = vmatmul.mubr.bf16.gmra.mrb[8].mxu1 %v1762_v57 }
 0x35f   : > { %v1941_v0 = vpop.f32.mrb[0].mxu0  ;;  %v2004_v1 = vpop.f32.mrb[0].mxu1 }
 0x360   : > { %v1943_v3 = vpop.f32.mrb[1].mxu0  ;;  %v4700_v4 = vpop.f32.mrb[1].mxu1  ;;  %v1942_v8 = vadd.f32 %v1941_v0, %v5822_v62  ;;  %v5834_v9 = vadd.f32 %v2004_v1, %v5826_v63 }
 0x361   : > { %v1945_v6 = vpop.f32.mrb[2].mxu0  ;;  %v2007_v7 = vpop.f32.mrb[2].mxu1  ;;  %v1944_v14 = vadd.f32 %v1943_v3, %v5830_v2 }
 0x362   : > { %v1946_v10 = vadd.f32 %v1945_v6, %v5822_v62  ;;  %v5838_v11 = vadd.f32 %v2007_v7, %v5826_v63  ;;  %v1947_v12 = vpop.f32.mrb[3].mxu0  ;;  %v4701_v13 = vpop.f32.mrb[3].mxu1 }
 0x363   : > { %v1948_v15 = vadd.f32 %v1947_v12, %v5830_v2 }
 0x364   : > { %v2051_v16 = vpack.c.bf16 %v1946_v10, %v1942_v8  ;;  %v4989_v17 = vpack.i.bf16 %v5838_v11, %v5834_v9  ;;  %v5846_v18 = vpack.c.bf16 %v5838_v11, %v5834_v9 }
 0x365   : > { %v4964_v19 = vpack.i.bf16 %v1948_v15, %v1944_v14  ;;  %v2083_v20 = vpack.c.bf16 %v1948_v15, %v1944_v14 }
 0x366   : > { %4714 = vmatprep.mubr.msk.bf16.mxu1 %vm2127_vm1, %v2051_v16 }
 0x367   : > { %v1951_v21 = vpop.f32.mrb[4].mxu0  ;;  %v2012_v22 = vpop.f32.mrb[4].mxu1  ;;  %4965 = vrot.lane.b32.xlu0 %v4964_v19, %s5327_s27  ;;  %4838 = vmatprep.subr.msk.bf16.mxu1 %vm2127_vm1, %v2083_v20  ;;  %v2135_v23 = vsel %vm2127_vm1, %v2083_v20, 0 }
 0x368   : > { %v1953_v25 = vpop.f32.mrb[5].mxu0  ;;  %v4704_v26 = vpop.f32.mrb[5].mxu1  ;;  %4711 = vmatpush3.bf16.xpose.msra.mxu1 %v2135_v23  ;;  %v1952_v49 = vadd.f32 %v1951_v21, %v5822_v62 }
 0x369   : > { %v1954_v27 = vadd.f32 %v1953_v25, %v5830_v2  ;;  %v1955_v28 = vpop.f32.mrb[6].mxu0  ;;  %v2015_v29 = vpop.f32.mrb[6].mxu1 }
 0x36a   : > { %v1957_v32 = vpop.f32.mrb[7].mxu0  ;;  %v4705_v33 = vpop.f32.mrb[7].mxu1  ;;  %v1956_v42 = vadd.f32 %v1955_v28, %v5822_v62  ;;  %v5859_v43 = vadd.f32 %v2015_v29, %v5826_v63  ;;  %v2052_v3 = vpack.c.bf16 %v1952_v49, %v1952_v49 }
 0x36b   : > { %v2084_v34 = vpack.c.bf16 %v1954_v27, %v1954_v27  ;;  %v4969_v35 = vpack.i.bf16 %v1942_v8, %v1954_v27  ;;  %v1958_v36 = vadd.f32 %v1957_v32, %v5830_v2  ;;  %v5891_v8 = vadd.f32 %v2012_v22, %v5826_v63 }
 0x36d   : > { %v4974_v39 = vpack.i.bf16 %v1958_v36, %v1946_v10  ;;  %4839 = vmatprep.subr.msk.bf16.mxu1 %vm2127_vm1, %v2084_v34  ;;  %4970 = vrot.lane.b32.xlu1 %v4969_v35, %s5327_s27  ;;  %v2138_v41 = vsel %vm2127_vm1, %v2084_v34, 0  ;;  %v2116_v12 = vpack.c.bf16 %v5891_v8, %v5891_v8 }
 0x36f   : > { %v1961_v40 = vpop.f32.mrb[8].mxu0  ;;  %v2020_v30 = vpop.f32.mrb[8].mxu1 }
 0x370   : > { %v1962_v44 = vadd.f32 %v1961_v40, %v5822_v62  ;;  %v5863_v47 = vadd.f32 %v2020_v30, %v5826_v63  ;;  %v1963_v48 = vpop.f32.mrb[9].mxu0  ;;  %v4708_v37 = vpop.f32.mrb[9].mxu1  ;;  %4713 = vmatpush3.bf16.xpose.msra.mxu1 %v2138_v41 }
 0x371   : > { %v1964_v50 = vadd.f32 %v1963_v48, %v5830_v2  ;;  %v1965_v51 = vpop.f32.mrb[10].mxu0  ;;  %v2023_v52 = vpop.f32.mrb[10].mxu1  ;;  %4975 = vrot.lane.b32.xlu1 %v4974_v39, %s5327_s27 }
 0x372   : > { %v4984_v31 = vpack.i.bf16 %v1962_v44, %v1956_v42  ;;  %v2055_v53 = vpack.c.bf16 %v1962_v44, %v1956_v42  ;;  %v4994_v38 = vpack.i.bf16 %v5863_v47, %v5859_v43  ;;  %v5872_v54 = vpack.c.bf16 %v5863_v47, %v5859_v43  ;;  %v1967_v55 = vpop.f32.mrb[11].mxu0  ;;  %v4709_v56 = vpop.f32.mrb[11].mxu1 }
 0x373   : > { %v2087_v57 = vpack.c.bf16 %v1964_v50, %v1958_v36  ;;  %v4979_v60 = vpack.i.bf16 %v1952_v49, %v1964_v50  ;;  %v5875_v0 = vadd.f32 %v2023_v52, %v5826_v63  ;;  %v1968_v1 = vadd.f32 %v1967_v55, %v5830_v2 }
 0x374   : > { %4730 = vmatprep.mubr.msk.bf16.mxu0 %vm2127_vm1, %v2055_v53  ;;  %v1966_v7 = vadd.f32 %v1965_v51, %v5822_v62  ;;  %v2541_v62 = vsel %vm2539_vm2, %v2116_v12, 0 }
 0x375   : > { %4842 = vmatprep.subr.msk.bf16.mxu0 %vm2127_vm1, %v2087_v57  ;;  %4980 = vrot.lane.b32.xlu1 %v4979_v60, %s5327_s27  ;;  %v2255_v4 = vsel %vm2127_vm1, %v2087_v57, 0  ;;  %v2088_v6 = vpack.c.bf16 %v1968_v1, %v1968_v1  ;;  %v2124_v57 = vand.u32 127, %v1764_v46 }
 0x376   : > { %2078 = vrot.lane.b32.xlu0 %v1968_v1, %s5327_s27  ;;  %4727 = vmatpush3.bf16.xpose.msra.mxu0 %v2255_v4  ;;  %v2056_v10 = vpack.c.bf16 %v1966_v7, %v1966_v7 }
 0x377   : > { %4715 = vmatmul.mubr.msk.bf16.vlgmr.msra.gmra.mrb[12].mxu1 %vm2127_vm1, %v2052_v3  ;;  %4843 = vmatprep.subr.msk.bf16.mxu0 %vm2127_vm1, %v2088_v6  ;;  %v2258_v2 = vsel %vm2127_vm1, %v2088_v6, 0  ;;  %vm2125_vm3 = vcmp.ge.s32.totalorder %v2124_v57, 17 }
 0x379   : > { %4985 = vrot.lane.b32.xlu1 %v4984_v31, %s5327_s27 }
 0x37a   : > { %2046 = vrot.lane.b32.xlu0 %v1966_v7, %s5327_s27  ;;  %v2126_v7 = vsel %vm2125_vm3, -1e+09, %v5324_v24 }
 0x37e   : > { %4729 = vmatpush3.bf16.xpose.msra.mxu0 %v2258_v2 }
 0x37f   : > { %4742 = vmatprep.subr.bf16.mxu0 %v5846_v18 }
 0x385   : > { %4731 = vmatmul.mubr.msk.bf16.vlgmr.msra.gmra.mrb[12].mxu0 %vm2127_vm1, %v2056_v10 }
 0x386   : > { %4743 = vmatpush3.bf16.msra.mxu0 %v5846_v18 }
 0x387   : > { %4846 = vmatprep.subr.msk.bf16.mxu0 %vm2539_vm2, %v2116_v12 }
 0x38a   : > { %4745 = vmatpush3.bf16.msra.mxu0 %v2541_v62 }
 0x38b   : > { %4758 = vmatprep.subr.bf16.mxu0 %v5872_v54 }
 0x3d9   : > { %v4966_v13 = vpop.permute.xlu0 %4965 }
 0x3da   : > { %v4968_v14 = vunpack.i.h.bf16 %v4966_v13  ;;  %v4967_v63 = vunpack.i.l.bf16 %v4966_v13 }
 0x3dc   : > { %v2085_v15 = vpack.c.bf16 %v4968_v14, %v4967_v63 }
 0x3de   : > { %4840 = vmatprep.subr.msk.bf16.mxu1 %vm2127_vm1, %v2085_v15  ;;  %v2195_v16 = vsel %vm2127_vm1, %v2085_v15, 0 }
 0x3df   : > { %v4971_v19 = vpop.permute.xlu1 %4970  ;;  %4719 = vmatpush3.bf16.xpose.msra.mxu1 %v2195_v16 }
 0x3e0   : > { %v4972_v20 = vunpack.i.l.bf16 %v4971_v19  ;;  %v4973_v22 = vunpack.i.h.bf16 %v4971_v19 }
 0x3e2   : > { %v2086_v18 = vpack.c.bf16 %v4972_v20, %v4972_v20 }
 0x3e3   : > { %v4976_v21 = vpop.permute.xlu1 %4975 }
 0x3e4   : > { %v4977_v23 = vunpack.i.l.bf16 %v4976_v21  ;;  %4841 = vmatprep.subr.msk.bf16.mxu1 %vm2127_vm1, %v2086_v18  ;;  %v2198_v26 = vsel %vm2127_vm1, %v2086_v18, 0  ;;  %v4978_v28 = vunpack.i.h.bf16 %v4976_v21 }
 0x3e6   : > { %v2053_v25 = vpack.c.bf16 %v4977_v23, %v4973_v22 }
 0x3e7   : > { %v4981_v27 = vpop.permute.xlu1 %4980  ;;  %4721 = vmatpush3.bf16.xpose.msra.mxu1 %v2198_v26 }
 0x3e8   : > { %v4983_v29 = vunpack.i.h.bf16 %v4981_v27  ;;  %v4982_v32 = vunpack.i.l.bf16 %v4981_v27  ;;  %4722 = vmatprep.mubr.msk.bf16.mxu1 %vm2127_vm1, %v2053_v25  ;;  %v2079_v34 = vpop.permute.xlu0 %2078 }
 0x3e9   : > { %v2090_v30 = vpack.c.bf16 %v2079_v34, %v2079_v34 }
 0x3ea   : > { %v2089_v33 = vpack.c.bf16 %v4982_v32, %v4978_v28  ;;  %v2054_v36 = vpack.c.bf16 %v4983_v29, %v4983_v29 }
 0x3eb   : > { %v4986_v35 = vpop.permute.xlu1 %4985  ;;  %v2318_v44 = vsel %vm2127_vm1, %v2090_v30, 0 }
 0x3ec   : > { %v4988_v39 = vunpack.i.h.bf16 %v4986_v35  ;;  %v4987_v40 = vunpack.i.l.bf16 %v4986_v35  ;;  %4844 = vmatprep.subr.msk.bf16.mxu1 %vm2127_vm1, %v2089_v33  ;;  %v2315_v42 = vsel %vm2127_vm1, %v2089_v33, 0  ;;  %v2047_v48 = vpop.permute.xlu0 %2046 }
 0x3ed   : > { %v2058_v37 = vpack.c.bf16 %v2047_v48, %v2047_v48 }
 0x3ee   : > { %v2057_v41 = vpack.c.bf16 %v4988_v39, %v4987_v40  ;;  %4723 = vmatmul.mubr.msk.bf16.vlgmr.msra.gmra.mrb[16].mxu1 %vm2127_vm1, %v2054_v36 }
 0x3ef   : > { %4735 = vmatpush3.bf16.xpose.msra.mxu1 %v2315_v42 }
 0x3f0   : > { %4845 = vmatprep.subr.msk.bf16.mxu1 %vm2127_vm1, %v2090_v30  ;;  %4738 = vmatprep.mubr.msk.bf16.mxu1 %vm2127_vm1, %v2057_v41 }
 0x3f7   : > { %4737 = vmatpush3.bf16.xpose.msra.mxu1 %v2318_v44 }
 0x3fe   : > { %4739 = vmatmul.mubr.msk.bf16.vlgmr.msra.gmra.mrb[20].mxu1 %vm2127_vm1, %v2058_v37 }
 0x44a   : > { %v4716_v49 = vpop.f32.mrb[12].mxu1 }
 0x44b   : > { %v2174_v50 = vpop.f32.mrb[13].mxu1  ;;  %v2370_v13 = vmul.f32 0.125, %v4716_v49 }
 0x44c   : > { %v4717_v51 = vpop.f32.mrb[14].mxu1  ;;  %v2368_v3 = vmul.f32 0.125, %v2174_v50 }
 0x44d   : > { %v2177_v52 = vpop.f32.mrb[15].mxu1  ;;  %v5920_v18 = vadd.f32 %v2370_v13, %v2126_v7 }
 0x44e   : > { %v5915_v15 = vadd.f32 %v2368_v3, %v2126_v7  ;;  %v2369_v36 = vmul.f32 0.125, %v2177_v52 }
 0x44f   : > { %v2399_v22 = vsel %vm2392_vm4, %v5920_v18, -inf }
 0x450   : > { %v2393_v20 = vsel %vm2392_vm4, %v5915_v15, -inf  ;;  %v5935_v48 = vadd.f32 %v2369_v36, %v2126_v7 }
 0x452   : > { %v2396_v49 = vsel %vm2392_vm4, %v5935_v48, -inf }
 0x458   : > { %v4732_v31 = vpop.f32.mrb[12].mxu0 }
 0x459   : > { %v2294_v53 = vpop.f32.mrb[13].mxu0  ;;  %v2376_v37 = vmul.f32 0.125, %v4732_v31 }
 0x45a   : > { %v4733_v55 = vpop.f32.mrb[14].mxu0  ;;  %v2374_v42 = vmul.f32 0.125, %v2294_v53 }
 0x45b   : > { %v2297_v56 = vpop.f32.mrb[15].mxu0  ;;  %v5943_v52 = vadd.f32 %v2376_v37, %v2126_v7 }
 0x45c   : > { %v2375_v19 = vmul.f32 0.125, %v2297_v56  ;;  %v5939_v50 = vadd.f32 %v2374_v42, %v2126_v7 }
 0x45d   : > { %v2417_v53 = vsel %vm2392_vm4, %v5943_v52, -inf }
 0x45e   : > { %v5925_v23 = vadd.f32 %v2375_v19, %v2126_v7  ;;  %v2411_v51 = vsel %vm2392_vm4, %v5939_v50, -inf }
 0x460   : > { %v2414_v32 = vsel %vm2392_vm4, %v5925_v23, -inf }
 0x4c1   : > { %v4724_v60 = vpop.f32.mrb[16].mxu1 }
 0x4c2   : > { %v2234_v1 = vpop.f32.mrb[17].mxu1  ;;  %v2373_v10 = vmul.f32 0.125, %v4724_v60 }
 0x4c3   : > { %v2371_v4 = vmul.f32 0.125, %v2234_v1  ;;  %v4725_v6 = vpop.f32.mrb[18].mxu1 }
 0x4c4   : > { %v2237_v2 = vpop.f32.mrb[19].mxu1  ;;  %v2385_v16 = vadd.f32 %v2373_v10, %v2126_v7 }
 0x4c5   : > { %v2372_v12 = vmul.f32 0.125, %v2237_v2  ;;  %v2383_v62 = vadd.f32 %v2371_v4, %v2126_v7 }
 0x4c6   : > { %v2408_v21 = vsel %vm2392_vm4, %v2385_v16, -inf }
 0x4c7   : > { %v2402_v14 = vsel %vm2392_vm4, %v2383_v62, -inf  ;;  %v2384_v63 = vadd.f32 %v2372_v12, %v2126_v7 }
 0x4c8   : > { %2403 = vmax.xlane.f32.xlu1 %v2402_v14 }
 0x4c9   : > { %v2405_v46 = vsel %vm2392_vm4, %v2384_v63, -inf }
 0x4ca   : > { %2406 = vmax.xlane.f32.xlu0 %v2405_v46 }
 0x4cc   : > { %2394 = vmax.xlane.f32.xlu1 %v2393_v20 }
 0x4ce   : > { %2409 = vmax.xlane.f32.xlu0 %v2408_v21 }
 0x4d0   : > { %2400 = vmax.xlane.f32.xlu1 %v2399_v22 }
 0x4d1   : > { %v4740_v25 = vpop.f32.mrb[20].mxu1 }
 0x4d2   : > { %v2354_v26 = vpop.f32.mrb[21].mxu1  ;;  %v2379_v27 = vmul.f32 0.125, %v4740_v25 }
 0x4d3   : > { %v2377_v28 = vmul.f32 0.125, %v2354_v26  ;;  %v4741_v29 = vpop.f32.mrb[22].mxu1 }
 0x4d4   : > { %2415 = vmax.xlane.f32.xlu1 %v2414_v32  ;;  %v2357_v33 = vpop.f32.mrb[23].mxu1  ;;  %v2391_v30 = vadd.f32 %v2379_v27, %v2126_v7 }
 0x4d5   : > { %v2378_v34 = vmul.f32 0.125, %v2357_v33  ;;  %v2389_v35 = vadd.f32 %v2377_v28, %v2126_v7 }
 0x4d6   : > { %v2426_v44 = vsel %vm2392_vm4, %v2391_v30, -inf }
 0x4d7   : > { %v2420_v39 = vsel %vm2392_vm4, %v2389_v35, -inf  ;;  %v5930_v40 = vadd.f32 %v2378_v34, %v2126_v7 }
 0x4d8   : > { %2421 = vmax.xlane.f32.xlu0 %v2420_v39 }
 0x4d9   : > { %v2423_v41 = vsel %vm2392_vm4, %v5930_v40, -inf }
 0x4da   : > { %2424 = vmax.xlane.f32.xlu1 %v2423_v41 }
 0x4dc   : > { %2427 = vmax.xlane.f32.xlu0 %v2426_v44 }
 0x4e0   : > { %2397 = vmax.xlane.f32.xlu0 %v2396_v49 }
 0x4e4   : > { %2412 = vmax.xlane.f32.xlu0 %v2411_v51 }
 0x4e8   : > { %2418 = vmax.xlane.f32.xlu0 %v2417_v53 }
 0x4eb   : > { %4990 = vrot.lane.b32.xlu1 %v4989_v17, %s5327_s27 }
 0x555   : > { %v2404_v31 = vpop.xlane.xlu1 %2403 }
 0x556   : > { %v2432_v60 = vsub.f32 %v2383_v62, %v2404_v31 }
 0x557   : > { %v2407_v55 = vpop.xlane.xlu0 %2406 }
 0x558   : > { %v2433_v56 = vsub.f32 %v2384_v63, %v2407_v55  ;;  %v2447_v7 = vmul.f32 1.442695, %v2432_v60 }
 0x559   : > { %v5951_v57 = vpop.xlane.xlu1 %2394 }
 0x55a   : > { %v2449_v1 = vmul.f32 1.442695, %v2433_v56  ;;  %v2429_v56 = vsub.f32 %v5915_v15, %v5951_v57 }
 0x55b   : > { %v2410_v3 = vpop.xlane.xlu0 %2409 }
 0x55c   : > { %5146 = vpow2.f32 %v2449_v1  ;;  %v2434_v4 = vsub.f32 %v2385_v16, %v2410_v3  ;;  %v2441_v60 = vmul.f32 1.442695, %v2429_v56 }
 0x55d   : > { %v2401_v6 = vpop.xlane.xlu1 %2400 }
 0x55e   : > { %v2451_v2 = vmul.f32 1.442695, %v2434_v4  ;;  %v2431_v42 = vsub.f32 %v5920_v18, %v2401_v6 }
 0x560   : > { %5148 = vpow2.f32 %v2451_v2  ;;  %v2445_v47 = vmul.f32 1.442695, %v2431_v42 }
 0x561   : > { %5150 = vpow2.f32 %v2447_v7  ;;  %v5953_v10 = vpop.xlane.xlu1 %2415 }
 0x562   : > { %v2436_v1 = vsub.f32 %v5925_v23, %v5953_v10 }
 0x564   : > { %v2455_v3 = vmul.f32 1.442695, %v2436_v1 }
 0x565   : > { %v2422_v12 = vpop.xlane.xlu0 %2421 }
 0x566   : > { %v5955_v9 = vpop.eup %5146  ;;  %v2438_v13 = vsub.f32 %v2389_v35, %v2422_v12 }
 0x567   : > { %v2425_v11 = vpop.xlane.xlu1 %2424  ;;  %v2477_v17 = vsel %vm2392_vm4, %v5955_v9, 0.0 }
 0x568   : > { %2478 = vadd.xlane.f32.xlu0 %v2477_v17  ;;  %v2459_v20 = vmul.f32 1.442695, %v2438_v13  ;;  %v2439_v34 = vsub.f32 %v5930_v40, %v2425_v11 }
 0x569   : > { %v2428_v62 = vpop.xlane.xlu0 %2427 }
 0x56a   : > { %v5959_v14 = vpop.eup %5148  ;;  %v2440_v63 = vsub.f32 %v2391_v30, %v2428_v62  ;;  %v2461_v35 = vmul.f32 1.442695, %v2439_v34 }
 0x56b   : > { %v4991_v46 = vpop.permute.xlu1 %4990  ;;  %v2480_v16 = vsel %vm2392_vm4, %v5959_v14, 0.0  ;;  %v5963_v19 = vpop.eup %5150 }
 0x56c   : > { %v2463_v21 = vmul.f32 1.442695, %v2440_v63  ;;  %v4993_v22 = vunpack.i.h.bf16 %v4991_v46  ;;  %v4992_v25 = vunpack.i.l.bf16 %v4991_v46  ;;  %2481 = vadd.xlane.f32.xlu1 %v2480_v16  ;;  %v2474_v27 = vsel %vm2392_vm4, %v5963_v19, 0.0 }
 0x56d   : > { %v2398_v36 = vpop.xlane.xlu0 %2397 }
 0x56e   : > { %5152 = vpow2.f32 %v2463_v21  ;;  %v2117_v26 = vpack.c.bf16 %v4993_v22, %v4992_v25  ;;  %v2430_v39 = vsub.f32 %v5935_v48, %v2398_v36 }
 0x56f   : > { %5154 = vpow2.f32 %v2459_v20 }
 0x570   : > { %2475 = vadd.xlane.f32.xlu1 %v2474_v27  ;;  %4750 = vmatprep.subr.bf16.mxu1 %v2117_v26  ;;  %5156 = vpow2.f32 %v2461_v35  ;;  %v2443_v44 = vmul.f32 1.442695, %v2430_v39 }
 0x571   : > { %4751 = vmatpush3.bf16.msra.mxu1 %v2117_v26  ;;  %v2413_v30 = vpop.xlane.xlu0 %2412 }
 0x572   : > { %5158 = vpow2.f32 %v2443_v44 }
 0x573   : > { %5160 = vpow2.f32 %v2445_v47 }
 0x575   : > { %v2419_v40 = vpop.xlane.xlu0 %2418 }
 0x576   : > { %v2437_v37 = vsub.f32 %v5943_v52, %v2419_v40 }
 0x578   : > { %v5967_v28 = vpop.eup %5152  ;;  %v2457_v48 = vmul.f32 1.442695, %v2437_v37 }
 0x579   : > { %v2498_v29 = vsel %vm2392_vm4, %v5967_v28, 0.0  ;;  %v5971_v32 = vpop.eup %5154 }
 0x57a   : > { %2499 = vadd.xlane.f32.xlu0 %v2498_v29  ;;  %v2492_v33 = vsel %vm2392_vm4, %v5971_v32, 0.0  ;;  %v5983_v41 = vpop.eup %5156 }
 0x57b   : > { %v2495_v43 = vsel %vm2392_vm4, %v5983_v41, 0.0 }
 0x57c   : > { %v5990_v49 = vpop.eup %5158 }
 0x57d   : > { %v2468_v18 = vsel %vm2392_vm4, %v5990_v49, 0.0  ;;  %v5994_v51 = vpop.eup %5160 }
 0x57e   : > { %2493 = vadd.xlane.f32.xlu0 %v2492_v33 }
 0x581   : > { %4995 = vrot.lane.b32.xlu1 %v4994_v38, %s5327_s27  ;;  %v2435_v38 = vsub.f32 %v5939_v50, %v2413_v30  ;;  %v2471_v50 = vsel %vm2392_vm4, %v5994_v51, 0.0 }
 0x594   : > { %2098 = vrot.lane.b32.xlu0 %v5891_v8, %s5327_s27  ;;  %v2453_v8 = vmul.f32 1.442695, %v2435_v38 }
 0x596   : > { %5162 = vpow2.f32 %v2453_v8 }
 0x597   : > { %5164 = vpow2.f32 %v2457_v48 }
 0x598   : > { %5166 = vpow2.f32 %v2441_v60 }
 0x599   : > { %5168 = vpow2.f32 %v2455_v3 }
 0x5a0   : > { %v6000_v53 = vpop.eup %5162 }
 0x5a1   : > { %v2483_v52 = vsel %vm2392_vm4, %v6000_v53, 0.0  ;;  %v6004_v31 = vpop.eup %5164 }
 0x5a2   : > { %v2489_v55 = vsel %vm2392_vm4, %v6004_v31, 0.0  ;;  %v6012_v4 = vpop.eup %5166 }
 0x5a3   : > { %v2465_v6 = vsel %vm2392_vm4, %v6012_v4, 0.0  ;;  %v6016_v7 = vpop.eup %5168 }
 0x5a4   : > { %v2486_v2 = vsel %vm2392_vm4, %v6016_v7, 0.0 }
 0x5a5   : > { %2496 = vadd.xlane.f32.xlu1 %v2495_v43 }
 0x5b3   : > { %2469 = vadd.xlane.f32.xlu0 %v2468_v18 }
 0x5b6   : > { %2110 = vrot.lane.b32.xlu1 %v5875_v0, %s5327_s27 }
 0x5b7   : > { %2472 = vadd.xlane.f32.xlu0 %v2471_v50 }
 0x5bb   : > { %2484 = vadd.xlane.f32.xlu0 %v2483_v52 }
 0x5bf   : > { %2490 = vadd.xlane.f32.xlu0 %v2489_v55 }
 0x5da   : > { %2466 = vadd.xlane.f32.xlu1 %v2465_v6 }
 0x5de   : > { %2487 = vadd.xlane.f32.xlu1 %v2486_v2 }
 0x5f5   : > { %v2479_v15 = vpop.xlane.xlu0 %2478 }
 0x5f6   : > { %5170 = vrcp.f32 %v2479_v15 }
 0x5f9   : > { %v2482_v57 = vpop.xlane.xlu1 %2481 }
 0x5fd   : > { %v2476_v12 = vpop.xlane.xlu1 %2475 }
 0x5fe   : > { %5172 = vrcp.f32 %v2476_v12  ;;  %v5050_v12 = vld [vmem:[%s5470_s23 + $0x20] sm:$0xff]  }
 0x5ff   : > { %5174 = vrcp.f32 %v2482_v57  ;;  %v2120_v57 = vpack.c.bf16 %v5875_v0, %v5875_v0  ;;  %v5047_v0 = vld [vmem:[%s5470_s23 + $0x8] sm:$0xff]  }
 0x600   : > { %v5171_v23 = vpop.eup %5170 }
 0x601   : > { %v2517_v13 = vmul.f32 %v5171_v23, %v5955_v9  ;;  %v4996_v62 = vpop.permute.xlu1 %4995  ;;  %v5051_v23 = vld [vmem:[%s5470_s23 + $0x28] sm:$0xff]  }
 0x602   : > { %v4998_v20 = vunpack.i.h.bf16 %v4996_v62  ;;  %v4997_v21 = vunpack.i.l.bf16 %v4996_v62 }
 0x604   : > { %v2121_v27 = vpack.c.bf16 %v4998_v20, %v4997_v21 }
 0x607   : > { %v2500_v10 = vpop.xlane.xlu0 %2499 }
 0x608   : > { %v5173_v11 = vpop.eup %5172  ;;  %5176 = vrcp.f32 %v2500_v10  ;;  %v5052_v10 = vld [vmem:[%s5470_s23 + $0x30] sm:$0xff]  }
 0x609   : > { %v2516_v17 = vmul.f32 %v5173_v11, %v5963_v19  ;;  %v5175_v16 = vpop.eup %5174  ;;  %v5053_v11 = vld [vmem:[%s5470_s23 + $0x38] sm:$0xff]  }
 0x60a   : > { %v2518_v25 = vmul.f32 %v5175_v16, %v5959_v14 }
 0x60b   : > { %v2494_v63 = vpop.xlane.xlu0 %2493  ;;  %v2527_v46 = vpack.c.bf16 %v2517_v13, %v2516_v17 }
 0x60c   : > { %v2528_v9 = vpack.c.bf16 %v2518_v25, %v2518_v25  ;;  %5178 = vrcp.f32 %v2494_v63 }
 0x60d   : > { %4754 = vmatprep.mubr.msk.bf16.mxu1 %vm2392_vm4, %v2527_v46 }
 0x60f   : > { %v2099_v22 = vpop.permute.xlu0 %2098 }
 0x610   : > { %v2118_v26 = vpack.c.bf16 %v2099_v22, %v2099_v22 }
 0x612   : > { %v2598_v29 = vsel %vm2539_vm2, %v2118_v26, 0  ;;  %4847 = vmatprep.subr.msk.bf16.mxu1 %vm2539_vm2, %v2118_v26  ;;  %v5177_v35 = vpop.eup %5176 }
 0x613   : > { %4753 = vmatpush3.bf16.msra.mxu1 %v2598_v29  ;;  %v2524_v30 = vmul.f32 %v5177_v35, %v5967_v28 }
 0x614   : > { %4766 = vmatprep.subr.bf16.mxu1 %v2121_v27 }
 0x615   : > { %v2532_v47 = vpack.c.bf16 %v2524_v30, %v2524_v30 }
 0x616   : > { %4755 = vmatmul.mubr.msk.bf16.vlgmr.msra.gmra.mrb[24].mxu1 %vm2392_vm4, %v2528_v9  ;;  %v5179_v36 = vpop.eup %5178 }
 0x617   : > { %4767 = vmatpush3.bf16.msra.mxu1 %v2121_v27  ;;  %v2522_v42 = vmul.f32 %v5179_v36, %v5971_v32 }
 0x632   : > { %v2497_v19 = vpop.xlane.xlu1 %2496 }
 0x633   : > { %5180 = vrcp.f32 %v2497_v19 }
 0x636   : > { %v2111_v33 = vpop.permute.xlu1 %2110 }
 0x637   : > { %v2122_v34 = vpack.c.bf16 %v2111_v33, %v2111_v33 }
 0x639   : > { %v2712_v14 = vsel %vm2539_vm2, %v2122_v34, 0  ;;  %4849 = vmatprep.subr.msk.bf16.mxu1 %vm2539_vm2, %v2122_v34 }
 0x63a   : > { %4769 = vmatpush3.bf16.msra.mxu1 %v2712_v14 }
 0x63d   : > { %v5181_v39 = vpop.eup %5180 }
 0x63e   : > { %v2523_v44 = vmul.f32 %v5181_v39, %v5983_v41 }
 0x640   : > { %v2531_v43 = vpack.c.bf16 %v2523_v44, %v2522_v42  ;;  %v2470_v38 = vpop.xlane.xlu0 %2469 }
 0x642   : > { %4770 = vmatprep.mubr.msk.bf16.mxu1 %vm2392_vm4, %v2531_v43 }
 0x643   : > { %4771 = vmatmul.mubr.msk.bf16.vlgmr.msra.gmra.mrb[28].mxu1 %vm2392_vm4, %v2532_v47 }
 0x644   : > { %3224 = vmatprep.mubr.bf16.mxu1 %v5325_v5  ;;  %v2473_v40 = vpop.xlane.xlu0 %2472 }
 0x645   : > { %5182 = vrcp.f32 %v2473_v40 }
 0x646   : > { %5184 = vrcp.f32 %v2470_v38 }
 0x648   : > { %v2485_v8 = vpop.xlane.xlu0 %2484 }
 0x64c   : > { %v2491_v28 = vpop.xlane.xlu0 %2490 }
 0x64f   : > { %v5183_v41 = vpop.eup %5182 }
 0x650   : > { %v5185_v48 = vpop.eup %5184  ;;  %v2515_v50 = vmul.f32 %v5183_v41, %v5994_v51 }
 0x651   : > { %v2514_v55 = vmul.f32 %v5185_v48, %v5990_v49 }
 0x652   : > { %v2526_v3 = vpack.c.bf16 %v2515_v50, %v2515_v50 }
 0x667   : > { %v2467_v37 = vpop.xlane.xlu1 %2466 }
 0x668   : > { %5186 = vrcp.f32 %v2467_v37 }
 0x669   : > { %5188 = vrcp.f32 %v2485_v8 }
 0x66b   : > { %v2488_v32 = vpop.xlane.xlu1 %2487 }
 0x66c   : > { %5190 = vrcp.f32 %v2488_v32 }
 0x66d   : > { %5192 = vrcp.f32 %v2491_v28 }
 0x672   : > { %v5187_v18 = vpop.eup %5186 }
 0x673   : > { %v2513_v52 = vmul.f32 %v5187_v18, %v6012_v4  ;;  %v5189_v56 = vpop.eup %5188 }
 0x674   : > { %v2519_v2 = vmul.f32 %v5189_v56, %v6000_v53  ;;  %v2655_v53 = vsel %vm2539_vm2, %v2120_v57, 0 }
 0x675   : > { %v2525_v60 = vpack.c.bf16 %v2514_v55, %v2513_v52  ;;  %v4362_v55 = vld [vmem:[%s6519_s2] ss:$0 sm:$0xff] }
 0x676   : > { %v5191_v1 = vpop.eup %5190 }
 0x677   : > { %v5193_v6 = vpop.eup %5192  ;;  %4746 = vmatprep.mubr.msk.bf16.mxu0 %vm2392_vm4, %v2525_v60  ;;  %v2520_v15 = vmul.f32 %v5191_v1, %v6016_v7  ;;  %v5049_v7 = vld [vmem:[%s5470_s23 + $0x18] sm:$0xff]   ;;  %v5254_v60 = vld [vmem:[#allocation2] sm:$0xff] }
 0x678   : > { %4747 = vmatmul.mubr.msk.bf16.vlgmr.msra.gmra.mrb[16].mxu0 %vm2392_vm4, %v2526_v3  ;;  %v2521_v51 = vmul.f32 %v5193_v6, %v6004_v31  ;;  %v5048_v31 = vld [vmem:[%s5470_s23 + $0x10] sm:$0xff]  }
 0x679   : > { %4759 = vmatpush3.bf16.msra.mxu0 %v5872_v54  ;;  %v2529_v49 = vpack.c.bf16 %v2520_v15, %v2519_v2  ;;  %v5046_v54 = vld [vmem:[%s5470_s23] sm:$0xff]   ;;  %v5255_v15 = vld [vmem:[#allocation2 + $0x8] sm:$0xff]  ;;  %s6525_s23 = sld [smem:[#allocation17_spill]] (!%p4430_p6) }
 0x67a   : > { %4848 = vmatprep.subr.msk.bf16.mxu0 %vm2539_vm2, %v2120_v57  ;;  %v2530_v4 = vpack.c.bf16 %v2521_v51, %v2521_v51 }
 0x67b   : > { %4762 = vmatprep.mubr.msk.bf16.mxu0 %vm2392_vm4, %v2529_v49 }
 0x67d   : > { %4761 = vmatpush3.bf16.msra.mxu0 %v2655_v53  ;;  %v5256_v53 = vld [vmem:[#allocation2 + $0x10] sm:$0xff] }
 0x67e   : > { %4774 = vmatprep.subr.bf16.mxu0 %v5324_v24 }
 0x680   : > { %4763 = vmatmul.mubr.msk.bf16.vlgmr.msra.gmra.mrb[20].mxu0 %vm2392_vm4, %v2530_v4 }
 0x681   : > { %4790 = vmatprep.mubr.msk.bf16.mxu0 %vm5326_vm0, %v5324_v24  ;;  %4775 = vmatpush3.bf16.msra.mxu0 %v5046_v54 }
 0x682   : > { %4776 = vmatprep.subr.bf16.mxu0 %v5324_v24 }
 0x685   : > { %4777 = vmatpush3.bf16.msra.mxu0 %v5047_v0 }
 0x686   : > { %4778 = vmatprep.subr.bf16.mxu0 %v5324_v24 }
 0x689   : > { %4779 = vmatpush3.bf16.msra.mxu0 %v5048_v31 }
 0x68a   : > { %4780 = vmatprep.subr.bf16.mxu0 %v5324_v24 }
 0x68d   : > { %4781 = vmatpush3.bf16.msra.mxu0 %v5049_v7  ;;  %v5257_v7 = vld [vmem:[#allocation2 + $0x18] sm:$0xff] }
 0x68e   : > { %4782 = vmatprep.subr.bf16.mxu0 %v5324_v24 }
 0x691   : > { %4783 = vmatpush3.bf16.msra.mxu0 %v5050_v12 }
 0x692   : > { %4784 = vmatprep.subr.bf16.mxu0 %v5324_v24 }
 0x695   : > { %4785 = vmatpush3.bf16.msra.mxu0 %v5051_v23 }
 0x696   : > { %4786 = vmatprep.subr.bf16.mxu0 %v5324_v24 }
 0x699   : > { %4787 = vmatpush3.bf16.msra.mxu0 %v5052_v10 }
 0x69a   : > { %4788 = vmatprep.subr.bf16.mxu0 %v5324_v24 }
 0x69d   : > { %4789 = vmatpush3.bf16.msra.mxu0 %v5053_v11 }
 0x6e9   : > { %v4756_v17 = vpop.f32.mrb[24].mxu1 }
 0x6ea   : > { %v2634_v13 = vpop.f32.mrb[25].mxu1 }
 0x6eb   : > { %v4757_v62 = vpop.f32.mrb[26].mxu1 }
 0x6ec   : > { %v2637_v63 = vpop.f32.mrb[27].mxu1 }
 0x6ed   : > { %v4999_v46 = vpack.i.bf16 %v2637_v63, %v2634_v13 }
 0x6ef   : > { %5000 = vrot.lane.b32.xlu1 %v4999_v46, %s5327_s27 }
 0x716   : > { %v4772_v16 = vpop.f32.mrb[28].mxu1 }
 0x717   : > { %v2748_v20 = vpop.f32.mrb[29].mxu1 }
 0x718   : > { %v5004_v21 = vpack.i.bf16 %v2748_v20, %v4756_v17  ;;  %v4773_v22 = vpop.f32.mrb[30].mxu1  ;;  %v5258_v17 = vld [vmem:[#allocation2 + $0x20] sm:$0xff] }
 0x719   : > { %v2751_v25 = vpop.f32.mrb[31].mxu1 }
 0x71a   : > { %v5009_v26 = vpack.i.bf16 %v4772_v16, %v2751_v25  ;;  %5005 = vrot.lane.b32.xlu0 %v5004_v21, %s5327_s27  ;;  %v5259_v16 = vld [vmem:[#allocation2 + $0x28] sm:$0xff]  ;;  %v5054_v25 = vld [vmem:[%s5498_s5] ss:$16 sps:$4 sm:$0xff]  }
 0x71c   : > { %5010 = vrot.lane.b32.xlu1 %v5009_v26, %s5327_s27  ;;  %v5056_v26 = vld [vmem:[%s5498_s5 + $0x4] ss:$16 sps:$4 sm:$0xff]  }
 0x71d   : > { %3192 = vmatprep.subr.bf16.mxu1 %v5056_v26 }
 0x71e   : > { %3193 = vmatpush1.bf16.msra.mxu1 %v5054_v25 }
 0x74b   : > { %v4748_v27 = vpop.f32.mrb[16].mxu0 }
 0x74c   : > { %v2577_v29 = vpop.f32.mrb[17].mxu0 }
 0x74d   : > { %v4749_v9 = vpop.f32.mrb[18].mxu0 }
 0x74e   : > { %v2580_v19 = vpop.f32.mrb[19].mxu0  ;;  %v5062_v9 = vld [vmem:[%s5498_s5 + $0x24] ss:$16 sps:$4 sm:$0xff]  }
 0x74f   : > { %3194 = vmatprep.subr.bf16.mxu1 %v5062_v9 }
 0x753   : > { %v4764_v33 = vpop.f32.mrb[20].mxu0 }
 0x754   : > { %v2691_v34 = vpop.f32.mrb[21].mxu0 }
 0x755   : > { %v4765_v14 = vpop.f32.mrb[22].mxu0 }
 0x756   : > { %v2694_v35 = vpop.f32.mrb[23].mxu0 }
 0x761   : > { %v5001_v36 = vpop.permute.xlu1 %5000 }
 0x762   : > { %v5003_v39 = vunpack.i.h.bf16 %v5001_v36  ;;  %v5002_v30 = vunpack.i.l.bf16 %v5001_v36 }
 0x764   : > { %v2775_v42 = vsel %vm2127_vm1, %v2580_v19, %v5003_v39  ;;  %v2774_v44 = vsel %vm2127_vm1, %v2577_v29, %v5002_v30  ;;  %v5059_v29 = vld [vmem:[%s5498_s5 + $0xc] ss:$16 sps:$4 sm:$0xff]  }
 0x765   : > { %v2792_v43 = vpack.c.bf16 %v2775_v42, %v2774_v44  ;;  %v5065_v19 = vld [vmem:[%s5498_s5 + $0x2c] ss:$16 sps:$4 sm:$0xff]   ;;  %3255 = vmatprep.subr.bf16.mxu0 %v5059_v29 }
 0x767   : > { %4791 = vmatmul.mubr.bf16.vlgmr.msra.gmra.mrb[24].mxu0 %v2792_v43 }
 0x768   : > { %4794 = vmatprep.mubr.msk.bf16.mxu0 %vm5326_vm0, %v5324_v24 }
 0x78c   : > { %v5006_v47 = vpop.permute.xlu0 %5005 }
 0x78d   : > { %v5008_v38 = vunpack.i.h.bf16 %v5006_v47  ;;  %v5007_v40 = vunpack.i.l.bf16 %v5006_v47  ;;  %v5068_v47 = vld [vmem:[%s5498_s5 + $0x44] ss:$16 sps:$4 sm:$0xff]  }
 0x78e   : > { %v5011_v8 = vpop.permute.xlu1 %5010 }
 0x78f   : > { %v5013_v37 = vunpack.i.h.bf16 %v5011_v8  ;;  %v5012_v28 = vunpack.i.l.bf16 %v5011_v8  ;;  %v2776_v32 = vsel %vm2127_vm1, %v4748_v27, %v5007_v40  ;;  %v2789_v41 = vsel %vm2127_vm1, %v2691_v34, %v5008_v38  ;;  %v5057_v27 = vld [vmem:[%s5498_s5 + $0x8] ss:$16 sps:$4 sm:$0xff]   ;;  %v5071_v38 = vld [vmem:[%s5498_s5 + $0x4c] ss:$16 sps:$4 sm:$0xff]   ;;  %v5066_v40 = vld [vmem:[%s5498_s5 + $0x40] ss:$16 sps:$4 sm:$0xff]  }
 0x790   : > { %v2793_v48 = vpack.c.bf16 %v2789_v41, %v2776_v32  ;;  %3256 = vmatpush1.bf16.msra.mxu0 %v5057_v27  ;;  %v5063_v34 = vld [vmem:[%s5498_s5 + $0x28] ss:$16 sps:$4 sm:$0xff]   ;;  %v5072_v32 = vld [vmem:[%s5498_s5 + $0x60] ss:$16 sps:$4 sm:$0xff]  }
 0x791   : > { %v2790_v18 = vsel %vm2127_vm1, %v2694_v35, %v5012_v28  ;;  %v2791_v50 = vsel %vm2127_vm1, %v4764_v33, %v5013_v37  ;;  %v5060_v33 = vld [vmem:[%s5498_s5 + $0x20] ss:$16 sps:$4 sm:$0xff]   ;;  %3257 = vmatprep.subr.bf16.mxu0 %v5065_v19  ;;  %v5069_v8 = vld [vmem:[%s5498_s5 + $0x48] ss:$16 sps:$4 sm:$0xff]   ;;  %v5074_v37 = vld [vmem:[%s5498_s5 + $0x64] ss:$16 sps:$4 sm:$0xff]  }
 0x792   : > { %4795 = vmatmul.mubr.bf16.gmra.mrb[28].mxu0 %v2793_v48  ;;  %v2794_v52 = vpack.c.bf16 %v2791_v50, %v2790_v18  ;;  %3195 = vmatpush1.bf16.msra.mxu1 %v5060_v33  ;;  %v5077_v28 = vld [vmem:[%s5498_s5 + $0x6c] ss:$16 sps:$4 sm:$0xff]   ;;  %v5075_v41 = vld [vmem:[%s5498_s5 + $0x68] ss:$16 sps:$4 sm:$0xff]   ;;  %v5080_v48 = vld [vmem:[%s5498_s5 + $0x84] ss:$16 sps:$4 sm:$0xff]  }
 0x793   : > { %4798 = vmatprep.mubr.msk.bf16.mxu0 %vm5326_vm0, %v5324_v24  ;;  %3196 = vmatprep.subr.bf16.mxu1 %v5068_v47  ;;  %v5083_v18 = vld [vmem:[%s5498_s5 + $0x8c] ss:$16 sps:$4 sm:$0xff]   ;;  %v5078_v50 = vld [vmem:[%s5498_s5 + $0x80] ss:$16 sps:$4 sm:$0xff]  }
 0x794   : > { %3258 = vmatpush1.bf16.msra.mxu0 %v5063_v34 }
 0x795   : > { %3259 = vmatprep.subr.bf16.mxu0 %v5071_v38  ;;  %v4364_v38 = vld [vmem:[%s6521_s24] ss:$0 sm:$0xff] }
 0x796   : > { %3197 = vmatpush1.bf16.msra.mxu1 %v5066_v40 }
 0x797   : > { %3198 = vmatprep.subr.bf16.mxu1 %v5074_v37 }
 0x798   : > { %3260 = vmatpush1.bf16.msra.mxu0 %v5069_v8 }
 0x799   : > { %3261 = vmatprep.subr.bf16.mxu0 %v5077_v28 }
 0x79a   : > { %4799 = vmatmul.mubr.bf16.gmra.mrb[32].mxu0 %v2794_v52  ;;  %3199 = vmatpush1.bf16.msra.mxu1 %v5072_v32  ;;  %v5081_v52 = vld [vmem:[%s5498_s5 + $0x88] ss:$16 sps:$4 sm:$0xff]  }
 0x79b   : > { %3287 = vmatprep.mubr.bf16.mxu0 %v5325_v5  ;;  %3200 = vmatprep.subr.bf16.mxu1 %v5080_v48 }
 0x79c   : > { %3262 = vmatpush1.bf16.msra.mxu0 %v5075_v41 }
 0x79d   : > { %3263 = vmatprep.subr.bf16.mxu0 %v5083_v18 }
 0x79e   : > { %3201 = vmatpush1.bf16.msra.mxu1 %v5078_v50 }
 0x7a0   : > { %3264 = vmatpush1.bf16.msra.mxu0 %v5081_v52 }
 0x83a   : > { %v2877_v56 = vpop.f32.mrb[24].mxu0 }
 0x83b   : > { %v2900_v1 = vadd.f32 %v5254_v60, %v2877_v56  ;;  %v4792_v3 = vpop.f32.mrb[25].mxu0  ;;  %v5089_v56 = vld [vmem:[%s5498_s5 + $0xac] ss:$16 sps:$4 sm:$0xff]   ;;  %v5084_v60 = vld [vmem:[%s5498_s5 + $0xa0] ss:$16 sps:$4 sm:$0xff]  }
 0x83c   : > { %v2880_v6 = vpop.f32.mrb[26].mxu0  ;;  %3265 = vmatprep.subr.bf16.mxu0 %v5089_v56  ;;  %v5092_v3 = vld [vmem:[%s5498_s5 + $0xc4] ss:$16 sps:$4 sm:$0xff]  }
 0x83d   : > { %v6087_v2 = vadd.f32 %v4362_v55, %v2900_v1  ;;  %v2901_v57 = vadd.f32 %v5255_v15, %v2880_v6  ;;  %v4793_v49 = vpop.f32.mrb[27].mxu0  ;;  %v5087_v1 = vld [vmem:[%s5498_s5 + $0xa8] ss:$16 sps:$4 sm:$0xff]   ;;  %v5095_v6 = vld [vmem:[%s5498_s5 + $0xcc] ss:$16 sps:$4 sm:$0xff]  }
 0x83e   : > { %3266 = vmatpush1.bf16.msra.mxu0 %v5087_v1  ;;  %v5090_v15 = vld [vmem:[%s5498_s5 + $0xc0] ss:$16 sps:$4 sm:$0xff]   ;;  %v5098_v49 = vld [vmem:[%s5498_s5 + $0xe4] ss:$16 sps:$4 sm:$0xff]  }
 0x83f   : > { %v6089_v51 = vadd.f32 %v4362_v55, %v2901_v57  ;;  %2918 = vadd.xlane.f32.xlu1 %v6087_v2  ;;  %v5093_v57 = vld [vmem:[%s5498_s5 + $0xc8] ss:$16 sps:$4 sm:$0xff]   ;;  %3267 = vmatprep.subr.bf16.mxu0 %v5095_v6 }
 0x841   : > { %2920 = vadd.xlane.f32.xlu0 %v6089_v51 }
 0x842   : > { %3268 = vmatpush1.bf16.msra.mxu0 %v5093_v57 }
 0x865   : > { %v2885_v24 = vpop.f32.mrb[28].mxu0 }
 0x866   : > { %v2902_v4 = vadd.f32 %v5256_v53, %v2885_v24  ;;  %v4796_v54 = vpop.f32.mrb[29].mxu0  ;;  %v5101_v24 = vld [vmem:[%s5498_s5 + $0xec] ss:$16 sps:$4 sm:$0xff]   ;;  %v5096_v53 = vld [vmem:[%s5498_s5 + $0xe0] ss:$16 sps:$4 sm:$0xff]  }
 0x867   : > { %v2888_v0 = vpop.f32.mrb[30].mxu0  ;;  %3269 = vmatprep.subr.bf16.mxu0 %v5101_v24 }
 0x868   : > { %v6093_v31 = vadd.f32 %v4362_v55, %v2902_v4  ;;  %v2903_v12 = vadd.f32 %v5257_v7, %v2888_v0  ;;  %v4797_v23 = vpop.f32.mrb[31].mxu0  ;;  %v5099_v4 = vld [vmem:[%s5498_s5 + $0xe8] ss:$16 sps:$4 sm:$0xff]  }
 0x869   : > { %3270 = vmatpush1.bf16.msra.mxu0 %v5099_v4 }
 0x86a   : > { %v6095_v10 = vadd.f32 %v4362_v55, %v2903_v12  ;;  %2922 = vadd.xlane.f32.xlu0 %v6093_v31 }
 0x86c   : > { %2924 = vadd.xlane.f32.xlu1 %v6095_v10 }
 0x86d   : > { %v2893_v11 = vpop.f32.mrb[32].mxu0 }
 0x86e   : > { %v2904_v13 = vadd.f32 %v5258_v17, %v2893_v11  ;;  %v4800_v62 = vpop.f32.mrb[33].mxu0 }
 0x86f   : > { %v2896_v63 = vpop.f32.mrb[34].mxu0 }
 0x870   : > { %v6099_v46 = vadd.f32 %v4362_v55, %v2904_v13  ;;  %v2905_v20 = vadd.f32 %v5259_v16, %v2896_v63  ;;  %v4801_v21 = vpop.f32.mrb[35].mxu0 }
 0x872   : > { %v6101_v22 = vadd.f32 %v4362_v55, %v2905_v20  ;;  %2926 = vadd.xlane.f32.xlu0 %v6099_v46  ;;  %v5086_v55 = vld [vmem:[%s5498_s5 + $0xa4] ss:$16 sps:$4 sm:$0xff]  }
 0x873   : > { %3202 = vmatprep.subr.bf16.mxu1 %v5086_v55 }
 0x874   : > { %2928 = vadd.xlane.f32.xlu1 %v6101_v22  ;;  %3203 = vmatpush1.bf16.msra.mxu1 %v5084_v60 }
 0x875   : > { %3204 = vmatprep.subr.bf16.mxu1 %v5092_v3 }
 0x878   : > { %3205 = vmatpush1.bf16.msra.mxu1 %v5090_v15 }
 0x879   : > { %3206 = vmatprep.subr.bf16.mxu1 %v5098_v49 }
 0x87c   : > { %3207 = vmatpush1.bf16.msra.mxu1 %v5096_v53 }
 0x8cc   : > { %v2919_v14 = vpop.xlane.xlu1 %2918 }
 0x8cd   : > { %v2930_v35 = vmul.f32 0.0078125, %v2919_v14 }
 0x8ce   : > { %v2921_v36 = vpop.xlane.xlu0 %2920 }
 0x8cf   : > { %v6114_v39 = vsub.f32 %v6087_v2, %v2930_v35  ;;  %v2931_v30 = vmul.f32 0.0078125, %v2921_v36  ;;  %v4363_v36 = vld [vmem:[%s6520_s28] ss:$0 sm:$0xff] }
 0x8d1   : > { %v6117_v42 = vsub.f32 %v6089_v51, %v2931_v30  ;;  %v2942_v44 = vmul.f32 %v6114_v39, %v6114_v39 }
 0x8d3   : > { %2948 = vadd.xlane.f32.xlu0 %v2942_v44  ;;  %v2943_v43 = vmul.f32 %v6117_v42, %v6117_v42 }
 0x8d5   : > { %2950 = vadd.xlane.f32.xlu1 %v2943_v43 }
 0x8f7   : > { %v2923_v54 = vpop.xlane.xlu0 %2922 }
 0x8f8   : > { %v2932_v0 = vmul.f32 0.0078125, %v2923_v54 }
 0x8f9   : > { %v2925_v7 = vpop.xlane.xlu1 %2924 }
 0x8fa   : > { %v2938_v12 = vsub.f32 %v6093_v31, %v2932_v0  ;;  %v2933_v23 = vmul.f32 0.0078125, %v2925_v7 }
 0x8fc   : > { %v2939_v11 = vsub.f32 %v6095_v10, %v2933_v23  ;;  %v2944_v17 = vmul.f32 %v2938_v12, %v2938_v12 }
 0x8fe   : > { %2952 = vadd.xlane.f32.xlu0 %v2944_v17  ;;  %v2945_v13 = vmul.f32 %v2939_v11, %v2939_v11 }
 0x8ff   : > { %v2927_v62 = vpop.xlane.xlu0 %2926 }
 0x900   : > { %v2934_v63 = vmul.f32 0.0078125, %v2927_v62  ;;  %2954 = vadd.xlane.f32.xlu1 %v2945_v13 }
 0x901   : > { %v2929_v16 = vpop.xlane.xlu1 %2928 }
 0x902   : > { %v2940_v20 = vsub.f32 %v6099_v46, %v2934_v63  ;;  %v2935_v21 = vmul.f32 0.0078125, %v2929_v16  ;;  %v5102_v16 = vld [vmem:[%s5509_s15 + $0x40] sm:$0xff]  }
 0x903   : > { %4605 = vmatprep.subr.bf16.mxu1 %v5102_v16 }
 0x904   : > { %v2941_v25 = vsub.f32 %v6101_v22, %v2935_v21  ;;  %v2946_v26 = vmul.f32 %v2940_v20, %v2940_v20  ;;  %v5104_v21 = vld [vmem:[%s5509_s15] sm:$0xff]  }
 0x906   : > { %2956 = vadd.xlane.f32.xlu0 %v2946_v26  ;;  %v2947_v27 = vmul.f32 %v2941_v25, %v2941_v25  ;;  %v5107_v26 = vld [vmem:[%s5509_s15 + $0xc8] sm:$0xff]  }
 0x908   : > { %2958 = vadd.xlane.f32.xlu1 %v2947_v27  ;;  %v5108_v27 = vld [vmem:[%s5509_s15 + $0x8] sm:$0xff]  }
 0x960   : > { %v2949_v29 = vpop.xlane.xlu0 %2948 }
 0x961   : > { %v2960_v9 = vmul.f32 0.0078125, %v2949_v29  ;;  %v5109_v29 = vld [vmem:[%s5509_s15 + $0x88] sm:$0xff]  }
 0x962   : > { %v2951_v19 = vpop.xlane.xlu1 %2950 }
 0x963   : > { %v2966_v33 = vadd.f32 1e-06, %v2960_v9  ;;  %v2961_v34 = vmul.f32 0.0078125, %v2951_v19  ;;  %v5110_v9 = vld [vmem:[%s5509_s15 + $0x50] sm:$0xff]  }
 0x964   : > { %v5111_v19 = vld [vmem:[%s5509_s15 + $0xd0] sm:$0xff]  }
 0x965   : > { %5194 = vrsqrt.f32 %v2966_v33  ;;  %v2967_v14 = vadd.f32 1e-06, %v2961_v34  ;;  %v5112_v33 = vld [vmem:[%s5509_s15 + $0x10] sm:$0xff]  }
 0x966   : > { %v5113_v34 = vld [vmem:[%s5509_s15 + $0x90] sm:$0xff]  }
 0x967   : > { %5196 = vrsqrt.f32 %v2967_v14  ;;  %v5114_v14 = vld [vmem:[%s5509_s15 + $0x58] sm:$0xff]  }
 0x96f   : > { %v5195_v35 = vpop.eup %5194 }
 0x970   : > { %v2978_v30 = vmul.f32 %v5195_v35, %v6114_v39  ;;  %v5115_v35 = vld [vmem:[%s5509_s15 + $0xd8] sm:$0xff]  }
 0x971   : > { %v5197_v44 = vpop.eup %5196 }
 0x972   : > { %v2979_v43 = vmul.f32 %v5197_v44, %v6117_v42  ;;  %v2990_v47 = vmul.f32 %v4363_v36, %v2978_v30  ;;  %v5117_v30 = vld [vmem:[%s5509_s15 + $0x98] sm:$0xff]   ;;  %v5118_v44 = vld [vmem:[%s5509_s15 + $0x60] sm:$0xff]  }
 0x974   : > { %v2991_v40 = vmul.f32 %v4363_v36, %v2979_v43  ;;  %v3002_v8 = vadd.f32 %v4364_v38, %v2990_v47  ;;  %v5119_v43 = vld [vmem:[%s5509_s15 + $0xe0] sm:$0xff]  }
 0x975   : > { %v5120_v47 = vld [vmem:[%s5509_s15 + $0x20] sm:$0xff]  }
 0x976   : > { %v3003_v37 = vadd.f32 %v4364_v38, %v2991_v40  ;;  %v5122_v40 = vld [vmem:[%s5509_s15 + $0x68] sm:$0xff]  }
 0x978   : > { %v3008_v28 = vpack.c.bf16 %v3003_v37, %v3002_v8  ;;  %v5123_v8 = vld [vmem:[%s5509_s15 + $0xe8] sm:$0xff]  }
 0x979   : > { %v5124_v37 = vld [vmem:[%s5509_s15 + $0x28] sm:$0xff]  }
 0x97a   : > { %3225 = vmatmul.mubr.bf16.vlgmr.msra.gmra.mrb[32].mxu1 %v3008_v28  ;;  %3288 = vmatmul.mubr.bf16.vlgmr.msra.gmra.mrb[36].mxu0 %v3008_v28  ;;  %v5125_v28 = vld [vmem:[%s5509_s15 + $0xa8] sm:$0xff]  }
 0x97b   : > { %3234 = vmatprep.mubr.bf16.mxu1 %v5325_v5  ;;  %3297 = vmatprep.mubr.bf16.mxu0 %v5325_v5 }
 0x97c   : > { %4606 = vmatpush3.bf16.msra.mxu1 %v5104_v21 }
 0x98b   : > { %v2953_v39 = vpop.xlane.xlu0 %2952 }
 0x98c   : > { %v2962_v32 = vmul.f32 0.0078125, %v2953_v39  ;;  %v5126_v39 = vld [vmem:[%s5509_s15 + $0x70] sm:$0xff]  }
 0x98d   : > { %v2955_v41 = vpop.xlane.xlu1 %2954 }
 0x98e   : > { %v2968_v42 = vadd.f32 1e-06, %v2962_v32  ;;  %v2963_v48 = vmul.f32 0.0078125, %v2955_v41  ;;  %v5127_v32 = vld [vmem:[%s5509_s15 + $0xf0] sm:$0xff]  }
 0x98f   : > { %v5128_v41 = vld [vmem:[%s5509_s15 + $0x30] sm:$0xff]  }
 0x990   : > { %5198 = vrsqrt.f32 %v2968_v42  ;;  %v2969_v18 = vadd.f32 1e-06, %v2963_v48  ;;  %v5129_v42 = vld [vmem:[%s5509_s15 + $0xb0] sm:$0xff]   ;;  %v5130_v48 = vld [vmem:[%s5509_s15 + $0x78] sm:$0xff]  }
 0x992   : > { %5200 = vrsqrt.f32 %v2969_v18  ;;  %v5131_v18 = vld [vmem:[%s5509_s15 + $0xf8] sm:$0xff]  }
 0x993   : > { %v2957_v50 = vpop.xlane.xlu0 %2956 }
 0x994   : > { %v2964_v52 = vmul.f32 0.0078125, %v2957_v50  ;;  %v5132_v50 = vld [vmem:[%s5509_s15 + $0x38] sm:$0xff]  }
 0x995   : > { %v2959_v55 = vpop.xlane.xlu1 %2958 }
 0x996   : > { %v2970_v56 = vadd.f32 1e-06, %v2964_v52  ;;  %v2965_v60 = vmul.f32 0.0078125, %v2959_v55  ;;  %v5133_v52 = vld [vmem:[%s5509_s15 + $0xb8] sm:$0xff]   ;;  %v1597_v55 = vld [vmem:[%s5504_s21] sm:$0xf] }
 0x998   : > { %5202 = vrsqrt.f32 %v2970_v56  ;;  %v2971_v1 = vadd.f32 1e-06, %v2965_v60  ;;  %v3026_v56 = vsub.s32 3, %v5814_v58  ;;  %v6203_v60 = vrot.slane %v1597_v55, %v1766_v45 }
 0x99a   : > { %v5199_v3 = vpop.eup %5198  ;;  %5204 = vrsqrt.f32 %v2971_v1  ;;  %v6207_v1 = vrot.slane %v1597_v55, %v1774_v59 }
 0x99b   : > { %v2980_v6 = vmul.f32 %v5199_v3, %v2938_v12  ;;  %v6211_v3 = vrot.slane %v1597_v55, %v1770_v61 }
 0x99c   : > { %v5201_v15 = vpop.eup %5200 }
 0x99d   : > { %v2981_v57 = vmul.f32 %v5201_v15, %v2939_v11  ;;  %v2992_v49 = vmul.f32 %v4363_v36, %v2980_v6  ;;  %v6213_v6 = vrot.slane %v1597_v55, %v3026_v56 }
 0x99f   : > { %v2993_v24 = vmul.f32 %v4363_v36, %v2981_v57  ;;  %v3004_v53 = vadd.f32 %v4364_v38, %v2992_v49 }
 0x9a1   : > { %v3005_v4 = vadd.f32 %v4364_v38, %v2993_v24 }
 0x9a2   : > { %v5203_v54 = vpop.eup %5202 }
 0x9a3   : > { %v3009_v0 = vpack.c.bf16 %v3005_v4, %v3004_v53  ;;  %v2982_v7 = vmul.f32 %v5203_v54, %v2940_v20  ;;  %v5103_v20 = vld [vmem:[%s5509_s15 + $0xc0] sm:$0xff]  }
 0x9a4   : > { %v5205_v23 = vpop.eup %5204  ;;  %4639 = vmatprep.subr.bf16.mxu0 %v5103_v20 }
 0x9a5   : > { %3235 = vmatmul.mubr.bf16.gmra.mrb[36].mxu1 %v3009_v0  ;;  %3298 = vmatmul.mubr.bf16.gmra.mrb[40].mxu0 %v3009_v0  ;;  %v2983_v17 = vmul.f32 %v5205_v23, %v2941_v25  ;;  %v2994_v13 = vmul.f32 %v4363_v36, %v2982_v7  ;;  %v5105_v25 = vld [vmem:[%s5509_s15 + $0x80] sm:$0xff]  }
 0x9a6   : > { %3244 = vmatprep.mubr.bf16.mxu1 %v5325_v5  ;;  %3307 = vmatprep.mubr.bf16.mxu0 %v5325_v5  ;;  %v5106_v5 = vld [vmem:[%s5509_s15 + $0x48] sm:$0xff]  }
 0x9a7   : > { %v2995_v12 = vmul.f32 %v4363_v36, %v2983_v17  ;;  %v3006_v11 = vadd.f32 %v4364_v38, %v2994_v13  ;;  %4640 = vmatpush3.bf16.msra.mxu0 %v5105_v25  ;;  %4607 = vmatprep.subr.bf16.mxu1 %v5106_v5  ;;  %v5116_v36 = vld [vmem:[%s5509_s15 + $0x18] sm:$0xff]  }
 0x9a8   : > { %4641 = vmatprep.subr.bf16.mxu0 %v5107_v26  ;;  %4608 = vmatpush3.bf16.msra.mxu1 %v5108_v27 }
 0x9a9   : > { %v3007_v62 = vadd.f32 %v4364_v38, %v2995_v12  ;;  %4609 = vmatprep.subr.bf16.mxu1 %v5110_v9  ;;  %v5121_v38 = vld [vmem:[%s5509_s15 + $0xa0] sm:$0xff]  }
 0x9ab   : > { %v3010_v63 = vpack.c.bf16 %v3007_v62, %v3006_v11  ;;  %4642 = vmatpush3.bf16.msra.mxu0 %v5109_v29 }
 0x9ac   : > { %4643 = vmatprep.subr.bf16.mxu0 %v5111_v19  ;;  %4610 = vmatpush3.bf16.msra.mxu1 %v5112_v33 }
 0x9ad   : > { %3245 = vmatmul.mubr.bf16.gmra.mrb[40].mxu1 %v3010_v63  ;;  %3308 = vmatmul.mubr.bf16.gmra.mrb[44].mxu0 %v3010_v63 }
 0x9ae   : > { %4611 = vmatprep.subr.bf16.mxu1 %v5114_v14 }
 0x9af   : > { %4644 = vmatpush3.bf16.msra.mxu0 %v5113_v34 }
 0x9b0   : > { %4645 = vmatprep.subr.bf16.mxu0 %v5115_v35  ;;  %4612 = vmatpush3.bf16.msra.mxu1 %v5116_v36 }
 0x9b1   : > { %4613 = vmatprep.subr.bf16.mxu1 %v5118_v44 }
 0x9b3   : > { %4646 = vmatpush3.bf16.msra.mxu0 %v5117_v30 }
 0x9b4   : > { %4647 = vmatprep.subr.bf16.mxu0 %v5119_v43  ;;  %4614 = vmatpush3.bf16.msra.mxu1 %v5120_v47 }
 0x9b5   : > { %4615 = vmatprep.subr.bf16.mxu1 %v5122_v40 }
 0x9b7   : > { %4648 = vmatpush3.bf16.msra.mxu0 %v5121_v38 }
 0x9b8   : > { %4649 = vmatprep.subr.bf16.mxu0 %v5123_v8  ;;  %4616 = vmatpush3.bf16.msra.mxu1 %v5124_v37 }
 0x9b9   : > { %4617 = vmatprep.subr.bf16.mxu1 %v5126_v39 }
 0x9bb   : > { %4650 = vmatpush3.bf16.msra.mxu0 %v5125_v28 }
 0x9bc   : > { %4651 = vmatprep.subr.bf16.mxu0 %v5127_v32  ;;  %4618 = vmatpush3.bf16.msra.mxu1 %v5128_v41 }
 0x9bd   : > { %4619 = vmatprep.subr.bf16.mxu1 %v5130_v48 }
 0x9bf   : > { %4652 = vmatpush3.bf16.msra.mxu0 %v5129_v42 }
 0x9c0   : > { %4653 = vmatprep.subr.bf16.mxu0 %v5131_v18  ;;  %4620 = vmatpush3.bf16.msra.mxu1 %v5132_v50 }
 0x9c3   : > { %4654 = vmatpush3.bf16.msra.mxu0 %v5133_v52 }
 0xa4d   : > { %v3226_v15 = vpop.f32.mrb[32].mxu1  ;;  %v3289_v57 = vpop.f32.mrb[36].mxu0 }
 0xa4e   : > { %v6216_v49 = vadd.f32 %v3226_v15, %v6203_v60  ;;  %v6219_v24 = vadd.f32 %v3289_v57, %v6207_v1  ;;  %v3228_v45 = vpop.f32.mrb[33].mxu1  ;;  %v3291_v53 = vpop.f32.mrb[37].mxu0 }
 0xa4f   : > { %v6222_v4 = vadd.f32 %v3228_v45, %v6211_v3  ;;  %v6225_v59 = vadd.f32 %v3291_v53, %v6213_v6  ;;  %v3230_v58 = vpop.f32.mrb[34].mxu1  ;;  %v3293_v61 = vpop.f32.mrb[38].mxu0 }
 0xa50   : > { %v3342_v54 = vmul.f32 0.044715, %v6216_v49  ;;  %v3344_v0 = vmul.f32 0.044715, %v6219_v24  ;;  %v3231_v17 = vadd.f32 %v3230_v58, %v6203_v60  ;;  %v3294_v13 = vadd.f32 %v3293_v61, %v6207_v1  ;;  %v3232_v12 = vpop.f32.mrb[35].mxu1  ;;  %v3295_v11 = vpop.f32.mrb[39].mxu0 }
 0xa51   : > { %v3343_v7 = vmul.f32 0.044715, %v6222_v4  ;;  %v3345_v23 = vmul.f32 0.044715, %v6225_v59  ;;  %v3233_v16 = vadd.f32 %v3232_v12, %v6211_v3  ;;  %v6237_v20 = vadd.f32 %v3295_v11, %v6213_v6 }
 0xa52   : > { %v3366_v62 = vmul.f32 %v3342_v54, %v6216_v49  ;;  %v3368_v63 = vmul.f32 %v3344_v0, %v6219_v24  ;;  %v3346_v5 = vmul.f32 0.044715, %v3231_v17  ;;  %v3348_v29 = vmul.f32 0.044715, %v3294_v13 }
 0xa53   : > { %v3367_v21 = vmul.f32 %v3343_v7, %v6222_v4  ;;  %v3369_v25 = vmul.f32 %v3345_v23, %v6225_v59  ;;  %v3347_v33 = vmul.f32 0.044715, %v3233_v16  ;;  %v3349_v36 = vmul.f32 0.044715, %v6237_v20 }
 0xa54   : > { %v3390_v26 = vmul.f32 %v3366_v62, %v6216_v49  ;;  %v3392_v27 = vmul.f32 %v3368_v63, %v6219_v24  ;;  %v3370_v19 = vmul.f32 %v3346_v5, %v3231_v17  ;;  %v3372_v35 = vmul.f32 %v3348_v29, %v3294_v13 }
 0xa55   : > { %v3391_v9 = vmul.f32 %v3367_v21, %v6222_v4  ;;  %v3393_v30 = vmul.f32 %v3369_v25, %v6225_v59  ;;  %v3371_v43 = vmul.f32 %v3347_v33, %v3233_v16  ;;  %v3373_v8 = vmul.f32 %v3349_v36, %v6237_v20 }
 0xa56   : > { %v3414_v34 = vadd.f32 %v3390_v26, %v6216_v49  ;;  %v3416_v14 = vadd.f32 %v3392_v27, %v6219_v24  ;;  %v3394_v44 = vmul.f32 %v3370_v19, %v3231_v17  ;;  %v3396_v40 = vmul.f32 %v3372_v35, %v3294_v13 }
 0xa57   : > { %v3395_v28 = vmul.f32 %v3371_v43, %v3233_v16  ;;  %v3415_v39 = vadd.f32 %v3391_v9, %v6222_v4  ;;  %v3397_v41 = vmul.f32 %v3373_v8, %v6237_v20  ;;  %v3417_v52 = vadd.f32 %v3393_v30, %v6225_v59 }
 0xa58   : > { %v3438_v47 = vmul.f32 0.7978846, %v3414_v34  ;;  %v3440_v38 = vmul.f32 0.7978846, %v3416_v14  ;;  %v3418_v37 = vadd.f32 %v3394_v44, %v3231_v17  ;;  %v3420_v32 = vadd.f32 %v3396_v40, %v3294_v13 }
 0xa59   : > { %v3419_v48 = vadd.f32 %v3395_v28, %v3233_v16  ;;  %v3439_v18 = vmul.f32 0.7978846, %v3415_v39  ;;  %v3421_v55 = vadd.f32 %v3397_v41, %v6237_v20  ;;  %v3441_v15 = vmul.f32 0.7978846, %v3417_v52 }
 0xa5a   : > { %5206 = vtanh.f32 %v3438_v47  ;;  %v3442_v42 = vmul.f32 0.7978846, %v3418_v37  ;;  %v3444_v50 = vmul.f32 0.7978846, %v3420_v32  ;;  %v3318_v7 = vmul.f32 0.5, %v6216_v49 }
 0xa5b   : > { %5208 = vtanh.f32 %v3440_v38  ;;  %v3443_v56 = vmul.f32 0.7978846, %v3419_v48  ;;  %v3445_v57 = vmul.f32 0.7978846, %v3421_v55  ;;  %v3322_v23 = vmul.f32 0.5, %v3231_v17 }
 0xa5c   : > { %5210 = vtanh.f32 %v3442_v42  ;;  %v3320_v62 = vmul.f32 0.5, %v6219_v24  ;;  %v3324_v63 = vmul.f32 0.5, %v3294_v13  ;;  %v3319_v5 = vmul.f32 0.5, %v6222_v4 }
 0xa5d   : > { %5212 = vtanh.f32 %v3444_v50  ;;  %v3323_v19 = vmul.f32 0.5, %v3233_v16  ;;  %v3321_v49 = vmul.f32 0.5, %v6225_v59  ;;  %v3325_v17 = vmul.f32 0.5, %v6237_v20 }
 0xa5e   : > { %5214 = vtanh.f32 %v3439_v18 }
 0xa5f   : > { %5216 = vtanh.f32 %v3443_v56 }
 0xa60   : > { %5218 = vtanh.f32 %v3441_v15 }
 0xa61   : > { %5220 = vtanh.f32 %v3445_v57 }
 0xa64   : > { %v5207_v45 = vpop.eup %5206 }
 0xa65   : > { %v5209_v53 = vpop.eup %5208  ;;  %v3486_v58 = vadd.f32 1.0, %v5207_v45 }
 0xa66   : > { %v5211_v61 = vpop.eup %5210  ;;  %v3488_v54 = vadd.f32 1.0, %v5209_v53 }
 0xa67   : > { %v5213_v0 = vpop.eup %5212  ;;  %v3490_v12 = vadd.f32 1.0, %v5211_v61  ;;  %v3510_v27 = vmul.f32 %v3486_v58, %v3318_v7 }
 0xa68   : > { %v5215_v11 = vpop.eup %5214  ;;  %v3492_v21 = vadd.f32 1.0, %v5213_v0  ;;  %v3512_v34 = vmul.f32 %v3488_v54, %v3320_v62 }
 0xa69   : > { %v5217_v25 = vpop.eup %5216  ;;  %v3487_v26 = vadd.f32 1.0, %v5215_v11  ;;  %v3514_v29 = vmul.f32 %v3490_v12, %v3322_v23 }
 0xa6a   : > { %v5219_v9 = vpop.eup %5218  ;;  %v3491_v33 = vadd.f32 1.0, %v5217_v25  ;;  %v3516_v14 = vmul.f32 %v3492_v21, %v3324_v63 }
 0xa6b   : > { %v5221_v35 = vpop.eup %5220  ;;  %v3489_v36 = vadd.f32 1.0, %v5219_v9  ;;  %v3534_v24 = vpack.c.bf16 %v3514_v29, %v3510_v27  ;;  %v3511_v13 = vmul.f32 %v3487_v26, %v3319_v5 }
 0xa6c   : > { %v3515_v30 = vmul.f32 %v3491_v33, %v3323_v19  ;;  %v3493_v44 = vadd.f32 1.0, %v5221_v35  ;;  %v3536_v43 = vpack.c.bf16 %v3516_v14, %v3512_v34 }
 0xa6d   : > { %v3513_v47 = vmul.f32 %v3489_v36, %v3321_v49 }
 0xa6e   : > { %v3535_v4 = vpack.c.bf16 %v3515_v30, %v3511_v13  ;;  %v3517_v38 = vmul.f32 %v3493_v44, %v3325_v17 }
 0xa70   : > { %3770 = vmatprep.mubr.bf16.mxu1 %v3535_v4  ;;  %v3537_v40 = vpack.c.bf16 %v3517_v38, %v3513_v47 }
 0xa71   : > { %3771 = vmatmul.mubr.bf16.vlgmr.msra.gmra.mrb[44].mxu1 %v3534_v24 }
 0xa72   : > { %3827 = vmatprep.mubr.bf16.mxu0 %v3537_v40 }
 0xa73   : > { %3828 = vmatmul.mubr.bf16.vlgmr.msra.gmra.mrb[48].mxu0 %v3536_v43 }
 0xa78   : > { %v3236_v16 = vpop.f32.mrb[36].mxu1  ;;  %v3299_v8 = vpop.f32.mrb[40].mxu0 }
 0xa79   : > { %v6259_v59 = vadd.f32 %v3236_v16, %v6203_v60  ;;  %v3238_v20 = vpop.f32.mrb[37].mxu1  ;;  %v3301_v37 = vpop.f32.mrb[41].mxu0  ;;  %v6262_v28 = vadd.f32 %v3299_v8, %v6207_v1 }
 0xa7a   : > { %v6265_v39 = vadd.f32 %v3238_v20, %v6211_v3  ;;  %v3240_v32 = vpop.f32.mrb[38].mxu1  ;;  %v3303_v41 = vpop.f32.mrb[42].mxu0  ;;  %v6268_v42 = vadd.f32 %v3301_v37, %v6213_v6 }
 0xa7b   : > { %v3242_v48 = vpop.f32.mrb[39].mxu1  ;;  %v3305_v18 = vpop.f32.mrb[43].mxu0  ;;  %v3350_v50 = vmul.f32 0.044715, %v6259_v59  ;;  %v6272_v52 = vadd.f32 %v3240_v32, %v6203_v60  ;;  %v6282_v57 = vadd.f32 %v3303_v41, %v6207_v1  ;;  %v3352_v45 = vmul.f32 0.044715, %v6262_v28 }
 0xa7c   : > { %v6275_v55 = vadd.f32 %v3242_v48, %v6211_v3  ;;  %v6278_v56 = vadd.f32 %v3305_v18, %v6213_v6  ;;  %v3351_v15 = vmul.f32 0.044715, %v6265_v39  ;;  %v3353_v58 = vmul.f32 0.044715, %v6268_v42 }
 0xa7d   : > { %v3374_v54 = vmul.f32 %v3350_v50, %v6259_v59  ;;  %v3354_v0 = vmul.f32 0.044715, %v6272_v52  ;;  %v3356_v11 = vmul.f32 0.044715, %v6282_v57  ;;  %v3376_v5 = vmul.f32 %v3352_v45, %v6262_v28 }
 0xa7e   : > { %v3355_v53 = vmul.f32 0.044715, %v6275_v55  ;;  %v3357_v61 = vmul.f32 0.044715, %v6278_v56  ;;  %v3375_v12 = vmul.f32 %v3351_v15, %v6265_v39  ;;  %v3377_v33 = vmul.f32 %v3353_v58, %v6268_v42 }
 0xa7f   : > { %v3378_v36 = vmul.f32 %v3354_v0, %v6272_v52  ;;  %v3398_v20 = vmul.f32 %v3374_v54, %v6259_v59  ;;  %v3400_v37 = vmul.f32 %v3376_v5, %v6262_v28 }
 0xa80   : > { %v3246_v7 = vpop.f32.mrb[40].mxu1  ;;  %v3309_v23 = vpop.f32.mrb[44].mxu0  ;;  %v3379_v26 = vmul.f32 %v3355_v53, %v6275_v55  ;;  %v3381_v34 = vmul.f32 %v3357_v61, %v6278_v56  ;;  %v3399_v44 = vmul.f32 %v3375_v12, %v6265_v39  ;;  %v3401_v40 = vmul.f32 %v3377_v33, %v6268_v42 }
 0xa81   : > { %v6293_v62 = vadd.f32 %v3246_v7, %v6203_v60  ;;  %v6296_v63 = vadd.f32 %v3309_v23, %v6207_v1  ;;  %v3248_v21 = vpop.f32.mrb[41].mxu1  ;;  %v3311_v25 = vpop.f32.mrb[45].mxu0  ;;  %v3402_v48 = vmul.f32 %v3378_v36, %v6272_v52 }
 0xa82   : > { %v6301_v27 = vadd.f32 %v3248_v21, %v6211_v3  ;;  %v6304_v29 = vadd.f32 %v3311_v25, %v6213_v6  ;;  %v3250_v9 = vpop.f32.mrb[42].mxu1  ;;  %v3313_v19 = vpop.f32.mrb[46].mxu0  ;;  %v3403_v4 = vmul.f32 %v3379_v26, %v6275_v55  ;;  %v3423_v58 = vadd.f32 %v3399_v44, %v6265_v39 }
 0xa83   : > { %v6309_v14 = vadd.f32 %v3250_v9, %v6203_v60  ;;  %v6312_v35 = vadd.f32 %v3313_v19, %v6207_v1  ;;  %v3252_v49 = vpop.f32.mrb[43].mxu1  ;;  %v3315_v17 = vpop.f32.mrb[47].mxu0  ;;  %v3380_v60 = vmul.f32 %v3356_v11, %v6282_v57  ;;  %v3358_v43 = vmul.f32 0.044715, %v6293_v62 }
 0xa84   : > { %v3359_v24 = vmul.f32 0.044715, %v6301_v27  ;;  %v6317_v13 = vadd.f32 %v3252_v49, %v6211_v3  ;;  %v6320_v30 = vadd.f32 %v3315_v17, %v6213_v6  ;;  %v3360_v1 = vmul.f32 0.044715, %v6296_v63 }
 0xa85   : > { %v3361_v47 = vmul.f32 0.044715, %v6304_v29  ;;  %v3405_v6 = vmul.f32 %v3381_v34, %v6278_v56  ;;  %v3362_v16 = vmul.f32 0.044715, %v6309_v14  ;;  %v3364_v8 = vmul.f32 0.044715, %v6312_v35 }
 0xa86   : > { %v3363_v38 = vmul.f32 0.044715, %v6317_v13  ;;  %v3365_v3 = vmul.f32 0.044715, %v6320_v30  ;;  %v3383_v32 = vmul.f32 %v3359_v24, %v6301_v27  ;;  %v3404_v18 = vmul.f32 %v3380_v60, %v6282_v57 }
 0xa87   : > { %v3382_v50 = vmul.f32 %v3358_v43, %v6293_v62  ;;  %v3384_v15 = vmul.f32 %v3360_v1, %v6296_v63  ;;  %v3385_v45 = vmul.f32 %v3361_v47, %v6304_v29  ;;  %v3427_v61 = vadd.f32 %v3403_v4, %v6275_v55 }
 0xa88   : > { %v3387_v41 = vmul.f32 %v3363_v38, %v6317_v13  ;;  %v3389_v53 = vmul.f32 %v3365_v3, %v6320_v30  ;;  %v3386_v54 = vmul.f32 %v3362_v16, %v6309_v14  ;;  %v3388_v0 = vmul.f32 %v3364_v8, %v6312_v35 }
 0xa89   : > { %v3425_v7 = vadd.f32 %v3401_v40, %v6268_v42  ;;  %v3429_v23 = vadd.f32 %v3405_v6, %v6278_v56  ;;  %v3407_v12 = vmul.f32 %v3383_v32, %v6301_v27  ;;  %v3447_v21 = vmul.f32 0.7978846, %v3423_v58 }
 0xa8a   : > { %v3411_v11 = vmul.f32 %v3387_v41, %v6317_v13  ;;  %v3451_v25 = vmul.f32 0.7978846, %v3427_v61  ;;  %v3422_v9 = vadd.f32 %v3398_v20, %v6259_v59  ;;  %v3426_v19 = vadd.f32 %v3402_v48, %v6272_v52 }
 0xa8b   : > { %v3449_v5 = vmul.f32 0.7978846, %v3425_v7  ;;  %v3453_v26 = vmul.f32 0.7978846, %v3429_v23  ;;  %v3409_v33 = vmul.f32 %v3385_v45, %v6304_v29  ;;  %v3413_v34 = vmul.f32 %v3389_v53, %v6320_v30 }
 0xa8c   : > { %5222 = vtanh.f32 %v3447_v21  ;;  %v3424_v49 = vadd.f32 %v3400_v37, %v6262_v28  ;;  %v3446_v17 = vmul.f32 0.7978846, %v3422_v9  ;;  %v3450_v36 = vmul.f32 0.7978846, %v3426_v19 }
 0xa8d   : > { %5224 = vtanh.f32 %v3451_v25  ;;  %v3428_v24 = vadd.f32 %v3404_v18, %v6282_v57  ;;  %v3406_v44 = vmul.f32 %v3382_v50, %v6293_v62  ;;  %v3410_v60 = vmul.f32 %v3386_v54, %v6309_v14 }
 0xa8e   : > { %5226 = vtanh.f32 %v3449_v5  ;;  %v3448_v43 = vmul.f32 0.7978846, %v3424_v49  ;;  %v3431_v4 = vadd.f32 %v3407_v12, %v6301_v27  ;;  %v3435_v47 = vadd.f32 %v3411_v11, %v6317_v13 }
 0xa8f   : > { %5228 = vtanh.f32 %v3453_v26  ;;  %v3452_v1 = vmul.f32 0.7978846, %v3428_v24  ;;  %v3408_v38 = vmul.f32 %v3384_v15, %v6296_v63  ;;  %v3412_v3 = vmul.f32 %v3388_v0, %v6312_v35 }
 0xa90   : > { %5230 = vtanh.f32 %v3446_v17  ;;  %v3433_v40 = vadd.f32 %v3409_v33, %v6304_v29  ;;  %v3455_v6 = vmul.f32 0.7978846, %v3431_v4  ;;  %v3459_v16 = vmul.f32 0.7978846, %v3435_v47 }
 0xa91   : > { %5232 = vtanh.f32 %v3450_v36  ;;  %v3437_v8 = vadd.f32 %v3413_v34, %v6320_v30  ;;  %v3430_v32 = vadd.f32 %v3406_v44, %v6293_v62  ;;  %v3434_v41 = vadd.f32 %v3410_v60, %v6309_v14 }
 0xa92   : > { %5234 = vtanh.f32 %v3448_v43  ;;  %v3457_v20 = vmul.f32 0.7978846, %v3433_v40  ;;  %v3432_v48 = vadd.f32 %v3408_v38, %v6296_v63  ;;  %v3436_v15 = vadd.f32 %v3412_v3, %v6312_v35 }
 0xa93   : > { %5236 = vtanh.f32 %v3452_v1  ;;  %v3461_v37 = vmul.f32 0.7978846, %v3437_v8  ;;  %v3454_v18 = vmul.f32 0.7978846, %v3430_v32  ;;  %v3458_v50 = vmul.f32 0.7978846, %v3434_v41 }
 0xa94   : > { %5238 = vtanh.f32 %v3455_v6  ;;  %v3456_v53 = vmul.f32 0.7978846, %v3432_v48  ;;  %v3460_v54 = vmul.f32 0.7978846, %v3436_v15  ;;  %v3327_v7 = vmul.f32 0.5, %v6265_v39 }
 0xa95   : > { %5240 = vtanh.f32 %v3459_v16  ;;  %v3331_v23 = vmul.f32 0.5, %v6275_v55  ;;  %v3329_v21 = vmul.f32 0.5, %v6268_v42  ;;  %v3333_v25 = vmul.f32 0.5, %v6278_v56 }
 0xa96   : > { %v5223_v45 = vpop.eup %5222  ;;  %5242 = vtanh.f32 %v3457_v20  ;;  %v3326_v49 = vmul.f32 0.5, %v6259_v59  ;;  %v3330_v39 = vmul.f32 0.5, %v6272_v52  ;;  %v3328_v60 = vmul.f32 0.5, %v6262_v28 }
 0xa97   : > { %v5225_v58 = vpop.eup %5224  ;;  %v3495_v61 = vadd.f32 1.0, %v5223_v45  ;;  %5244 = vtanh.f32 %v3461_v37  ;;  %v3332_v43 = vmul.f32 0.5, %v6282_v57  ;;  %v3335_v40 = vmul.f32 0.5, %v6301_v27 }
 0xa98   : > { %v5227_v0 = vpop.eup %5226  ;;  %v3499_v12 = vadd.f32 1.0, %v5225_v58  ;;  %5246 = vtanh.f32 %v3454_v18  ;;  %v3339_v6 = vmul.f32 0.5, %v6317_v13  ;;  %v3337_v41 = vmul.f32 0.5, %v6304_v29 }
 0xa99   : > { %v5229_v11 = vpop.eup %5228  ;;  %v3497_v5 = vadd.f32 1.0, %v5227_v0  ;;  %5248 = vtanh.f32 %v3458_v50  ;;  %v3519_v9 = vmul.f32 %v3495_v61, %v3327_v7  ;;  %v3341_v48 = vmul.f32 0.5, %v6320_v30 }
 0xa9a   : > { %v5231_v26 = vpop.eup %5230  ;;  %v3523_v19 = vmul.f32 %v3499_v12, %v3331_v23  ;;  %v3501_v33 = vadd.f32 1.0, %v5229_v11  ;;  %5250 = vtanh.f32 %v3456_v53  ;;  %v3334_v58 = vmul.f32 0.5, %v6293_v62 }
 0xa9b   : > { %v5233_v34 = vpop.eup %5232  ;;  %v3494_v55 = vadd.f32 1.0, %v5231_v26  ;;  %5252 = vtanh.f32 %v3460_v54  ;;  %v3521_v24 = vmul.f32 %v3497_v5, %v3329_v21  ;;  %v3338_v61 = vmul.f32 0.5, %v6309_v14 }
 0xa9c   : > { %v5235_v17 = vpop.eup %5234  ;;  %v3539_v36 = vpack.c.bf16 %v3523_v19, %v3519_v9  ;;  %v3525_v42 = vmul.f32 %v3501_v33, %v3333_v25  ;;  %v3498_v44 = vadd.f32 1.0, %v5233_v34  ;;  %v3336_v11 = vmul.f32 0.5, %v6296_v63 }
 0xa9d   : > { %v5237_v56 = vpop.eup %5236  ;;  %v3496_v1 = vadd.f32 1.0, %v5235_v17  ;;  %v3518_v38 = vmul.f32 %v3494_v55, %v3326_v49  ;;  %v3340_v21 = vmul.f32 0.5, %v6312_v35 }
 0xa9e   : > { %v5239_v4 = vpop.eup %5238  ;;  %3778 = vmatprep.mubr.bf16.mxu1 %v3539_v36  ;;  %v3541_v47 = vpack.c.bf16 %v3525_v42, %v3521_v24  ;;  %v3522_v59 = vmul.f32 %v3498_v44, %v3330_v39  ;;  %v3500_v3 = vadd.f32 1.0, %v5237_v56 }
 0xa9f   : > { %v5241_v52 = vpop.eup %5240  ;;  %v3503_v16 = vadd.f32 1.0, %v5239_v4  ;;  %v3520_v37 = vmul.f32 %v3496_v1, %v3328_v60  ;;  %v4429_v1 = vld [vmem:[%s6522_s19] ss:$0 sm:$0xff] }
 0xaa0   : > { %v5243_v8 = vpop.eup %5242  ;;  %3835 = vmatprep.mubr.bf16.mxu0 %v3541_v47  ;;  %v3538_v20 = vpack.c.bf16 %v3522_v59, %v3518_v38  ;;  %v3524_v28 = vmul.f32 %v3500_v3, %v3332_v43  ;;  %v3507_v32 = vadd.f32 1.0, %v5241_v52 }
 0xaa1   : > { %v5245_v57 = vpop.eup %5244  ;;  %v3505_v18 = vadd.f32 1.0, %v5243_v8  ;;  %v3527_v45 = vmul.f32 %v3503_v16, %v3335_v40 }
 0xaa2   : > { %v5247_v50 = vpop.eup %5246  ;;  %3779 = vmatmul.mubr.bf16.gmra.mrb[48].mxu1 %v3538_v20  ;;  %v3540_v15 = vpack.c.bf16 %v3524_v28, %v3520_v37  ;;  %v3531_v27 = vmul.f32 %v3507_v32, %v3339_v6  ;;  %v3509_v53 = vadd.f32 1.0, %v5245_v57 }
 0xaa3   : > { %v5249_v13 = vpop.eup %5248  ;;  %v3502_v54 = vadd.f32 1.0, %v5247_v50  ;;  %v3529_v23 = vmul.f32 %v3505_v18, %v3337_v41 }
 0xaa4   : > { %v5251_v0 = vpop.eup %5250  ;;  %3836 = vmatmul.mubr.bf16.gmra.mrb[52].mxu0 %v3540_v15  ;;  %v3543_v7 = vpack.c.bf16 %v3531_v27, %v3527_v45  ;;  %v3533_v29 = vmul.f32 %v3509_v53, %v3341_v48  ;;  %v3506_v12 = vadd.f32 1.0, %v5249_v13 }
 0xaa5   : > { %v5253_v30 = vpop.eup %5252  ;;  %v3504_v25 = vadd.f32 1.0, %v5251_v0  ;;  %v3526_v26 = vmul.f32 %v3502_v54, %v3334_v58 }
 0xaa6   : > { %3786 = vmatprep.mubr.bf16.mxu1 %v3543_v7  ;;  %v3545_v5 = vpack.c.bf16 %v3533_v29, %v3529_v23  ;;  %v3530_v9 = vmul.f32 %v3506_v12, %v3338_v61  ;;  %v3508_v62 = vadd.f32 1.0, %v5253_v30 }
 0xaa7   : > { %v3528_v19 = vmul.f32 %v3504_v25, %v3336_v11 }
 0xaa8   : > { %3843 = vmatprep.mubr.bf16.mxu0 %v3545_v5  ;;  %v3542_v14 = vpack.c.bf16 %v3530_v9, %v3526_v26  ;;  %v3532_v33 = vmul.f32 %v3508_v62, %v3340_v21 }
 0xaaa   : > { %3787 = vmatmul.mubr.bf16.gmra.mrb[52].mxu1 %v3542_v14  ;;  %v3544_v34 = vpack.c.bf16 %v3532_v33, %v3528_v19  ;;  %v5328_v14 = vmov (!%p4430_p6), 0.0  }
 0xaab   : > { %4802 = vmatprep.subr.bf16.mxu0 (!%p4430_p6), %v5328_v14 }
 0xaac   : > { %3844 = vmatmul.mubr.bf16.gmra.mrb[56].mxu0 %v3544_v34 }
 0xaad   : > { %4818 = vmatprep.mubr.msk.bf16.mxu0 (!%p4430_p6), %vm5329_vm7, %v5328_v14 }
 0xb44   : > { %v4621_v49 = vpop.f32.mrb[44].mxu1 }
 0xb45   : > { %v4622_v39 = vpop.f32.mrb[45].mxu1 }
 0xb46   : > { %v4655_v55 = vpop.f32.mrb[48].mxu0  ;;  %v4623_v63 = vadd.f32 %v4622_v39, %v4621_v49  ;;  %v4624_v17 = vpop.f32.mrb[46].mxu1 }
 0xb47   : > { %v4656_v35 = vpop.f32.mrb[49].mxu0  ;;  %v4625_v36 = vpop.f32.mrb[47].mxu1 }
 0xb48   : > { %v4657_v24 = vadd.f32 %v4656_v35, %v4655_v55  ;;  %v4658_v42 = vpop.f32.mrb[50].mxu0  ;;  %v4626_v44 = vadd.f32 %v4625_v36, %v4624_v17  ;;  %v5262_v55 = vld [vmem:[%s6487_s17 + $0x10] sm:$0xff] (!%p4430_p6)   ;;  %v5264_v17 = vld [vmem:[%s6487_s17 + $0x20] sm:$0xff] (!%p4430_p6)   ;;  %v5265_v35 = vld [vmem:[%s6487_s17 + $0x28] sm:$0xff] (!%p4430_p6)  }
 0xb49   : > { %v4659_v56 = vpop.f32.mrb[51].mxu0  ;;  %v5266_v36 = vld [vmem:[%s6487_s17 + $0x30] sm:$0xff] (!%p4430_p6)  }
 0xb4a   : > { %v3830_v60 = vadd.f32 %v4657_v24, %v4623_v63  ;;  %v4660_v43 = vadd.f32 %v4659_v56, %v4658_v42  ;;  %v5263_v63 = vld [vmem:[%s6487_s17 + $0x18] sm:$0xff] (!%p4430_p6)  }
 0xb4b   : > { %v5267_v24 = vld [vmem:[%s6487_s17 + $0x38] sm:$0xff] (!%p4430_p6)  }
 0xb4c   : > { %v3852_v4 = vadd.f32 %v3830_v60, %v6087_v2  ;;  %v3833_v47 = vadd.f32 %v4660_v43, %v4626_v44  ;;  %v4431_v43 = vld [vmem:[%s6523_s22] ss:$0 sm:$0xff] (!%p4430_p6) }
 0xb4e   : > { %v3864_v38 = vadd.f32 %v4429_v1, %v3852_v4  ;;  %v3853_v59 = vadd.f32 %v3833_v47, %v6089_v51  ;;  %v4432_v4 = vld [vmem:[%s6524_s16] ss:$0 sm:$0xff] (!%p4430_p6) }
 0xb50   : > { %3870 = vst [vmem:[#allocation2] sm:$0xff] %v3864_v38  ;;  %v3865_v3 = vadd.f32 %v4429_v1, %v3853_v59 }
 0xb52   : > { %3871 = vst [vmem:[#allocation2 + $0x8] sm:$0xff] %v3865_v3  ;;  %v4433_v3 = vld [vmem:[%s6525_s23] ss:$0 sm:$0xff] (!%p4430_p6) }
 0xb75   : > { %v4627_v52 = vpop.f32.mrb[48].mxu1 }
 0xb76   : > { %v4628_v40 = vpop.f32.mrb[49].mxu1 }
 0xb77   : > { %v4661_v6 = vpop.f32.mrb[52].mxu0  ;;  %v4629_v16 = vadd.f32 %v4628_v40, %v4627_v52  ;;  %v4630_v8 = vpop.f32.mrb[50].mxu1 }
 0xb78   : > { %v4662_v20 = vpop.f32.mrb[53].mxu0  ;;  %v4631_v37 = vpop.f32.mrb[51].mxu1 }
 0xb79   : > { %v4663_v28 = vadd.f32 %v4662_v20, %v4661_v6  ;;  %v4664_v32 = vpop.f32.mrb[54].mxu0  ;;  %v4632_v57 = vadd.f32 %v4631_v37, %v4630_v8 }
 0xb7a   : > { %v4665_v41 = vpop.f32.mrb[55].mxu0 }
 0xb7b   : > { %v3838_v48 = vadd.f32 %v4663_v28, %v4629_v16  ;;  %v4666_v2 = vadd.f32 %v4665_v41, %v4664_v32 }
 0xb7d   : > { %v3854_v18 = vadd.f32 %v3838_v48, %v6093_v31  ;;  %v3841_v50 = vadd.f32 %v4666_v2, %v4632_v57  ;;  %v4633_v51 = vpop.f32.mrb[52].mxu1 }
 0xb7e   : > { %v4634_v15 = vpop.f32.mrb[53].mxu1 }
 0xb7f   : > { %v3866_v45 = vadd.f32 %v4429_v1, %v3854_v18  ;;  %v3855_v27 = vadd.f32 %v3841_v50, %v6095_v10  ;;  %v4667_v53 = vpop.f32.mrb[56].mxu0  ;;  %v4635_v13 = vadd.f32 %v4634_v15, %v4633_v51  ;;  %v4636_v58 = vpop.f32.mrb[54].mxu1 }
 0xb80   : > { %v4668_v61 = vpop.f32.mrb[57].mxu0  ;;  %v4637_v54 = vpop.f32.mrb[55].mxu1 }
 0xb81   : > { %3872 = vst [vmem:[#allocation2 + $0x10] sm:$0xff] %v3866_v45  ;;  %v3867_v0 = vadd.f32 %v4429_v1, %v3855_v27  ;;  %v4669_v7 = vadd.f32 %v4668_v61, %v4667_v53  ;;  %v4670_v23 = vpop.f32.mrb[58].mxu0  ;;  %v4638_v29 = vadd.f32 %v4637_v54, %v4636_v58 }
 0xb82   : > { %v4671_v12 = vpop.f32.mrb[59].mxu0 }
 0xb83   : > { %3873 = vst [vmem:[#allocation2 + $0x18] sm:$0xff] %v3867_v0  ;;  %v3846_v30 = vadd.f32 %v4669_v7, %v4635_v13  ;;  %v4672_v31 = vadd.f32 %v4671_v12, %v4670_v23  ;;  %v3900_v26 = vrot.slane (!%p4430_p6), %v3867_v0, 7 }
 0xb85   : > { %v3856_v11 = vadd.f32 %v3846_v30, %v6099_v46  ;;  %v3849_v21 = vadd.f32 %v4672_v31, %v4638_v29  ;;  %3879 = sbr.rel (%p4430_p6) target bundleno = 3480 (0xd98), region = 104  ;;  %v3903_v9 = vsel (!%p4430_p6), %vm3902_vm5, %v3864_v38, %v3900_v26  ;;  %v5260_v46 = vld [vmem:[%s6487_s17] sm:$0xff] (!%p4430_p6)  }
 0xb86   : > { %v3905_v62 = vsel (!%p4430_p6), %vm3904_vm6, %v3903_v9, 0.0  ;;  %4803 = vmatpush3.bf16.msra.mxu0 (!%p4430_p6), %v5260_v46 }
 0xb87   : > { %v3868_v25 = vadd.f32 %v4429_v1, %v3856_v11  ;;  %v3857_v10 = vadd.f32 %v3849_v21, %v6101_v22  ;;  %3906 = vadd.xlane.f32.xlu0 (!%p4430_p6), %v3905_v62  ;;  %v5261_v22 = vld [vmem:[%s6487_s17 + $0x8] sm:$0xff] (!%p4430_p6)   ;;  %4804 = vmatprep.subr.bf16.mxu0 (!%p4430_p6), %v5328_v14 }
 0xb89   : > { %3874 = vst [vmem:[#allocation2 + $0x20] sm:$0xff] %v3868_v25  ;;  %v3869_v5 = vadd.f32 %v4429_v1, %v3857_v10 }
 0xb8a   : > { %4805 = vmatpush3.bf16.msra.mxu0 (!%p4430_p6), %v5261_v22 }
 0xb8b   : > { %3875 = vst [vmem:[#allocation2 + $0x28] sm:$0xff] %v3869_v5  ;;  %4806 = vmatprep.subr.bf16.mxu0 (!%p4430_p6), %v5328_v14 }
 0xb8e   : > { %4807 = vmatpush3.bf16.msra.mxu0 %v5262_v55 }
 0xb8f   : > { %4808 = vmatprep.subr.bf16.mxu0 %v5328_v14 }
 0xb92   : > { %4809 = vmatpush3.bf16.msra.mxu0 %v5263_v63 }
 0xb93   : > { %4810 = vmatprep.subr.bf16.mxu0 %v5328_v14 }
 0xb96   : > { %4811 = vmatpush3.bf16.msra.mxu0 %v5264_v17 }
 0xb97   : > { %4812 = vmatprep.subr.bf16.mxu0 %v5328_v14 }
 0xb9a   : > { %4813 = vmatpush3.bf16.msra.mxu0 %v5265_v35 }
 0xb9b   : > { %4814 = vmatprep.subr.bf16.mxu0 %v5328_v14 }
 0xb9e   : > { %4815 = vmatpush3.bf16.msra.mxu0 %v5266_v36 }
 0xb9f   : > { %4816 = vmatprep.subr.bf16.mxu0 %v5328_v14 }
 0xba2   : > { %4817 = vmatpush3.bf16.msra.mxu0 %v5267_v24 }
 0xc14   : > { %v3907_v19 = vpop.xlane.xlu0 %3906 }
 0xc15   : > { %v3908_v33 = vmul.f32 0.0078125, %v3907_v19 }
 0xc17   : > { %v3909_v34 = vsub.f32 %v3903_v9, %v3908_v33 }
 0xc19   : > { %v3910_v49 = vmul.f32 %v3909_v34, %v3909_v34 }
 0xc1b   : > { %v3911_v39 = vsel %vm3904_vm6, %v3910_v49, 0.0 }
 0xc1c   : > { %3912 = vadd.xlane.f32.xlu0 %v3911_v39 }
 0xca9   : > { %v3913_v42 = vpop.xlane.xlu0 %3912 }
 0xcaa   : > { %v3914_v44 = vmul.f32 0.0078125, %v3913_v42 }
 0xcac   : > { %v3915_v56 = vadd.f32 1e-06, %v3914_v44 }
 0xcae   : > { %5268 = vrsqrt.f32 %v3915_v56 }
 0xcb8   : > { %v5269_v60 = vpop.eup %5268 }
 0xcb9   : > { %v3917_v1 = vmul.f32 %v5269_v60, %v3909_v34 }
 0xcbb   : > { %v3924_v47 = vmul.f32 %v4431_v43, %v3917_v1 }
 0xcbd   : > { %v3931_v38 = vadd.f32 %v4432_v4, %v3924_v47 }
 0xcbf   : > { %v3932_v59 = vpack.c.bf16 %v3931_v38, %v3931_v38 }
 0xcc1   : > { %4819 = vmatmul.mubr.bf16.vlgmr.msra.gmra.mrb[0].mxu0 %v3932_v59 }
 0xd94   : > { %v4021_v52 = vpop.f32.mrb[0].mxu0 }
 0xd95   : > { %v4022_v40 = vadd.f32 %v4433_v3, %v4021_v52  ;;  %v4820_v6 = vpop.f32.mrb[1].mxu0 }
 0xd96   : > { %v4024_v16 = vpop.f32.mrb[2].mxu0 }
 0xd97   : > { %4027 = vst [vmem:[#allocation3] sm:$0x3] %v4022_v40  ;;  %v4821_v8 = vpop.f32.mrb[3].mxu0 }
 0xd98 PF: > { %s6526_s29 = sld [smem:[#allocation7_spill]]  ;;  %s5330_s30 = smov [#allocation3]  }
 0xd99   : > { %s4037_s28 = sshll.u32 %s5330_s30, 4  ;;  %s4038_s28 = int_to_ptr.vmem [resolvable:$true] %s4037_s28 }
 0xd9a   : > { %s5270_s20 = scalar_lea.vmem %s4038_s28, 32  ;;  %p5277_p11 = scmp.lt.s32.totalorder %s4038_s28, %s4038_s28 }
 0xd9b   : > { %p5271_p8 = scmp.ne.s32.totalorder %s4038_s28, %s5270_s20  ;;  %p5278_p12 = scmp.lt.s32.totalorder %s5270_s20, %s5270_s20 }
 0xd9d   : > { %p5279_p13 = por %p5278_p12, %p5277_p11 }
 0xd9e   : > { %s6527_s2 = sadd.s32 4294967295, %s6526_s29  }
 0xd9f   : > { %p6435_p7 = scmp.eq.s32.totalorder %s6527_s2, 1 }
 0xda1   : > { %p5272_p9 = pnand %p5271_p8, %p6435_p7 }
 0xda3   : > { %p5273_p10 = pneg %p5272_p9 }
 0xda5   : > { %p5280_p0 = pnand %p5279_p13, %p5273_p10 }
 0xda7   : > { %5283 = shalt.err (!%p5280_p0)
}
 0xda8   : > { %s6529_s21 = sld [smem:[#allocation18_spill]] }
 0xdae   : > { %s5284_s15 = scalar_lea.hbm %s6529_s21, 32 }
 0xdaf   : > { %p5285_p1 = scmp.ne.s32.totalorder %s6529_s21, %s5284_s15  ;;  %p5290_p4 = scmp.lt.u32.totalorder %s5284_s15, %s6529_s21 }
 0xdb1   : > { %p5286_p2 = pnand %p5285_p1, %p6435_p7 }
 0xdb3   : > { %p5287_p3 = pneg %p5286_p2 }
 0xdb5   : > { %p5292_p5 = pnand %p5290_p4, %p5287_p3 }
 0xdb7   : > { %5295 = shalt.err (!%p5292_p5)
}
 0xdb8   : > { %4853 = dma.vmem_to_hbm [thread:$0]  (%p6435_p7), %s4038_s28, 32, %s6529_s21, [#allocation4]  }
 0xdb9   : > { %5309 = dma.done.wait (%p6435_p7), [#allocation4], 32  }
 0xdba   : > { %5311 = vsyncadd (%p6435_p7), [#allocation4], 4294967264 }
 0xdbb PF: > { %s6530_s27 = sld [smem:[#allocation7_spill]]  ;;  %s6531_s0 = sld [smem:[#allocation6_spill]] }
 0xdbc   : > { %s6532_s30 = sld [smem:[#allocation8_spill]] }
 0xdc1   : > { %s30_s20 = sadd.s32 1, %s6530_s27  }
 0xdc2   : > { %p27_p6 = scmp.ge.s32.totalorder %s30_s20, 4  }
 0xdc4   :  { %29 = sbr.rel (!%p27_p6) target bundleno = 13 (0xd), region = 171 }
 0xdcb   :  { %4050 = vsyncpa [#allocation4], 1 }
 0xdcc   :  { %4052 = vsyncpa [#allocation4 + $0x1], 1 }

</bundles_post_ra>
